<compile_context>
chip_gen: v6e
topology: v6e:2x2x1
jax: 0.10.0
libtpu: 0.0.40
codegen_flags: <defaults>
</compile_context>

<pallas_src>
import functools

import jax
import jax.numpy as jnp
from jax.experimental import pallas as pl
from jax.experimental.pallas import tpu as pltpu

H1, H2 = 80, 40          # module defaults: hidden_size=[80, 40]
BN_EPS = 1e-9            # Dice: nn.BatchNorm1d(num_features, eps=1e-09)


# --------------------------------------------------------------------------
# Pallas kernel: one batch block of LocalActivationUnit.forward (eval mode).
# Layout: batch on lanes, channels (H1) on sublanes, T as a small static loop.
# --------------------------------------------------------------------------
def _lau_kernel(q_ref, ub_ref,                      # (E,TB) bf16, (T,E,TB) bf16
                w1qT_ref, w1uT_ref, w1pT_ref,       # (H1,E) bf16 each
                b1_ref,                             # (H1,1) f32
                alpha_ref, dsc_ref, dsh_ref,        # Dice: (H1,1) f32 each
                w23_ref, b23_ref,                   # (H1,1) f32, (1,1) f32
                out_ref):                           # (T,TB) f32, lane-dense
    T = ub_ref.shape[0]

    q2 = q_ref[...]                                  # (E, TB) bf16
    w1uT = w1uT_ref[...]                             # (H1, E) bf16
    w1pT = w1pT_ref[...]                             # (H1, E) bf16
    alpha = alpha_ref[...]                           # (H1, 1) f32
    dsc = dsc_ref[...]
    dsh = dsh_ref[...]
    w23 = w23_ref[...]                               # (H1, 1) f32
    b23 = b23_ref[...]                               # (1, 1)  f32

    # Query projection hoisted out of the T axis (once per batch block).
    # bf16 MXU operands, f32 accumulation.
    hq = jnp.dot(w1qT_ref[...], q2, preferred_element_type=jnp.float32)   # (H1,TB)
    hq = hq + b1_ref[...]                            # lane-broadcast of (H1,1)

    # T is a short behavior window in this module; static unroll keeps every
    # iteration visible to the scheduler (8 small matmuls per block).
    for t in range(T):
        u_t = ub_ref[t]                              # (E, TB) bf16
        p_t = u_t * q2                               # query * behavior term
        h_t = (hq
               + jnp.dot(w1uT, u_t, preferred_element_type=jnp.float32)
               + jnp.dot(w1pT, p_t, preferred_element_type=jnp.float32))  # (H1,TB)

        # Dice(H1, dim=3), eval: BN folded into per-channel scale/shift (f32).
        x_p = jax.nn.sigmoid(h_t * dsc + dsh)
        d_t = (alpha * (1.0 - x_p) + x_p) * h_t

        # Dropout = id (eval); Linear(80,40)->Linear(40,1) folded into w23/b23.
        # Per-channel contraction over the sublane axis -> lane-dense row.
        row = jnp.sum(d_t * w23, axis=0, keepdims=True) + b23             # (1,TB)
        out_ref[pl.ds(t, 1), :] = row


# --------------------------------------------------------------------------
# Batch-block selection: batch is the lane axis, so a block must be a
# multiple of 128 lanes (or the whole batch).  Target a few thousand rows
# per grid step and keep >= 2 grid steps for v7x megacore sharding.
# --------------------------------------------------------------------------
def _pick_batch_block(B, T, target_rows):
    if B < 256 or B % 128 != 0:
        return B                                     # single resident block
    tb = max(128, min(B // 2, max(target_rows // T, 128)))
    tb = (tb // 128) * 128
    while B % tb != 0:                               # largest 128-multiple divisor
        tb -= 128
    return max(tb, 128)


# --------------------------------------------------------------------------
# Wrapper: weight folding + layout plumbing + batch-gridded pallas_call
# --------------------------------------------------------------------------
@functools.partial(jax.jit, static_argnames=("block_rows",))
def local_activation_unit(query, user_behavior, params, *, block_rows=4096):
    B, T, E = user_behavior.shape
    assert query.shape == (B, 1, E)
    h1 = params["w2"].shape[0]

    TB = _pick_batch_block(B, T, block_rows)
    grid = (B // TB,)

    # ---- activations: bf16, batch on the lane axis (layout plumbing) -------
    q_t = query.reshape(B, E).T.astype(jnp.bfloat16)                      # (E, B)
    ub_t = jnp.transpose(user_behavior, (1, 2, 0)).astype(jnp.bfloat16)   # (T, E, B)

    # ---- weight preprocessing (plain XLA, tiny) -----------------------------
    w1 = params["w1"]                                   # (4E, H1), (in,out) layout
    w1_q, w1_u, w1_d, w1_p = w1[:E], w1[E:2 * E], w1[2 * E:3 * E], w1[3 * E:]
    bf = lambda a: a.astype(jnp.bfloat16)
    w1qT = bf((w1_q + w1_d).T)                          # (H1, E): query +W_diff
    w1uT = bf((w1_u - w1_d).T)                          # (H1, E): behavior -W_diff
    w1pT = bf(w1_p.T)                                   # (H1, E): product term

    b1c = params["b1"].reshape(h1, 1)
    alpha_c = params["alpha"].reshape(h1, 1)
    scale = params["bn_gamma"] * jax.lax.rsqrt(params["bn_var"] + BN_EPS)
    shift = params["bn_beta"] - params["bn_mean"] * scale
    dsc = scale.reshape(h1, 1)
    dsh = shift.reshape(h1, 1)

    w23 = (params["w2"] @ params["w3"]).reshape(h1, 1)              # fold fc1b@fc2
    b23 = (params["b2"] @ params["w3"] + params["b3"]).reshape(1, 1)

    weight_args = (w1qT, w1uT, w1pT, b1c, alpha_c, dsc, dsh, w23, b23)

    in_specs = (
        [pl.BlockSpec((E, TB), lambda i: (0, i)),          # query block (lanes=TB)
         pl.BlockSpec((T, E, TB), lambda i: (0, 0, i))]    # behavior block
        + [pl.BlockSpec(a.shape, lambda i: (0, 0)) for a in weight_args]  # resident
    )

    flops = 2 * B * E * h1 + B * T * (4 * E * h1 + 10 * h1)
    transcendentals = B * T * h1
    bytes_accessed = (2 * (B * E + B * T * E)              # bf16 activations in
                      + 4 * T * B                          # f32 scores out
                      + sum(int(a.size) * a.dtype.itemsize for a in weight_args))

    out2 = pl.pallas_call(
        _lau_kernel,
        out_shape=jax.ShapeDtypeStruct((T, B), jnp.float32),
        grid=grid,
        in_specs=in_specs,
        out_specs=pl.BlockSpec((T, TB), lambda i: (0, i)),
        compiler_params=pltpu.CompilerParams(
            dimension_semantics=("parallel",),          # megacore-shardable (grid>=2)
            vmem_limit_bytes=32 * 1024 * 1024),         # v7x-safe; blocks are ~100s KiB
        cost_estimate=pl.CostEstimate(
            flops=flops, transcendentals=transcendentals,
            bytes_accessed=bytes_accessed),
    )(q_t, ub_t, *weight_args)

    return out2.T[..., None]                            # (B, T, 1), as in PyTorch


# --------------------------------------------------------------------------
# Deterministic parameters (shapes per the PyTorch __init__; random values so
# every term — biases, alpha, BN stats — is exercised numerically)
# --------------------------------------------------------------------------
def make_params(key, embedding_dim):
    E = embedding_dim
    ks = jax.random.split(key, 10)

    def xavier(k, fan_in, fan_out):                     # nn.init.xavier_normal_
        std = (2.0 / (fan_in + fan_out)) ** 0.5
        return std * jax.random.normal(k, (fan_in, fan_out), jnp.float32)

    return {
        "w1": xavier(ks[0], 4 * E, H1),                 # Linear(4E, 80) (transposed)
        "b1": 0.1 * jax.random.normal(ks[1], (1, H1), jnp.float32),
        "alpha": 0.25 * jax.random.normal(ks[2], (1, H1), jnp.float32),  # Dice alpha
        "bn_gamma": 1.0 + 0.1 * jax.random.normal(ks[3], (1, H1), jnp.float32),
        "bn_beta": 0.1 * jax.random.normal(ks[4], (1, H1), jnp.float32),
        "bn_mean": 0.1 * jax.random.normal(ks[5], (1, H1), jnp.float32),
        "bn_var": jax.random.uniform(ks[6], (1, H1), jnp.float32, 0.5, 1.5),
        "w2": xavier(ks[7], H1, H2),                    # Linear(80, 40)
        "b2": 0.1 * jax.random.normal(ks[8], (1, H2), jnp.float32),
        "w3": xavier(ks[9], H2, 1),                     # fc2: Linear(40, 1)
        "b3": jnp.zeros((1, 1), jnp.float32),
    }


# --------------------------------------------------------------------------
# Pure-JAX f32 reference (mirrors the PyTorch eval forward, no folding)
# --------------------------------------------------------------------------
def lau_reference(query, user_behavior, p):
    B, T, E = user_behavior.shape
    q = jnp.broadcast_to(query, (B, T, E))
    u = user_behavior
    att_in = jnp.concatenate([q, u, q - u, q * u], axis=-1)          # (B,T,4E)
    h1 = att_in @ p["w1"] + p["b1"]                                  # (B,T,H1)
    xn = (h1 - p["bn_mean"]) * jax.lax.rsqrt(p["bn_var"] + BN_EPS) * p["bn_gamma"] \
        + p["bn_beta"]
    x_p = jax.nn.sigmoid(xn)
    d1 = p["alpha"] * (1.0 - x_p) * h1 + x_p * h1                    # Dice
    h2 = d1 @ p["w2"] + p["b2"]                                      # Dropout = id
    return h2 @ p["w3"] + p["b3"]                                    # (B,T,1)


if __name__ == "__main__":
    key = jax.random.PRNGKey(0)
    # B chosen so the blocked path is exercised: TB=256 -> grid=(2,),
    # 2048 rows per grid step, >=2 steps for v7x megacore.
    B, T, E = 512, 8, 4                # batch, behavior length, embedding_dim (default 4)
    kq, ku, kp = jax.random.split(key, 3)
    query = jax.random.normal(kq, (B, 1, E), jnp.float32)
    user_behavior = jax.random.normal(ku, (B, T, E), jnp.float32)
    params = make_params(kp, E)

    out = local_activation_unit(query, user_behavior, params)
    out = jax.block_until_ready(out)

    ref = lau_reference(query, user_behavior, params)
    assert out.shape == (B, T, 1)
    # bf16 activations + bf16 MXU weights give ~1e-2-level deviation from the
    # pure-f32 reference; structural errors would be O(1).
    err = jnp.max(jnp.abs(out - ref))
    assert jnp.allclose(out, ref, atol=7.5e-2, rtol=5e-2), f"max abs diff {err}"

    # TODO(synk): training-mode Dropout masks and batch-statistic BatchNorm
    # inside Dice are not represented; eval-mode dense path only.
    print("KERNEL_OK")
</pallas_src>

<mosaic_0001>
module attributes {stable_mosaic.version = 11 : i64} {
  func.func @_lau_kernel(%arg0: i32, %arg1: memref<4x256xbf16, #tpu.memory_space<vmem>>, %arg2: memref<8x4x256xbf16, #tpu.memory_space<vmem>>, %arg3: memref<80x4xbf16, #tpu.memory_space<vmem>>, %arg4: memref<80x4xbf16, #tpu.memory_space<vmem>>, %arg5: memref<80x4xbf16, #tpu.memory_space<vmem>>, %arg6: memref<80x1xf32, #tpu.memory_space<vmem>>, %arg7: memref<80x1xf32, #tpu.memory_space<vmem>>, %arg8: memref<80x1xf32, #tpu.memory_space<vmem>>, %arg9: memref<80x1xf32, #tpu.memory_space<vmem>>, %arg10: memref<80x1xf32, #tpu.memory_space<vmem>>, %arg11: memref<1x1xf32, #tpu.memory_space<vmem>>, %arg12: memref<8x256xf32, #tpu.memory_space<vmem>>) attributes {dimension_semantics = [#tpu.dimension_semantics<parallel>], iteration_bounds = array<i64: 2>, scalar_prefetch = 0 : i64, scratch_operands = 0 : i64, tpu.core_type = #tpu.core_type<tc>, window_params = [{transform_indices = @transform_0, window_bounds = array<i64: 4, 256>}, {transform_indices = @transform_1, window_bounds = array<i64: 8, 4, 256>}, {pipeline_mode = #tpu.pipeline_mode<synchronous>, transform_indices = @transform_2, window_bounds = array<i64: 80, 4>}, {pipeline_mode = #tpu.pipeline_mode<synchronous>, transform_indices = @transform_3, window_bounds = array<i64: 80, 4>}, {pipeline_mode = #tpu.pipeline_mode<synchronous>, transform_indices = @transform_4, window_bounds = array<i64: 80, 4>}, {pipeline_mode = #tpu.pipeline_mode<synchronous>, transform_indices = @transform_5, window_bounds = array<i64: 80, 1>}, {pipeline_mode = #tpu.pipeline_mode<synchronous>, transform_indices = @transform_6, window_bounds = array<i64: 80, 1>}, {pipeline_mode = #tpu.pipeline_mode<synchronous>, transform_indices = @transform_7, window_bounds = array<i64: 80, 1>}, {pipeline_mode = #tpu.pipeline_mode<synchronous>, transform_indices = @transform_8, window_bounds = array<i64: 80, 1>}, {pipeline_mode = #tpu.pipeline_mode<synchronous>, transform_indices = @transform_9, window_bounds = array<i64: 80, 1>}, {pipeline_mode = #tpu.pipeline_mode<synchronous>, transform_indices = @transform_10, window_bounds = array<i64: 1, 1>}, {transform_indices = @transform_11, window_bounds = array<i64: 8, 256>}]} {
    %c0 = arith.constant 0 : index
    %c0_0 = arith.constant 0 : index
    %0 = vector.load %arg1[%c0, %c0_0] : memref<4x256xbf16, #tpu.memory_space<vmem>>, vector<4x256xbf16>
    %c0_1 = arith.constant 0 : index
    %c0_2 = arith.constant 0 : index
    %1 = vector.load %arg4[%c0_1, %c0_2] : memref<80x4xbf16, #tpu.memory_space<vmem>>, vector<80x4xbf16>
    %c0_3 = arith.constant 0 : index
    %c0_4 = arith.constant 0 : index
    %2 = vector.load %arg5[%c0_3, %c0_4] : memref<80x4xbf16, #tpu.memory_space<vmem>>, vector<80x4xbf16>
    %c0_5 = arith.constant 0 : index
    %c0_6 = arith.constant 0 : index
    %3 = vector.load %arg7[%c0_5, %c0_6] : memref<80x1xf32, #tpu.memory_space<vmem>>, vector<80x1xf32>
    %c0_7 = arith.constant 0 : index
    %c0_8 = arith.constant 0 : index
    %4 = vector.load %arg8[%c0_7, %c0_8] : memref<80x1xf32, #tpu.memory_space<vmem>>, vector<80x1xf32>
    %c0_9 = arith.constant 0 : index
    %c0_10 = arith.constant 0 : index
    %5 = vector.load %arg9[%c0_9, %c0_10] : memref<80x1xf32, #tpu.memory_space<vmem>>, vector<80x1xf32>
    %c0_11 = arith.constant 0 : index
    %c0_12 = arith.constant 0 : index
    %6 = vector.load %arg10[%c0_11, %c0_12] : memref<80x1xf32, #tpu.memory_space<vmem>>, vector<80x1xf32>
    %c0_13 = arith.constant 0 : index
    %c0_14 = arith.constant 0 : index
    %7 = vector.load %arg11[%c0_13, %c0_14] : memref<1x1xf32, #tpu.memory_space<vmem>>, vector<1x1xf32>
    %c0_15 = arith.constant 0 : index
    %c0_16 = arith.constant 0 : index
    %8 = vector.load %arg3[%c0_15, %c0_16] : memref<80x4xbf16, #tpu.memory_space<vmem>>, vector<80x4xbf16>
    %cst = arith.constant dense<0.000000e+00> : vector<80x256xf32>
    %9 = tpu.matmul %8, %0, %cst {dimension_numbers = #tpu.dot_dimension_numbers<[1], [0], [0], [1], [0, 0, 1, 1], [], []>} : vector<80x4xbf16>, vector<4x256xbf16>, vector<80x256xf32> -> vector<80x256xf32>
    %c0_17 = arith.constant 0 : index
    %c0_18 = arith.constant 0 : index
    %10 = vector.load %arg6[%c0_17, %c0_18] : memref<80x1xf32, #tpu.memory_space<vmem>>, vector<80x1xf32>
    %11 = vector.broadcast %10 : vector<80x1xf32> to vector<80x256xf32>
    %12 = arith.addf %9, %11 : vector<80x256xf32>
    %c0_19 = arith.constant 0 : index
    %c0_20 = arith.constant 0 : index
    %c0_21 = arith.constant 0 : index
    %13 = vector.load %arg2[%c0_19, %c0_20, %c0_21] : memref<8x4x256xbf16, #tpu.memory_space<vmem>>, vector<1x4x256xbf16>
    %14 = vector.shape_cast %13 : vector<1x4x256xbf16> to vector<4x256xbf16>
    %15 = arith.mulf %14, %0 : vector<4x256xbf16>
    %cst_22 = arith.constant dense<0.000000e+00> : vector<80x256xf32>
    %16 = tpu.matmul %1, %14, %cst_22 {dimension_numbers = #tpu.dot_dimension_numbers<[1], [0], [0], [1], [0, 0, 1, 1], [], []>} : vector<80x4xbf16>, vector<4x256xbf16>, vector<80x256xf32> -> vector<80x256xf32>
    %17 = arith.addf %12, %16 : vector<80x256xf32>
    %cst_23 = arith.constant dense<0.000000e+00> : vector<80x256xf32>
    %18 = tpu.matmul %2, %15, %cst_23 {dimension_numbers = #tpu.dot_dimension_numbers<[1], [0], [0], [1], [0, 0, 1, 1], [], []>} : vector<80x4xbf16>, vector<4x256xbf16>, vector<80x256xf32> -> vector<80x256xf32>
    %19 = arith.addf %17, %18 : vector<80x256xf32>
    %20 = vector.broadcast %4 : vector<80x1xf32> to vector<80x256xf32>
    %21 = arith.mulf %19, %20 : vector<80x256xf32>
    %22 = vector.broadcast %5 : vector<80x1xf32> to vector<80x256xf32>
    %23 = arith.addf %21, %22 : vector<80x256xf32>
    %24 = arith.negf %23 : vector<80x256xf32>
    %25 = math.exp %24 : vector<80x256xf32>
    %cst_24 = arith.constant 1.000000e+00 : f32
    %26 = vector.broadcast %cst_24 : f32 to vector<80x256xf32>
    %27 = arith.addf %26, %25 : vector<80x256xf32>
    %28 = arith.divf %26, %27 : vector<80x256xf32>
    %cst_25 = arith.constant 1.000000e+00 : f32
    %29 = vector.broadcast %cst_25 : f32 to vector<80x256xf32>
    %30 = arith.subf %29, %28 : vector<80x256xf32>
    %31 = vector.broadcast %3 : vector<80x1xf32> to vector<80x256xf32>
    %32 = arith.mulf %31, %30 : vector<80x256xf32>
    %33 = arith.addf %32, %28 : vector<80x256xf32>
    %34 = arith.mulf %33, %19 : vector<80x256xf32>
    %35 = vector.broadcast %6 : vector<80x1xf32> to vector<80x256xf32>
    %36 = arith.mulf %34, %35 : vector<80x256xf32>
    %cst_26 = arith.constant dense<0.000000e+00> : vector<256xf32>
    %37 = vector.multi_reduction <add>, %36, %cst_26 [0] : vector<80x256xf32> to vector<256xf32>
    %38 = vector.shape_cast %37 : vector<256xf32> to vector<1x256xf32>
    %39 = vector.broadcast %7 : vector<1x1xf32> to vector<1x256xf32>
    %40 = arith.addf %38, %39 : vector<1x256xf32>
    %c0_27 = arith.constant 0 : index
    %c0_28 = arith.constant 0 : index
    %41 = vector.load %arg12[%c0_27, %c0_28] : memref<8x256xf32, #tpu.memory_space<vmem>>, vector<1x256xf32>
    tpu.vector_store %arg12[%c0_27, %c0_28], %40 {strides = array<i32>} : memref<8x256xf32, #tpu.memory_space<vmem>>, vector<1x256xf32>,
    %c1 = arith.constant 1 : index
    %c0_29 = arith.constant 0 : index
    %c0_30 = arith.constant 0 : index
    %42 = vector.load %arg2[%c1, %c0_29, %c0_30] : memref<8x4x256xbf16, #tpu.memory_space<vmem>>, vector<1x4x256xbf16>
    %43 = vector.shape_cast %42 : vector<1x4x256xbf16> to vector<4x256xbf16>
    %44 = arith.mulf %43, %0 : vector<4x256xbf16>
    %cst_31 = arith.constant dense<0.000000e+00> : vector<80x256xf32>
    %45 = tpu.matmul %1, %43, %cst_31 {dimension_numbers = #tpu.dot_dimension_numbers<[1], [0], [0], [1], [0, 0, 1, 1], [], []>} : vector<80x4xbf16>, vector<4x256xbf16>, vector<80x256xf32> -> vector<80x256xf32>
    %46 = arith.addf %12, %45 : vector<80x256xf32>
    %cst_32 = arith.constant dense<0.000000e+00> : vector<80x256xf32>
    %47 = tpu.matmul %2, %44, %cst_32 {dimension_numbers = #tpu.dot_dimension_numbers<[1], [0], [0], [1], [0, 0, 1, 1], [], []>} : vector<80x4xbf16>, vector<4x256xbf16>, vector<80x256xf32> -> vector<80x256xf32>
    %48 = arith.addf %46, %47 : vector<80x256xf32>
    %49 = vector.broadcast %4 : vector<80x1xf32> to vector<80x256xf32>
    %50 = arith.mulf %48, %49 : vector<80x256xf32>
    %51 = vector.broadcast %5 : vector<80x1xf32> to vector<80x256xf32>
    %52 = arith.addf %50, %51 : vector<80x256xf32>
    %53 = arith.negf %52 : vector<80x256xf32>
    %54 = math.exp %53 : vector<80x256xf32>
    %cst_33 = arith.constant 1.000000e+00 : f32
    %55 = vector.broadcast %cst_33 : f32 to vector<80x256xf32>
    %56 = arith.addf %55, %54 : vector<80x256xf32>
    %57 = arith.divf %55, %56 : vector<80x256xf32>
    %cst_34 = arith.constant 1.000000e+00 : f32
    %58 = vector.broadcast %cst_34 : f32 to vector<80x256xf32>
    %59 = arith.subf %58, %57 : vector<80x256xf32>
    %60 = vector.broadcast %3 : vector<80x1xf32> to vector<80x256xf32>
    %61 = arith.mulf %60, %59 : vector<80x256xf32>
    %62 = arith.addf %61, %57 : vector<80x256xf32>
    %63 = arith.mulf %62, %48 : vector<80x256xf32>
    %64 = vector.broadcast %6 : vector<80x1xf32> to vector<80x256xf32>
    %65 = arith.mulf %63, %64 : vector<80x256xf32>
    %cst_35 = arith.constant dense<0.000000e+00> : vector<256xf32>
    %66 = vector.multi_reduction <add>, %65, %cst_35 [0] : vector<80x256xf32> to vector<256xf32>
    %67 = vector.shape_cast %66 : vector<256xf32> to vector<1x256xf32>
    %68 = vector.broadcast %7 : vector<1x1xf32> to vector<1x256xf32>
    %69 = arith.addf %67, %68 : vector<1x256xf32>
    %c1_36 = arith.constant 1 : index
    %c0_37 = arith.constant 0 : index
    %70 = vector.load %arg12[%c1_36, %c0_37] : memref<8x256xf32, #tpu.memory_space<vmem>>, vector<1x256xf32>
    tpu.vector_store %arg12[%c1_36, %c0_37], %69 {strides = array<i32>} : memref<8x256xf32, #tpu.memory_space<vmem>>, vector<1x256xf32>,
    %c2 = arith.constant 2 : index
    %c0_38 = arith.constant 0 : index
    %c0_39 = arith.constant 0 : index
    %71 = vector.load %arg2[%c2, %c0_38, %c0_39] : memref<8x4x256xbf16, #tpu.memory_space<vmem>>, vector<1x4x256xbf16>
    %72 = vector.shape_cast %71 : vector<1x4x256xbf16> to vector<4x256xbf16>
    %73 = arith.mulf %72, %0 : vector<4x256xbf16>
    %cst_40 = arith.constant dense<0.000000e+00> : vector<80x256xf32>
    %74 = tpu.matmul %1, %72, %cst_40 {dimension_numbers = #tpu.dot_dimension_numbers<[1], [0], [0], [1], [0, 0, 1, 1], [], []>} : vector<80x4xbf16>, vector<4x256xbf16>, vector<80x256xf32> -> vector<80x256xf32>
    %75 = arith.addf %12, %74 : vector<80x256xf32>
    %cst_41 = arith.constant dense<0.000000e+00> : vector<80x256xf32>
    %76 = tpu.matmul %2, %73, %cst_41 {dimension_numbers = #tpu.dot_dimension_numbers<[1], [0], [0], [1], [0, 0, 1, 1], [], []>} : vector<80x4xbf16>, vector<4x256xbf16>, vector<80x256xf32> -> vector<80x256xf32>
    %77 = arith.addf %75, %76 : vector<80x256xf32>
    %78 = vector.broadcast %4 : vector<80x1xf32> to vector<80x256xf32>
    %79 = arith.mulf %77, %78 : vector<80x256xf32>
    %80 = vector.broadcast %5 : vector<80x1xf32> to vector<80x256xf32>
    %81 = arith.addf %79, %80 : vector<80x256xf32>
    %82 = arith.negf %81 : vector<80x256xf32>
    %83 = math.exp %82 : vector<80x256xf32>
    %cst_42 = arith.constant 1.000000e+00 : f32
    %84 = vector.broadcast %cst_42 : f32 to vector<80x256xf32>
    %85 = arith.addf %84, %83 : vector<80x256xf32>
    %86 = arith.divf %84, %85 : vector<80x256xf32>
    %cst_43 = arith.constant 1.000000e+00 : f32
    %87 = vector.broadcast %cst_43 : f32 to vector<80x256xf32>
    %88 = arith.subf %87, %86 : vector<80x256xf32>
    %89 = vector.broadcast %3 : vector<80x1xf32> to vector<80x256xf32>
    %90 = arith.mulf %89, %88 : vector<80x256xf32>
    %91 = arith.addf %90, %86 : vector<80x256xf32>
    %92 = arith.mulf %91, %77 : vector<80x256xf32>
    %93 = vector.broadcast %6 : vector<80x1xf32> to vector<80x256xf32>
    %94 = arith.mulf %92, %93 : vector<80x256xf32>
    %cst_44 = arith.constant dense<0.000000e+00> : vector<256xf32>
    %95 = vector.multi_reduction <add>, %94, %cst_44 [0] : vector<80x256xf32> to vector<256xf32>
    %96 = vector.shape_cast %95 : vector<256xf32> to vector<1x256xf32>
    %97 = vector.broadcast %7 : vector<1x1xf32> to vector<1x256xf32>
    %98 = arith.addf %96, %97 : vector<1x256xf32>
    %c2_45 = arith.constant 2 : index
    %c0_46 = arith.constant 0 : index
    %99 = vector.load %arg12[%c2_45, %c0_46] : memref<8x256xf32, #tpu.memory_space<vmem>>, vector<1x256xf32>
    tpu.vector_store %arg12[%c2_45, %c0_46], %98 {strides = array<i32>} : memref<8x256xf32, #tpu.memory_space<vmem>>, vector<1x256xf32>,
    %c3 = arith.constant 3 : index
    %c0_47 = arith.constant 0 : index
    %c0_48 = arith.constant 0 : index
    %100 = vector.load %arg2[%c3, %c0_47, %c0_48] : memref<8x4x256xbf16, #tpu.memory_space<vmem>>, vector<1x4x256xbf16>
    %101 = vector.shape_cast %100 : vector<1x4x256xbf16> to vector<4x256xbf16>
    %102 = arith.mulf %101, %0 : vector<4x256xbf16>
    %cst_49 = arith.constant dense<0.000000e+00> : vector<80x256xf32>
    %103 = tpu.matmul %1, %101, %cst_49 {dimension_numbers = #tpu.dot_dimension_numbers<[1], [0], [0], [1], [0, 0, 1, 1], [], []>} : vector<80x4xbf16>, vector<4x256xbf16>, vector<80x256xf32> -> vector<80x256xf32>
    %104 = arith.addf %12, %103 : vector<80x256xf32>
    %cst_50 = arith.constant dense<0.000000e+00> : vector<80x256xf32>
    %105 = tpu.matmul %2, %102, %cst_50 {dimension_numbers = #tpu.dot_dimension_numbers<[1], [0], [0], [1], [0, 0, 1, 1], [], []>} : vector<80x4xbf16>, vector<4x256xbf16>, vector<80x256xf32> -> vector<80x256xf32>
    %106 = arith.addf %104, %105 : vector<80x256xf32>
    %107 = vector.broadcast %4 : vector<80x1xf32> to vector<80x256xf32>
    %108 = arith.mulf %106, %107 : vector<80x256xf32>
    %109 = vector.broadcast %5 : vector<80x1xf32> to vector<80x256xf32>
    %110 = arith.addf %108, %109 : vector<80x256xf32>
    %111 = arith.negf %110 : vector<80x256xf32>
    %112 = math.exp %111 : vector<80x256xf32>
    %cst_51 = arith.constant 1.000000e+00 : f32
    %113 = vector.broadcast %cst_51 : f32 to vector<80x256xf32>
    %114 = arith.addf %113, %112 : vector<80x256xf32>
    %115 = arith.divf %113, %114 : vector<80x256xf32>
    %cst_52 = arith.constant 1.000000e+00 : f32
    %116 = vector.broadcast %cst_52 : f32 to vector<80x256xf32>
    %117 = arith.subf %116, %115 : vector<80x256xf32>
    %118 = vector.broadcast %3 : vector<80x1xf32> to vector<80x256xf32>
    %119 = arith.mulf %118, %117 : vector<80x256xf32>
    %120 = arith.addf %119, %115 : vector<80x256xf32>
    %121 = arith.mulf %120, %106 : vector<80x256xf32>
    %122 = vector.broadcast %6 : vector<80x1xf32> to vector<80x256xf32>
    %123 = arith.mulf %121, %122 : vector<80x256xf32>
    %cst_53 = arith.constant dense<0.000000e+00> : vector<256xf32>
    %124 = vector.multi_reduction <add>, %123, %cst_53 [0] : vector<80x256xf32> to vector<256xf32>
    %125 = vector.shape_cast %124 : vector<256xf32> to vector<1x256xf32>
    %126 = vector.broadcast %7 : vector<1x1xf32> to vector<1x256xf32>
    %127 = arith.addf %125, %126 : vector<1x256xf32>
    %c3_54 = arith.constant 3 : index
    %c0_55 = arith.constant 0 : index
    %128 = vector.load %arg12[%c3_54, %c0_55] : memref<8x256xf32, #tpu.memory_space<vmem>>, vector<1x256xf32>
    tpu.vector_store %arg12[%c3_54, %c0_55], %127 {strides = array<i32>} : memref<8x256xf32, #tpu.memory_space<vmem>>, vector<1x256xf32>,
    %c4 = arith.constant 4 : index
    %c0_56 = arith.constant 0 : index
    %c0_57 = arith.constant 0 : index
    %129 = vector.load %arg2[%c4, %c0_56, %c0_57] : memref<8x4x256xbf16, #tpu.memory_space<vmem>>, vector<1x4x256xbf16>
    %130 = vector.shape_cast %129 : vector<1x4x256xbf16> to vector<4x256xbf16>
    %131 = arith.mulf %130, %0 : vector<4x256xbf16>
    %cst_58 = arith.constant dense<0.000000e+00> : vector<80x256xf32>
    %132 = tpu.matmul %1, %130, %cst_58 {dimension_numbers = #tpu.dot_dimension_numbers<[1], [0], [0], [1], [0, 0, 1, 1], [], []>} : vector<80x4xbf16>, vector<4x256xbf16>, vector<80x256xf32> -> vector<80x256xf32>
    %133 = arith.addf %12, %132 : vector<80x256xf32>
    %cst_59 = arith.constant dense<0.000000e+00> : vector<80x256xf32>
    %134 = tpu.matmul %2, %131, %cst_59 {dimension_numbers = #tpu.dot_dimension_numbers<[1], [0], [0], [1], [0, 0, 1, 1], [], []>} : vector<80x4xbf16>, vector<4x256xbf16>, vector<80x256xf32> -> vector<80x256xf32>
    %135 = arith.addf %133, %134 : vector<80x256xf32>
    %136 = vector.broadcast %4 : vector<80x1xf32> to vector<80x256xf32>
    %137 = arith.mulf %135, %136 : vector<80x256xf32>
    %138 = vector.broadcast %5 : vector<80x1xf32> to vector<80x256xf32>
    %139 = arith.addf %137, %138 : vector<80x256xf32>
    %140 = arith.negf %139 : vector<80x256xf32>
    %141 = math.exp %140 : vector<80x256xf32>
    %cst_60 = arith.constant 1.000000e+00 : f32
    %142 = vector.broadcast %cst_60 : f32 to vector<80x256xf32>
    %143 = arith.addf %142, %141 : vector<80x256xf32>
    %144 = arith.divf %142, %143 : vector<80x256xf32>
    %cst_61 = arith.constant 1.000000e+00 : f32
    %145 = vector.broadcast %cst_61 : f32 to vector<80x256xf32>
    %146 = arith.subf %145, %144 : vector<80x256xf32>
    %147 = vector.broadcast %3 : vector<80x1xf32> to vector<80x256xf32>
    %148 = arith.mulf %147, %146 : vector<80x256xf32>
    %149 = arith.addf %148, %144 : vector<80x256xf32>
    %150 = arith.mulf %149, %135 : vector<80x256xf32>
    %151 = vector.broadcast %6 : vector<80x1xf32> to vector<80x256xf32>
    %152 = arith.mulf %150, %151 : vector<80x256xf32>
    %cst_62 = arith.constant dense<0.000000e+00> : vector<256xf32>
    %153 = vector.multi_reduction <add>, %152, %cst_62 [0] : vector<80x256xf32> to vector<256xf32>
    %154 = vector.shape_cast %153 : vector<256xf32> to vector<1x256xf32>
    %155 = vector.broadcast %7 : vector<1x1xf32> to vector<1x256xf32>
    %156 = arith.addf %154, %155 : vector<1x256xf32>
    %c4_63 = arith.constant 4 : index
    %c0_64 = arith.constant 0 : index
    %157 = vector.load %arg12[%c4_63, %c0_64] : memref<8x256xf32, #tpu.memory_space<vmem>>, vector<1x256xf32>
    tpu.vector_store %arg12[%c4_63, %c0_64], %156 {strides = array<i32>} : memref<8x256xf32, #tpu.memory_space<vmem>>, vector<1x256xf32>,
    %c5 = arith.constant 5 : index
    %c0_65 = arith.constant 0 : index
    %c0_66 = arith.constant 0 : index
    %158 = vector.load %arg2[%c5, %c0_65, %c0_66] : memref<8x4x256xbf16, #tpu.memory_space<vmem>>, vector<1x4x256xbf16>
    %159 = vector.shape_cast %158 : vector<1x4x256xbf16> to vector<4x256xbf16>
    %160 = arith.mulf %159, %0 : vector<4x256xbf16>
    %cst_67 = arith.constant dense<0.000000e+00> : vector<80x256xf32>
    %161 = tpu.matmul %1, %159, %cst_67 {dimension_numbers = #tpu.dot_dimension_numbers<[1], [0], [0], [1], [0, 0, 1, 1], [], []>} : vector<80x4xbf16>, vector<4x256xbf16>, vector<80x256xf32> -> vector<80x256xf32>
    %162 = arith.addf %12, %161 : vector<80x256xf32>
    %cst_68 = arith.constant dense<0.000000e+00> : vector<80x256xf32>
    %163 = tpu.matmul %2, %160, %cst_68 {dimension_numbers = #tpu.dot_dimension_numbers<[1], [0], [0], [1], [0, 0, 1, 1], [], []>} : vector<80x4xbf16>, vector<4x256xbf16>, vector<80x256xf32> -> vector<80x256xf32>
    %164 = arith.addf %162, %163 : vector<80x256xf32>
    %165 = vector.broadcast %4 : vector<80x1xf32> to vector<80x256xf32>
    %166 = arith.mulf %164, %165 : vector<80x256xf32>
    %167 = vector.broadcast %5 : vector<80x1xf32> to vector<80x256xf32>
    %168 = arith.addf %166, %167 : vector<80x256xf32>
    %169 = arith.negf %168 : vector<80x256xf32>
    %170 = math.exp %169 : vector<80x256xf32>
    %cst_69 = arith.constant 1.000000e+00 : f32
    %171 = vector.broadcast %cst_69 : f32 to vector<80x256xf32>
    %172 = arith.addf %171, %170 : vector<80x256xf32>
    %173 = arith.divf %171, %172 : vector<80x256xf32>
    %cst_70 = arith.constant 1.000000e+00 : f32
    %174 = vector.broadcast %cst_70 : f32 to vector<80x256xf32>
    %175 = arith.subf %174, %173 : vector<80x256xf32>
    %176 = vector.broadcast %3 : vector<80x1xf32> to vector<80x256xf32>
    %177 = arith.mulf %176, %175 : vector<80x256xf32>
    %178 = arith.addf %177, %173 : vector<80x256xf32>
    %179 = arith.mulf %178, %164 : vector<80x256xf32>
    %180 = vector.broadcast %6 : vector<80x1xf32> to vector<80x256xf32>
    %181 = arith.mulf %179, %180 : vector<80x256xf32>
    %cst_71 = arith.constant dense<0.000000e+00> : vector<256xf32>
    %182 = vector.multi_reduction <add>, %181, %cst_71 [0] : vector<80x256xf32> to vector<256xf32>
    %183 = vector.shape_cast %182 : vector<256xf32> to vector<1x256xf32>
    %184 = vector.broadcast %7 : vector<1x1xf32> to vector<1x256xf32>
    %185 = arith.addf %183, %184 : vector<1x256xf32>
    %c5_72 = arith.constant 5 : index
    %c0_73 = arith.constant 0 : index
    %186 = vector.load %arg12[%c5_72, %c0_73] : memref<8x256xf32, #tpu.memory_space<vmem>>, vector<1x256xf32>
    tpu.vector_store %arg12[%c5_72, %c0_73], %185 {strides = array<i32>} : memref<8x256xf32, #tpu.memory_space<vmem>>, vector<1x256xf32>,
    %c6 = arith.constant 6 : index
    %c0_74 = arith.constant 0 : index
    %c0_75 = arith.constant 0 : index
    %187 = vector.load %arg2[%c6, %c0_74, %c0_75] : memref<8x4x256xbf16, #tpu.memory_space<vmem>>, vector<1x4x256xbf16>
    %188 = vector.shape_cast %187 : vector<1x4x256xbf16> to vector<4x256xbf16>
    %189 = arith.mulf %188, %0 : vector<4x256xbf16>
    %cst_76 = arith.constant dense<0.000000e+00> : vector<80x256xf32>
    %190 = tpu.matmul %1, %188, %cst_76 {dimension_numbers = #tpu.dot_dimension_numbers<[1], [0], [0], [1], [0, 0, 1, 1], [], []>} : vector<80x4xbf16>, vector<4x256xbf16>, vector<80x256xf32> -> vector<80x256xf32>
    %191 = arith.addf %12, %190 : vector<80x256xf32>
    %cst_77 = arith.constant dense<0.000000e+00> : vector<80x256xf32>
    %192 = tpu.matmul %2, %189, %cst_77 {dimension_numbers = #tpu.dot_dimension_numbers<[1], [0], [0], [1], [0, 0, 1, 1], [], []>} : vector<80x4xbf16>, vector<4x256xbf16>, vector<80x256xf32> -> vector<80x256xf32>
    %193 = arith.addf %191, %192 : vector<80x256xf32>
    %194 = vector.broadcast %4 : vector<80x1xf32> to vector<80x256xf32>
    %195 = arith.mulf %193, %194 : vector<80x256xf32>
    %196 = vector.broadcast %5 : vector<80x1xf32> to vector<80x256xf32>
    %197 = arith.addf %195, %196 : vector<80x256xf32>
    %198 = arith.negf %197 : vector<80x256xf32>
    %199 = math.exp %198 : vector<80x256xf32>
    %cst_78 = arith.constant 1.000000e+00 : f32
    %200 = vector.broadcast %cst_78 : f32 to vector<80x256xf32>
    %201 = arith.addf %200, %199 : vector<80x256xf32>
    %202 = arith.divf %200, %201 : vector<80x256xf32>
    %cst_79 = arith.constant 1.000000e+00 : f32
    %203 = vector.broadcast %cst_79 : f32 to vector<80x256xf32>
    %204 = arith.subf %203, %202 : vector<80x256xf32>
    %205 = vector.broadcast %3 : vector<80x1xf32> to vector<80x256xf32>
    %206 = arith.mulf %205, %204 : vector<80x256xf32>
    %207 = arith.addf %206, %202 : vector<80x256xf32>
    %208 = arith.mulf %207, %193 : vector<80x256xf32>
    %209 = vector.broadcast %6 : vector<80x1xf32> to vector<80x256xf32>
    %210 = arith.mulf %208, %209 : vector<80x256xf32>
    %cst_80 = arith.constant dense<0.000000e+00> : vector<256xf32>
    %211 = vector.multi_reduction <add>, %210, %cst_80 [0] : vector<80x256xf32> to vector<256xf32>
    %212 = vector.shape_cast %211 : vector<256xf32> to vector<1x256xf32>
    %213 = vector.broadcast %7 : vector<1x1xf32> to vector<1x256xf32>
    %214 = arith.addf %212, %213 : vector<1x256xf32>
    %c6_81 = arith.constant 6 : index
    %c0_82 = arith.constant 0 : index
    %215 = vector.load %arg12[%c6_81, %c0_82] : memref<8x256xf32, #tpu.memory_space<vmem>>, vector<1x256xf32>
    tpu.vector_store %arg12[%c6_81, %c0_82], %214 {strides = array<i32>} : memref<8x256xf32, #tpu.memory_space<vmem>>, vector<1x256xf32>,
    %c7 = arith.constant 7 : index
    %c0_83 = arith.constant 0 : index
    %c0_84 = arith.constant 0 : index
    %216 = vector.load %arg2[%c7, %c0_83, %c0_84] : memref<8x4x256xbf16, #tpu.memory_space<vmem>>, vector<1x4x256xbf16>
    %217 = vector.shape_cast %216 : vector<1x4x256xbf16> to vector<4x256xbf16>
    %218 = arith.mulf %217, %0 : vector<4x256xbf16>
    %cst_85 = arith.constant dense<0.000000e+00> : vector<80x256xf32>
    %219 = tpu.matmul %1, %217, %cst_85 {dimension_numbers = #tpu.dot_dimension_numbers<[1], [0], [0], [1], [0, 0, 1, 1], [], []>} : vector<80x4xbf16>, vector<4x256xbf16>, vector<80x256xf32> -> vector<80x256xf32>
    %220 = arith.addf %12, %219 : vector<80x256xf32>
    %cst_86 = arith.constant dense<0.000000e+00> : vector<80x256xf32>
    %221 = tpu.matmul %2, %218, %cst_86 {dimension_numbers = #tpu.dot_dimension_numbers<[1], [0], [0], [1], [0, 0, 1, 1], [], []>} : vector<80x4xbf16>, vector<4x256xbf16>, vector<80x256xf32> -> vector<80x256xf32>
    %222 = arith.addf %220, %221 : vector<80x256xf32>
    %223 = vector.broadcast %4 : vector<80x1xf32> to vector<80x256xf32>
    %224 = arith.mulf %222, %223 : vector<80x256xf32>
    %225 = vector.broadcast %5 : vector<80x1xf32> to vector<80x256xf32>
    %226 = arith.addf %224, %225 : vector<80x256xf32>
    %227 = arith.negf %226 : vector<80x256xf32>
    %228 = math.exp %227 : vector<80x256xf32>
    %cst_87 = arith.constant 1.000000e+00 : f32
    %229 = vector.broadcast %cst_87 : f32 to vector<80x256xf32>
    %230 = arith.addf %229, %228 : vector<80x256xf32>
    %231 = arith.divf %229, %230 : vector<80x256xf32>
    %cst_88 = arith.constant 1.000000e+00 : f32
    %232 = vector.broadcast %cst_88 : f32 to vector<80x256xf32>
    %233 = arith.subf %232, %231 : vector<80x256xf32>
    %234 = vector.broadcast %3 : vector<80x1xf32> to vector<80x256xf32>
    %235 = arith.mulf %234, %233 : vector<80x256xf32>
    %236 = arith.addf %235, %231 : vector<80x256xf32>
    %237 = arith.mulf %236, %222 : vector<80x256xf32>
    %238 = vector.broadcast %6 : vector<80x1xf32> to vector<80x256xf32>
    %239 = arith.mulf %237, %238 : vector<80x256xf32>
    %cst_89 = arith.constant dense<0.000000e+00> : vector<256xf32>
    %240 = vector.multi_reduction <add>, %239, %cst_89 [0] : vector<80x256xf32> to vector<256xf32>
    %241 = vector.shape_cast %240 : vector<256xf32> to vector<1x256xf32>
    %242 = vector.broadcast %7 : vector<1x1xf32> to vector<1x256xf32>
    %243 = arith.addf %241, %242 : vector<1x256xf32>
    %c7_90 = arith.constant 7 : index
    %c0_91 = arith.constant 0 : index
    %244 = vector.load %arg12[%c7_90, %c0_91] : memref<8x256xf32, #tpu.memory_space<vmem>>, vector<1x256xf32>
    tpu.vector_store %arg12[%c7_90, %c0_91], %243 {strides = array<i32>} : memref<8x256xf32, #tpu.memory_space<vmem>>, vector<1x256xf32>,
    return
  }
  func.func @transform_0(%arg0: i32) -> (i32, i32) {
    %c0_i32 = arith.constant 0 : i32
    %c0_i32_0 = arith.constant 0 : i32
    return %c0_i32, %arg0 : i32, i32
  }
  func.func @transform_1(%arg0: i32) -> (i32, i32, i32) {
    %c0_i32 = arith.constant 0 : i32
    %c0_i32_0 = arith.constant 0 : i32
    %c0_i32_1 = arith.constant 0 : i32
    return %c0_i32, %c0_i32_0, %arg0 : i32, i32, i32
  }
  func.func @transform_2(%arg0: i32) -> (i32, i32) {
    %c0_i32 = arith.constant 0 : i32
    %c0_i32_0 = arith.constant 0 : i32
    %c0_i32_1 = arith.constant 0 : i32
    return %c0_i32, %c0_i32_0 : i32, i32
  }
  func.func @transform_3(%arg0: i32) -> (i32, i32) {
    %c0_i32 = arith.constant 0 : i32
    %c0_i32_0 = arith.constant 0 : i32
    %c0_i32_1 = arith.constant 0 : i32
    return %c0_i32, %c0_i32_0 : i32, i32
  }
  func.func @transform_4(%arg0: i32) -> (i32, i32) {
    %c0_i32 = arith.constant 0 : i32
    %c0_i32_0 = arith.constant 0 : i32
    %c0_i32_1 = arith.constant 0 : i32
    return %c0_i32, %c0_i32_0 : i32, i32
  }
  func.func @transform_5(%arg0: i32) -> (i32, i32) {
    %c0_i32 = arith.constant 0 : i32
    %c0_i32_0 = arith.constant 0 : i32
    %c0_i32_1 = arith.constant 0 : i32
    return %c0_i32, %c0_i32_0 : i32, i32
  }
  func.func @transform_6(%arg0: i32) -> (i32, i32) {
    %c0_i32 = arith.constant 0 : i32
    %c0_i32_0 = arith.constant 0 : i32
    %c0_i32_1 = arith.constant 0 : i32
    return %c0_i32, %c0_i32_0 : i32, i32
  }
  func.func @transform_7(%arg0: i32) -> (i32, i32) {
    %c0_i32 = arith.constant 0 : i32
    %c0_i32_0 = arith.constant 0 : i32
    %c0_i32_1 = arith.constant 0 : i32
    return %c0_i32, %c0_i32_0 : i32, i32
  }
  func.func @transform_8(%arg0: i32) -> (i32, i32) {
    %c0_i32 = arith.constant 0 : i32
    %c0_i32_0 = arith.constant 0 : i32
    %c0_i32_1 = arith.constant 0 : i32
    return %c0_i32, %c0_i32_0 : i32, i32
  }
  func.func @transform_9(%arg0: i32) -> (i32, i32) {
    %c0_i32 = arith.constant 0 : i32
    %c0_i32_0 = arith.constant 0 : i32
    %c0_i32_1 = arith.constant 0 : i32
    return %c0_i32, %c0_i32_0 : i32, i32
  }
  func.func @transform_10(%arg0: i32) -> (i32, i32) {
    %c0_i32 = arith.constant 0 : i32
    %c0_i32_0 = arith.constant 0 : i32
    %c0_i32_1 = arith.constant 0 : i32
    return %c0_i32, %c0_i32_0 : i32, i32
  }
  func.func @transform_11(%arg0: i32) -> (i32, i32) {
    %c0_i32 = arith.constant 0 : i32
    %c0_i32_0 = arith.constant 0 : i32
    return %c0_i32, %arg0 : i32, i32
  }
}

</mosaic_0001>

<bundles_post_ra>
// kernel: local_activation_unit.1
= control target key start
LH: loop header
LB: loop body
LE: loop exit
PB: predicated region body
PF: predicated region fallthrough
CT: control target
= control target key end

     0   :  { %s10091_s0 = inlined_call_operand.vmem [shape: bf16[4,512], index: 0, kind: input, shape index: {}]   ;;  %s10092_s1 = inlined_call_operand.vmem [shape: bf16[8,4,512], index: 1, kind: input, shape index: {}]   ;;  %s10093_s2 = inlined_call_operand.vmem [shape: bf16[80,4], index: 2, kind: input, shape index: {}]   ;;  %s10094_s3 = inlined_call_operand.vmem [shape: bf16[80,4], index: 3, kind: input, shape index: {}]   ;;  %s10095_s4 = inlined_call_operand.vmem [shape: bf16[80,4], index: 4, kind: input, shape index: {}]   ;;  %s10096_s5 = inlined_call_operand.vmem [shape: f32[80,1], index: 5, kind: input, shape index: {}]   ;;  %s10097_s6 = inlined_call_operand.vmem [shape: f32[80,1], index: 6, kind: input, shape index: {}]   ;;  %s10098_s7 = inlined_call_operand.vmem [shape: f32[80,1], index: 7, kind: input, shape index: {}]   ;;  %s10099_s8 = inlined_call_operand.vmem [shape: f32[80,1], index: 8, kind: input, shape index: {}]   ;;  %s10100_s9 = inlined_call_operand.vmem [shape: f32[80,1], index: 9, kind: input, shape index: {}]   ;;  %s10101_s10 = inlined_call_operand.<no memory space> [shape: f32[1,1], index: 10, kind: input, shape index: {}]   ;;  %s10102_s11 = inlined_call_operand.vmem [shape: f32[8,512], index: 11, kind: output, shape index: {}]  }
   0x1   :  { %v16_v0 = vstv %s10101_s10 }
   0x2   :  { %17 = vst [vmem:[#allocation2] sm:$0x1] %v16_v0 }
   0x3   :  { %s6632_s19 = smov 0   ;;  %s6634_s20 = smov 0  }
   0x4   :  { %s6636_s21 = smov 0  }
   0x5 LB: > { %s5539_s10 = sadd.s32 4294967295, %s6564_s21   ;;  %s6649_s22 = sadd.s32 1, %s6564_s21   ;;  %s6564_s21 = sphi %s6636_s21, %s11105_s21   ;;  %s6560_s20 = sphi %s6634_s20, %s11104_s20   ;;  %s6556_s19 = sphi %s6632_s19, %s11103_s19  }
   0x6   : > { %s53_s23 = ssub.s32 %s6564_s21, %s6649_s22  ;;  %s56_s24 = sadd.s32 1, %s6560_s20 }
   0x7   : > { %p54_p0 = scmp.eq.s32.totalorder %s53_s23, 0  ;;  %p63_p1 = scmp.ne.s32.totalorder %s6560_s20, %s6556_s19 }
   0x8   : > { %p64_p2 = scmp.eq.s32.totalorder %s6564_s21, 0  ;;  %p5542_p4 = scmp.ge.s32.totalorder %s6564_s21, 2 }
   0x9   : > { %s6658_s25 = scalar_select %p54_p0, %s6560_s20, %s56_s24  }
   0xa   : > { %p65_p3 = por %p64_p2, %p63_p1  ;;  %331 = sbr.rel (%p5542_p4) target bundleno = 24 (0x18), region = 52 }
   0xf   : > { %343 = sbr.rel (!%p65_p3) target bundleno = 24 (0x18), region = 60  ;;  %s345_s26 = sand.u32 (%p65_p3), 1, %s6560_s20  }
  0x10   : > { %s5845_s27 = sshll.u32 (%p65_p3), %s6564_s21, 2  ;;  %s5543_s28 = sshll.u32 (%p65_p3), %s345_s26, 5 }
  0x11   : > { %s350_s12 = scalar_lea.vmem (%p65_p3), %s10092_s1, %s5845_s27  ;;  %s347_s13 = scalar_lea.vmem (%p65_p3), [#allocation3], %s5543_s28 }
  0x12   : > { %v367_v1 = vld [vmem:[%s350_s12] sm:$0xf] (%p65_p3)  ;;  %v369_v2 = vld [vmem:[%s350_s12 + $0x8] sm:$0xf] (%p65_p3)  ;;  %v371_v3 = vld [vmem:[%s350_s12 + $0x10] sm:$0xf] (%p65_p3) }
  0x13   : > { %368 = vst [vmem:[%s347_s13] sm:$0xf] (%p65_p3), %v367_v1  ;;  %370 = vst [vmem:[%s347_s13 + $0x4] sm:$0xf] (%p65_p3), %v369_v2  ;;  %v373_v4 = vld [vmem:[%s350_s12 + $0x18] sm:$0xf] (%p65_p3) }
  0x14   : > { %v375_v5 = vld [vmem:[%s350_s12 + $0x20] sm:$0xf]  ;;  %372 = vst [vmem:[%s347_s13 + $0x8] sm:$0xf] %v371_v3  ;;  %374 = vst [vmem:[%s347_s13 + $0xc] sm:$0xf] %v373_v4 }
  0x15   : > { %376 = vst [vmem:[%s347_s13 + $0x10] sm:$0xf] %v375_v5  ;;  %v377_v6 = vld [vmem:[%s350_s12 + $0x28] sm:$0xf]  ;;  %v379_v7 = vld [vmem:[%s350_s12 + $0x30] sm:$0xf] }
  0x16   : > { %v381_v8 = vld [vmem:[%s350_s12 + $0x38] sm:$0xf]  ;;  %378 = vst [vmem:[%s347_s13 + $0x14] sm:$0xf] %v377_v6  ;;  %380 = vst [vmem:[%s347_s13 + $0x18] sm:$0xf] %v379_v7 }
  0x17   : > { %382 = vst [vmem:[%s347_s13 + $0x1c] sm:$0xf] %v381_v8 }
  0x18 PF: > { %p5546_p5 = scmp.ge.s32.totalorder %s6564_s21, 1  ;;  %p421_p6 = scmp.lt.s32.totalorder %s6564_s21, 3 }
  0x1a   : > { %p422_p7 = pnand %p5546_p5, %p421_p6 }
  0x1c   : > { %425 = sbr.rel (%p422_p7) target bundleno = 903 (0x387), region = 101 }
  0x21   : > { %s5548_s14 = sshll.u32 %s5539_s10, 1  ;;  %v10103_v9 = vlaneseq  ;;  %v6566_v10 = vmov 1983009808   ;;  %v10104_v12 = vmov 0   ;;  %s428_s15 = sand.u32 1, %s6556_s19   ;;  %vm668_vm0 = vcmask 1041408  }
  0x22   : > { %p473_p8 = scmp.lt.s32.totalorder %s5548_s14, 3  ;;  %v645_v11 = vunpack.c.l.s4 %v6566_v10  ;;  %707 = vmatprep.mubr.bf16.mxu0 %v10104_v12  ;;  %737 = vmatprep.mubr.bf16.mxu1 %v10104_v12  ;;  %s5547_s10 = sshll.u32 %s428_s15, 5  ;;  %v5877_v24 = vld [vmem:[%s10093_s2] sm:$0xff]   ;;  %v5878_v26 = vld [vmem:[%s10093_s2 + $0x18] sm:$0xff]   ;;  %vm652_vm1 = vcmask 31744   ;;  %v560_v36 = vld [vmem:[%s10096_s5 + $0x10] sm:$0xff] }
  0x23   : > { %v6673_v13 = vshrl.u32 %v10103_v9, 7  ;;  %5876 = vset.pattern.permute.xlu1 %v10104_v12  ;;  %5875 = vset.pattern.permute.xlu0 %v10104_v12  ;;  %s6691_s23 = scalar_lea.vmem [#allocation3], %s5547_s10  ;;  %v558_v37 = vld [vmem:[%s10096_s5] sm:$0xff]  ;;  %v5879_v38 = vld [vmem:[%s10093_s2 + $0x8] sm:$0xff]   ;;  %v561_v40 = vld [vmem:[%s10096_s5 + $0x18] sm:$0xff] }
  0x24   : > { %s11107_s14 = smov (!%p473_p8, %s5548_s14), 3  ;;  %v646_v14 = vunpack.c.0.s8 %v645_v11  ;;  %v758_v18 = vld [vmem:[%s6691_s23] sm:$0xf]  ;;  %v5605_v19 = vld [vmem:[%s6691_s23 + $0x4] sm:$0xf]  ;;  %580 = vperm.xlu1 %5876, %v560_v36   ;;  %570 = vperm.xlu0 %5875, %v558_v37   ;;  %v5881_v46 = vld [vmem:[%s10093_s2 + $0x10] sm:$0xff]  }
  0x25   : > { %10492 = vst [vmem:[#allocation4_spill] sm:$0xff] %v6673_v13  ;;  %s5549_s16 = sshll.u32 %s11107_s14, 1  ;;  %v5880_v39 = vld [vmem:[%s10093_s2 + $0x20] sm:$0xff]   ;;  %v559_v41 = vld [vmem:[%s10096_s5 + $0x8] sm:$0xff]  ;;  %v565_v51 = vld [vmem:[%s10096_s5 + $0x38] sm:$0xff] }
  0x26   : > { %v6682_v15 = vsub.s32 %v646_v14, %v6673_v13  ;;  %s476_s21 = scalar_lea.vmem %s10091_s0, %s5549_s16  ;;  %v5639_v42 = vld [vmem:[%s6691_s23 + $0x8] sm:$0xf]  ;;  %v562_v45 = vld [vmem:[%s10096_s5 + $0x20] sm:$0xff]  ;;  %v564_v52 = vld [vmem:[%s10096_s5 + $0x30] sm:$0xff] }
  0x27   : > { %v6687_v16 = vld [vmem:[%s476_s21] sm:$0xf]  ;;  %v563_v44 = vld [vmem:[%s10096_s5 + $0x28] sm:$0xff]  ;;  %v6814_v62 = vld [vmem:[%s10094_s3 + $0x10] sm:$0xff]   ;;  %s5551_s21 = sshll.u32 %s11107_s14, 3 }
  0x28   : > { %v650_v17 = vrot.slane %v6687_v16, %v6682_v15  ;;  %v759_v22 = vmul.bf16 %v758_v18, %v6687_v16  ;;  %v792_v23 = vrot.slane %v758_v18, %v6682_v15  ;;  %v1603_v25 = vmul.bf16 %v5605_v19, %v6687_v16  ;;  %585 = vperm.xlu1 %5876, %v561_v40   ;;  %v6758_v47 = vld [vmem:[%s10094_s3] sm:$0xff]   ;;  %v567_v54 = vld [vmem:[%s10096_s5 + $0x48] sm:$0xff]  ;;  %v520_v0 = vld [vmem:[%s10098_s7 + $0x18] sm:$0xff]  ;;  %s8545_s19 = scalar_lea.vmem %s10102_s11, %s5551_s21 }
  0x29   : > { %v1611_v29 = vrot.slane %v5605_v19, %v6682_v15  ;;  %575 = vperm.xlu0 %5875, %v559_v41   ;;  %v6744_v43 = vrot.slane %v5639_v42, %v6682_v15  ;;  %v2155_v48 = vmul.bf16 %v5639_v42, %v6687_v16  ;;  %v6785_v55 = vld [vmem:[%s10094_s3 + $0x8] sm:$0xff]   ;;  %v6790_v56 = vld [vmem:[%s10095_s4] sm:$0xff]   ;;  %v519_v1 = vld [vmem:[%s10098_s7 + $0x10] sm:$0xff] }
  0x2a   : > { %v651_v20 = vcombine.high %v650_v17, %v650_v17  ;;  %v670_v21 = vsel %vm668_vm0, %v650_v17, 0  ;;  %v950_v27 = vrot.slane %v759_v22, %v6682_v15  ;;  %v793_v28 = vcombine.high %v792_v23, %v792_v23  ;;  %v566_v57 = vld [vmem:[%s10096_s5 + $0x40] sm:$0xff]  ;;  %v518_v60 = vld [vmem:[%s10098_s7 + $0x8] sm:$0xff]  ;;  %v6842_v4 = vld [vmem:[%s10094_s3 + $0x18] sm:$0xff]  }
  0x2b   : > { %v1729_v30 = vrot.slane %v1603_v25, %v6682_v15  ;;  %v810_v34 = vsel %vm668_vm0, %v792_v23, 0  ;;  %v1612_v35 = vcombine.high %v1611_v29, %v1611_v29  ;;  %v1614_v49 = vsel %vm668_vm0, %v1611_v29, 0  ;;  %v517_v61 = vld [vmem:[%s10098_s7] sm:$0xff]  ;;  %v6819_v63 = vld [vmem:[%s10095_s4 + $0x8] sm:$0xff]   ;;  %v6847_v5 = vld [vmem:[%s10095_s4 + $0x10] sm:$0xff]  }
  0x2c   : > { %5557 = vmatprep.subr.msk.bf16.mxu0 %vm668_vm0, %v651_v20  ;;  %5846 = vmatprep.subr.msk.bf16.mxu1 %vm668_vm0, %v651_v20  ;;  %v951_v31 = vcombine.high %v950_v27, %v950_v27  ;;  %v968_v32 = vsel %vm668_vm0, %v950_v27, 0  ;;  %v2164_v50 = vcombine.high %v6744_v43, %v6744_v43  ;;  %v6776_v53 = vrot.slane %v2155_v48, %v6682_v15  ;;  %v527_v2 = vld [vmem:[%s10099_s8] sm:$0xff]  ;;  %v528_v6 = vld [vmem:[%s10099_s8 + $0x8] sm:$0xff]  ;;  %v529_v7 = vld [vmem:[%s10099_s8 + $0x10] sm:$0xff] }
  0x2d   : > { %690 = vmatpush1.bf16.msra.mxu0 %v670_v21  ;;  %5847 = vmatpush1.bf16.msra.mxu1 %v670_v21  ;;  %v1730_v33 = vcombine.high %v1729_v30, %v1729_v30  ;;  %v1732_v58 = vsel %vm668_vm0, %v1729_v30, 0  ;;  %v521_v3 = vld [vmem:[%s10098_s7 + $0x20] sm:$0xff]  ;;  %v522_v8 = vld [vmem:[%s10098_s7 + $0x28] sm:$0xff]  ;;  %v530_v10 = vld [vmem:[%s10099_s8 + $0x18] sm:$0xff]  ;;  %v2166_v27 = vsel %vm668_vm0, %v6744_v43, 0 }
  0x2e   : > { %5568 = vmatprep.subr.msk.bf16.mxu1 %vm668_vm0, %v793_v28  ;;  %5579 = vmatprep.subr.msk.bf16.mxu0 %vm668_vm0, %v951_v31  ;;  %v2282_v59 = vcombine.high %v6776_v53, %v6776_v53  ;;  %v6870_v11 = vld [vmem:[%s10094_s3 + $0x20] sm:$0xff]   ;;  %v6875_v14 = vld [vmem:[%s10095_s4 + $0x18] sm:$0xff]   ;;  %v523_v17 = vld [vmem:[%s10098_s7 + $0x30] sm:$0xff] }
  0x2f   : > { %595 = vperm.xlu1 %5876, %v563_v44   ;;  %590 = vperm.xlu0 %5875, %v562_v45   ;;  %v531_v18 = vld [vmem:[%s10099_s8 + $0x20] sm:$0xff]  ;;  %v5673_v19 = vld [vmem:[%s6691_s23 + $0xc] sm:$0xf]  ;;  %v524_v20 = vld [vmem:[%s10098_s7 + $0x38] sm:$0xff] }
  0x30   : > { %5558 = vmatmul.mubr.msk.bf16.vlgmr.msra.gmra.mxu0 %vm652_vm1, %v5877_v24  ;;  %5561 = vmatmul.mubr.msk.bf16.vlgmr.msra.gmra.mxu1 %vm652_vm1, %v5878_v26  ;;  %v532_v21 = vld [vmem:[%s10099_s8 + $0x28] sm:$0xff]  ;;  %v6897_v22 = vrot.slane %v5673_v19, %v6682_v15  ;;  %v6902_v23 = vld [vmem:[%s10095_s4 + $0x20] sm:$0xff]   ;;  %v533_v25 = vld [vmem:[%s10099_s8 + $0x30] sm:$0xff]  ;;  %v2707_v26 = vmul.bf16 %v5673_v19, %v6687_v16 }
  0x31   : > { %717 = vmatprep.mubr.bf16.mxu0 %v10104_v12  ;;  %988 = vmatpush1.bf16.msra.mxu0 %v968_v32  ;;  %10493 = vst [vmem:[#allocation5_spill] sm:$0xff] %v6902_v23  ;;  %v525_v24 = vld [vmem:[%s10098_s7 + $0x40] sm:$0xff]  ;;  %v526_v29 = vld [vmem:[%s10098_s7 + $0x48] sm:$0xff]  ;;  %v534_v30 = vld [vmem:[%s10099_s8 + $0x38] sm:$0xff] }
  0x32   : > { %747 = vmatprep.mubr.bf16.mxu1 %v10104_v12  ;;  %830 = vmatpush1.bf16.msra.mxu1 %v810_v34  ;;  %v2716_v28 = vcombine.high %v6897_v22, %v6897_v22  ;;  %v6928_v31 = vrot.slane %v2707_v26, %v6682_v15  ;;  %v536_v32 = vld [vmem:[%s10099_s8 + $0x48] sm:$0xff]  ;;  %v507_v37 = vld [vmem:[%s10097_s6] sm:$0xff]  ;;  %v513_v44 = vld [vmem:[%s10097_s6 + $0x30] sm:$0xff] }
  0x33   : > { %5612 = vmatprep.subr.msk.bf16.mxu0 %vm668_vm0, %v1730_v33  ;;  %5606 = vmatprep.subr.msk.bf16.mxu1 %vm668_vm0, %v1612_v35  ;;  %v2284_v33 = vsel %vm668_vm0, %v6776_v53, 0  ;;  %v535_v35 = vld [vmem:[%s10099_s8 + $0x40] sm:$0xff]  ;;  %v508_v36 = vld [vmem:[%s10097_s6 + $0x8] sm:$0xff]  ;;  %v539_v45 = vld [vmem:[%s10100_s9 + $0x10] sm:$0xff] }
  0x34   : > { %605 = vperm.xlu1 %5876, %v565_v51   ;;  %600 = vperm.xlu0 %5875, %v564_v52   ;;  %v2834_v34 = vcombine.high %v6928_v31, %v6928_v31  ;;  %v537_v40 = vld [vmem:[%s10100_s9] sm:$0xff]  ;;  %v512_v42 = vld [vmem:[%s10097_s6 + $0x28] sm:$0xff]  ;;  %v5707_v48 = vld [vmem:[%s6691_s23 + $0x10] sm:$0xf] }
  0x35   : > { %v511_v41 = vld [vmem:[%s10097_s6 + $0x20] sm:$0xff]  ;;  %v538_v43 = vld [vmem:[%s10100_s9 + $0x8] sm:$0xff]  ;;  %v3267_v51 = vrot.slane %v5707_v48, %v6682_v15 }
  0x36   : > { %v541_v52 = vld [vmem:[%s10100_s9 + $0x20] sm:$0xff]  ;;  %v516_v53 = vld [vmem:[%s10097_s6 + $0x48] sm:$0xff] }
  0x38   : > { %5559 = vmatmul.mubr.msk.bf16.gmra.mxu0 %vm652_vm1, %v5879_v38  ;;  %5562 = vmatmul.mubr.msk.bf16.gmra.mxu1 %vm652_vm1, %v5880_v39  ;;  %v510_v38 = vld [vmem:[%s10097_s6 + $0x18] sm:$0xff]  ;;  %v509_v39 = vld [vmem:[%s10097_s6 + $0x10] sm:$0xff] }
  0x39   : > { %727 = vmatprep.mubr.bf16.mxu0 %v10104_v12  ;;  %847 = vmatprep.mubr.bf16.mxu1 %v10104_v12 }
  0x3a   : > { %615 = vperm.xlu1 %5876, %v567_v54   ;;  %610 = vperm.xlu0 %5875, %v566_v57   ;;  %v3259_v54 = vmul.bf16 %v5707_v48, %v6687_v16  ;;  %v2718_v57 = vsel %vm668_vm0, %v6897_v22, 0 }
  0x3e   : > { %1083 = vperm.xlu1 %5876, %v518_v60   ;;  %1078 = vperm.xlu0 %5875, %v517_v61   ;;  %v544_v60 = vld [vmem:[%s10100_s9 + $0x38] sm:$0xff]  ;;  %v3385_v61 = vrot.slane %v3259_v54, %v6682_v15 }
  0x40   : > { %5560 = vmatmul.mubr.msk.bf16.gmra.mxu0 %vm652_vm1, %v5881_v46  ;;  %5569 = vmatmul.mubr.msk.bf16.vlgmr.msra.gmra.mxu1 %vm652_vm1, %v6758_v47  ;;  %v514_v46 = vld [vmem:[%s10097_s6 + $0x38] sm:$0xff] }
  0x41   : > { %857 = vmatprep.mubr.bf16.mxu1 %v10104_v12  ;;  %1005 = vmatprep.mubr.bf16.mxu0 %v10104_v12 }
  0x42   : > { %1634 = vmatpush1.bf16.msra.mxu1 %v1614_v49  ;;  %1093 = vperm.xlu1 %5876, %v520_v0   ;;  %v540_v49 = vld [vmem:[%s10100_s9 + $0x18] sm:$0xff]  ;;  %v543_v0 = vld [vmem:[%s10100_s9 + $0x30] sm:$0xff] }
  0x43   : > { %5640 = vmatprep.subr.msk.bf16.mxu1 %vm668_vm0, %v2164_v50  ;;  %1088 = vperm.xlu0 %5875, %v519_v1   ;;  %v515_v50 = vld [vmem:[%s10097_s6 + $0x40] sm:$0xff]  ;;  %v2836_v1 = vsel %vm668_vm0, %v6928_v31, 0 }
  0x46   : > { %1148 = vperm.xlu1 %5876, %v527_v2   ;;  %v3386_v2 = vcombine.high %v3385_v61, %v3385_v61 }
  0x47   : > { %1098 = vperm.xlu0 %5875, %v521_v3   ;;  %v545_v3 = vld [vmem:[%s10100_s9 + $0x40] sm:$0xff] }
  0x48   : > { %5570 = vmatmul.mubr.msk.bf16.gmra.mxu1 %vm652_vm1, %v6785_v55  ;;  %5580 = vmatmul.mubr.msk.bf16.vlgmr.msra.gmra.mxu0 %vm652_vm1, %v6790_v56 }
  0x49   : > { %1752 = vmatpush1.bf16.msra.mxu0 %v1732_v58  ;;  %867 = vmatprep.mubr.bf16.mxu1 %v10104_v12  ;;  %v3268_v58 = vcombine.high %v3267_v51, %v3267_v51 }
  0x4a   : > { %1015 = vmatprep.mubr.bf16.mxu0 %v10104_v12  ;;  %5646 = vmatprep.subr.msk.bf16.mxu0 %vm668_vm0, %v2282_v59  ;;  %v542_v59 = vld [vmem:[%s10100_s9 + $0x28] sm:$0xff] }
  0x4b   : > { %1153 = vperm.xlu0 %5875, %v528_v6   ;;  %1158 = vperm.xlu1 %5876, %v529_v7   ;;  %v546_v6 = vld [vmem:[%s10100_s9 + $0x48] sm:$0xff]  ;;  %v547_v7 = vld [vmem:[#allocation2] sm:$0x1] }
  0x4f   : > { %1103 = vperm.xlu1 %5876, %v522_v8   ;;  %1163 = vperm.xlu0 %5875, %v530_v10   ;;  %v5741_v8 = vld [vmem:[%s6691_s23 + $0x14] sm:$0xf] }
  0x50   : > { %5571 = vmatmul.mubr.msk.bf16.gmra.mxu1 %vm652_vm1, %v6814_v62  ;;  %5581 = vmatmul.mubr.msk.bf16.gmra.mxu0 %vm652_vm1, %v6819_v63  ;;  %v3819_v10 = vrot.slane %v5741_v8, %v6682_v15 }
  0x51   : > { %877 = vmatprep.mubr.bf16.mxu1 %v10104_v12  ;;  %1025 = vmatprep.mubr.bf16.mxu0 %v10104_v12 }
  0x52   : > { %v3820_v19 = vcombine.high %v3819_v10, %v3819_v10 }
  0x53   : > { %1108 = vperm.xlu1 %5876, %v523_v17   ;;  %1168 = vperm.xlu0 %5875, %v531_v18   ;;  %v3811_v17 = vmul.bf16 %v5741_v8, %v6687_v16  ;;  %v3270_v18 = vsel %vm668_vm0, %v3267_v51, 0 }
  0x57   : > { %1113 = vperm.xlu1 %5876, %v524_v20   ;;  %1173 = vperm.xlu0 %5875, %v532_v21   ;;  %v3937_v20 = vrot.slane %v3811_v17, %v6682_v15  ;;  %v3388_v21 = vsel %vm668_vm0, %v3385_v61, 0 }
  0x58   : > { %5572 = vmatmul.mubr.msk.bf16.gmra.mxu1 %vm652_vm1, %v6842_v4  ;;  %5582 = vmatmul.mubr.msk.bf16.gmra.mxu0 %vm652_vm1, %v6847_v5 }
  0x59   : > { %887 = vmatprep.mubr.bf16.mxu1 %v10104_v12  ;;  %1035 = vmatprep.mubr.bf16.mxu0 %v10104_v12  ;;  %v3938_v22 = vcombine.high %v3937_v20, %v3937_v20 }
  0x5b   : > { %1118 = vperm.xlu1 %5876, %v525_v24   ;;  %1178 = vperm.xlu0 %5875, %v533_v25   ;;  %v5775_v24 = vld [vmem:[%s6691_s23 + $0x18] sm:$0xf] }
  0x5c   : > { %v7108_v26 = vrot.slane %v5775_v24, %v6682_v15 }
  0x5f   : > { %1123 = vperm.xlu1 %5876, %v526_v29   ;;  %1183 = vperm.xlu0 %5875, %v534_v30   ;;  %v4372_v29 = vcombine.high %v7108_v26, %v7108_v26 }
  0x60   : > { %5573 = vmatmul.mubr.msk.bf16.gmra.mxu1 %vm652_vm1, %v6870_v11  ;;  %5583 = vmatmul.mubr.msk.bf16.gmra.mxu0 %vm652_vm1, %v6875_v14 }
  0x61   : > { %1045 = vmatprep.mubr.bf16.mxu0 %v10104_v12  ;;  %1651 = vmatprep.mubr.bf16.mxu1 %v10104_v12 }
  0x63   : > { %1193 = vperm.xlu1 %5876, %v536_v32   ;;  %1188 = vperm.xlu0 %5875, %v535_v35  }
  0x67   : > { %1363 = vperm.xlu1 %5876, %v508_v36   ;;  %1358 = vperm.xlu0 %5875, %v507_v37  }
  0x68   : > { %5584 = vmatmul.mubr.msk.bf16.gmra.mxu0 %vm652_vm1, %v6902_v23  ;;  %5607 = vmatmul.mubr.msk.bf16.vlgmr.msra.gmra.mxu1 %vm652_vm1, %v6758_v47 }
  0x69   : > { %1661 = vmatprep.mubr.bf16.mxu1 %v10104_v12  ;;  %1769 = vmatprep.mubr.bf16.mxu0 %v10104_v12 }
  0x6a   : > { %2186 = vmatpush1.bf16.msra.mxu1 %v2166_v27  ;;  %v4363_v27 = vmul.bf16 %v5775_v24, %v6687_v16 }
  0x6b   : > { %5674 = vmatprep.subr.msk.bf16.mxu1 %vm668_vm0, %v2716_v28  ;;  %1373 = vperm.xlu1 %5876, %v510_v38   ;;  %v3822_v28 = vsel %vm668_vm0, %v3819_v10, 0 }
  0x6c   : > { %1368 = vperm.xlu0 %5875, %v509_v39   ;;  %v7125_v32 = vrot.slane %v4363_v27, %v6682_v15 }
  0x6f   : > { %1468 = vperm.xlu1 %5876, %v537_v40  }
  0x70   : > { %5608 = vmatmul.mubr.msk.bf16.gmra.mxu1 %vm652_vm1, %v6785_v55  ;;  %5613 = vmatmul.mubr.msk.bf16.vlgmr.msra.gmra.mxu0 %vm652_vm1, %v6790_v56 }
  0x71   : > { %2304 = vmatpush1.bf16.msra.mxu0 %v2284_v33  ;;  %1671 = vmatprep.mubr.bf16.mxu1 %v10104_v12  ;;  %v3940_v33 = vsel %vm668_vm0, %v3937_v20, 0 }
  0x72   : > { %1779 = vmatprep.mubr.bf16.mxu0 %v10104_v12  ;;  %5680 = vmatprep.subr.msk.bf16.mxu0 %vm668_vm0, %v2834_v34  ;;  %v4490_v34 = vcombine.high %v7125_v32, %v7125_v32 }
  0x73   : > { %1378 = vperm.xlu0 %5875, %v511_v41   ;;  %1383 = vperm.xlu1 %5876, %v512_v42  }
  0x77   : > { %1473 = vperm.xlu0 %5875, %v538_v43   ;;  %1388 = vperm.xlu1 %5876, %v513_v44  }
  0x78   : > { %5609 = vmatmul.mubr.msk.bf16.gmra.mxu1 %vm652_vm1, %v6814_v62  ;;  %5614 = vmatmul.mubr.msk.bf16.gmra.mxu0 %vm652_vm1, %v6819_v63 }
  0x79   : > { %1681 = vmatprep.mubr.bf16.mxu1 %v10104_v12  ;;  %1789 = vmatprep.mubr.bf16.mxu0 %v10104_v12 }
  0x7b   : > { %1478 = vperm.xlu0 %5875, %v539_v45   ;;  %1393 = vperm.xlu1 %5876, %v514_v46  }
  0x7f   : > { %1483 = vperm.xlu0 %5875, %v540_v49   ;;  %1398 = vperm.xlu1 %5876, %v515_v50  }
  0x80   : > { %5610 = vmatmul.mubr.msk.bf16.gmra.mxu1 %vm652_vm1, %v6842_v4  ;;  %5615 = vmatmul.mubr.msk.bf16.gmra.mxu0 %vm652_vm1, %v6847_v5 }
  0x81   : > { %1691 = vmatprep.mubr.bf16.mxu1 %v10104_v12  ;;  %1799 = vmatprep.mubr.bf16.mxu0 %v10104_v12 }
  0x83   : > { %1488 = vperm.xlu0 %5875, %v541_v52   ;;  %1403 = vperm.xlu1 %5876, %v516_v53  }
  0x87   : > { %1493 = vperm.xlu0 %5875, %v542_v59   ;;  %1503 = vperm.xlu1 %5876, %v544_v60  }
  0x88   : > { %5611 = vmatmul.mubr.msk.bf16.gmra.mxu1 %vm652_vm1, %v6870_v11  ;;  %5616 = vmatmul.mubr.msk.bf16.gmra.mxu0 %vm652_vm1, %v6875_v14 }
  0x89   : > { %1809 = vmatprep.mubr.bf16.mxu0 %v10104_v12  ;;  %2203 = vmatprep.mubr.bf16.mxu1 %v10104_v12 }
  0x8b   : > { %1498 = vperm.xlu0 %5875, %v543_v0   ;;  %1513 = vperm.xlu1 %5876, %v546_v6   ;;  %v5809_v6 = vld [vmem:[%s6691_s23 + $0x1c] sm:$0xf] }
  0x8c   : > { %v4915_v27 = vmul.bf16 %v5809_v6, %v6687_v16 }
  0x8f   : > { %1508 = vperm.xlu0 %5875, %v545_v3  }
  0x90   : > { %5617 = vmatmul.mubr.msk.bf16.gmra.mxu0 %vm652_vm1, %v6902_v23  ;;  %5641 = vmatmul.mubr.msk.bf16.vlgmr.msra.gmra.mxu1 %vm652_vm1, %v6758_v47 }
  0x91   : > { %2213 = vmatprep.mubr.bf16.mxu1 %v10104_v12  ;;  %2321 = vmatprep.mubr.bf16.mxu0 %v10104_v12 }
  0x92   : > { %2738 = vmatpush1.bf16.msra.mxu1 %v2718_v57 }
  0x93   : > { %5708 = vmatprep.subr.msk.bf16.mxu1 %vm668_vm0, %v3268_v58  ;;  %1568 = vperm.xlu0 %5875, %v547_v7  }
  0x98   : > { %5642 = vmatmul.mubr.msk.bf16.gmra.mxu1 %vm652_vm1, %v6785_v55  ;;  %5647 = vmatmul.mubr.msk.bf16.vlgmr.msra.gmra.mxu0 %vm652_vm1, %v6790_v56 }
  0x99   : > { %2856 = vmatpush1.bf16.msra.mxu0 %v2836_v1  ;;  %2223 = vmatprep.mubr.bf16.mxu1 %v10104_v12 }
  0x9a   : > { %2331 = vmatprep.mubr.bf16.mxu0 %v10104_v12  ;;  %5714 = vmatprep.subr.msk.bf16.mxu0 %vm668_vm0, %v3386_v2 }
  0x9f   : > { %v7105_v25 = vpop.permute.xlu0 %570  ;;  %v7120_v30 = vpop.permute.xlu1 %580 }
  0xa0   : > { %5643 = vmatmul.mubr.msk.bf16.gmra.mxu1 %vm652_vm1, %v6814_v62  ;;  %5648 = vmatmul.mubr.msk.bf16.gmra.mxu0 %vm652_vm1, %v6819_v63 }
  0xa1   : > { %2233 = vmatprep.mubr.bf16.mxu1 %v10104_v12  ;;  %2341 = vmatprep.mubr.bf16.mxu0 %v10104_v12 }
  0xa3   : > { %v7131_v35 = vpop.permute.xlu1 %585 }
  0xa4   : > { %v7122_v31 = vpop.permute.xlu0 %575 }
  0xa8   : > { %5644 = vmatmul.mubr.msk.bf16.gmra.mxu1 %vm652_vm1, %v6842_v4  ;;  %5649 = vmatmul.mubr.msk.bf16.gmra.mxu0 %vm652_vm1, %v6847_v5 }
  0xa9   : > { %2243 = vmatprep.mubr.bf16.mxu1 %v10104_v12  ;;  %2351 = vmatprep.mubr.bf16.mxu0 %v10104_v12 }
  0xaa   : > { %v7133_v36 = vpop.permute.xlu0 %590  ;;  %v7142_v37 = vpop.permute.xlu1 %595 }
  0xaf   : > { %v7144_v38 = vpop.permute.xlu0 %600  ;;  %v7158_v44 = vpop.permute.xlu1 %605 }
  0xb0   : > { %5645 = vmatmul.mubr.msk.bf16.gmra.mxu1 %vm652_vm1, %v6870_v11  ;;  %5650 = vmatmul.mubr.msk.bf16.gmra.mxu0 %vm652_vm1, %v6875_v14 }
  0xb1   : > { %2361 = vmatprep.mubr.bf16.mxu0 %v10104_v12  ;;  %2755 = vmatprep.mubr.bf16.mxu1 %v10104_v12 }
  0xb5   : > { %v7154_v41 = vpop.permute.xlu0 %610  ;;  %v7166_v51 = vpop.permute.xlu1 %615 }
  0xb8   : > { %5651 = vmatmul.mubr.msk.bf16.gmra.mxu0 %vm652_vm1, %v6902_v23  ;;  %5675 = vmatmul.mubr.msk.bf16.vlgmr.msra.gmra.mxu1 %vm652_vm1, %v6758_v47 }
  0xb9   : > { %2765 = vmatprep.mubr.bf16.mxu1 %v10104_v12  ;;  %2873 = vmatprep.mubr.bf16.mxu0 %v10104_v12  ;;  %v7162_v48 = vpop.permute.xlu0 %1078  ;;  %v7182_v58 = vpop.permute.xlu1 %1083 }
  0xba   : > { %3290 = vmatpush1.bf16.msra.mxu1 %v3270_v18  ;;  %10494 = vst [vmem:[#allocation6_spill] sm:$0xff] %v7162_v48  ;;  %10495 = vst [vmem:[#allocation7_spill] sm:$0xff] %v7182_v58  ;;  %v7210_v18 = vrot.slane %v5809_v6, %v6682_v15 }
  0xbb   : > { %5742 = vmatprep.subr.msk.bf16.mxu1 %vm668_vm0, %v3820_v19 }
  0xbd   : > { %v7203_v7 = vpop.permute.xlu1 %1093 }
  0xbe   : > { %v7184_v59 = vpop.permute.xlu0 %1088  ;;  %10497 = vst [vmem:[#allocation9_spill] sm:$0xff] %v7203_v7 }
  0xbf   : > { %10496 = vst [vmem:[#allocation8_spill] sm:$0xff] %v7184_v59 }
  0xc0   : > { %5676 = vmatmul.mubr.msk.bf16.gmra.mxu1 %vm652_vm1, %v6785_v55  ;;  %5681 = vmatmul.mubr.msk.bf16.vlgmr.msra.gmra.mxu0 %vm652_vm1, %v6790_v56 }
  0xc1   : > { %3408 = vmatpush1.bf16.msra.mxu0 %v3388_v21  ;;  %2775 = vmatprep.mubr.bf16.mxu1 %v10104_v12 }
  0xc2   : > { %2883 = vmatprep.mubr.bf16.mxu0 %v10104_v12  ;;  %5748 = vmatprep.subr.msk.bf16.mxu0 %vm668_vm0, %v3938_v22  ;;  %v7205_v8 = vpop.permute.xlu0 %1098 }
  0xc3   : > { %10498 = vst [vmem:[#allocation10_spill] sm:$0xff] %v7205_v8 }
  0xc6   : > { %v7228_v9 = vpop.permute.xlu0 %1153 }
  0xc7   : > { %10502 = vst [vmem:[#allocation14_spill] sm:$0xff] %v7228_v9 }
  0xc8   : > { %5677 = vmatmul.mubr.msk.bf16.gmra.mxu1 %vm652_vm1, %v6814_v62  ;;  %5682 = vmatmul.mubr.msk.bf16.gmra.mxu0 %vm652_vm1, %v6819_v63 }
  0xc9   : > { %2785 = vmatprep.mubr.bf16.mxu1 %v10104_v12  ;;  %2893 = vmatprep.mubr.bf16.mxu0 %v10104_v12 }
  0xd0   : > { %5678 = vmatmul.mubr.msk.bf16.gmra.mxu1 %vm652_vm1, %v6842_v4  ;;  %5683 = vmatmul.mubr.msk.bf16.gmra.mxu0 %vm652_vm1, %v6847_v5 }
  0xd1   : > { %2795 = vmatprep.mubr.bf16.mxu1 %v10104_v12  ;;  %2903 = vmatprep.mubr.bf16.mxu0 %v10104_v12 }
  0xd8   : > { %5679 = vmatmul.mubr.msk.bf16.gmra.mxu1 %vm652_vm1, %v6870_v11  ;;  %5684 = vmatmul.mubr.msk.bf16.gmra.mxu0 %vm652_vm1, %v6875_v14 }
  0xd9   : > { %2913 = vmatprep.mubr.bf16.mxu0 %v10104_v12  ;;  %3307 = vmatprep.mubr.bf16.mxu1 %v10104_v12 }
  0xe0   : > { %5685 = vmatmul.mubr.msk.bf16.gmra.mxu0 %vm652_vm1, %v6902_v23  ;;  %5709 = vmatmul.mubr.msk.bf16.vlgmr.msra.gmra.mxu1 %vm652_vm1, %v6758_v47 }
  0xe1   : > { %3317 = vmatprep.mubr.bf16.mxu1 %v10104_v12  ;;  %3425 = vmatprep.mubr.bf16.mxu0 %v10104_v12 }
  0xe2   : > { %3842 = vmatpush1.bf16.msra.mxu1 %v3822_v28 }
  0xe3   : > { %5776 = vmatprep.subr.msk.bf16.mxu1 %vm668_vm0, %v4372_v29 }
  0xe8   : > { %5710 = vmatmul.mubr.msk.bf16.gmra.mxu1 %vm652_vm1, %v6785_v55  ;;  %5715 = vmatmul.mubr.msk.bf16.vlgmr.msra.gmra.mxu0 %vm652_vm1, %v6790_v56 }
  0xe9   : > { %3960 = vmatpush1.bf16.msra.mxu0 %v3940_v33  ;;  %3327 = vmatprep.mubr.bf16.mxu1 %v10104_v12  ;;  %v7224_v33 = vpop.permute.xlu1 %1148 }
  0xea   : > { %3435 = vmatprep.mubr.bf16.mxu0 %v10104_v12  ;;  %5782 = vmatprep.subr.msk.bf16.mxu0 %vm668_vm0, %v4490_v34  ;;  %10501 = vst [vmem:[#allocation13_spill] sm:$0xff] %v7224_v33  ;;  %v4374_v34 = vsel %vm668_vm0, %v7108_v26, 0  ;;  %v10505_v26 = vmov 0  }
  0xf0   : > { %v709_v39 = vpop.f32.mrf.mxu0  ;;  %v7146_v40 = vpop.f32.mrf.mxu1  ;;  %5711 = vmatmul.mubr.msk.bf16.gmra.mxu1 %vm652_vm1, %v6814_v62  ;;  %5716 = vmatmul.mubr.msk.bf16.gmra.mxu0 %vm652_vm1, %v6819_v63 }
  0xf1   : > { %3337 = vmatprep.mubr.bf16.mxu1 %v10104_v12  ;;  %3445 = vmatprep.mubr.bf16.mxu0 %v10104_v12  ;;  %v7215_v21 = vadd.f32 %v709_v39, %v7105_v25  ;;  %v4924_v39 = vcombine.high %v7210_v18, %v7210_v18 }
  0xf2   : > { %v711_v42 = vpop.f32.mrf.mxu0  ;;  %v7156_v43 = vpop.f32.mrf.mxu1 }
  0xf3   : > { %10499 = vst [vmem:[#allocation11_spill] sm:$0xff] %v7215_v21  ;;  %v7221_v28 = vadd.f32 %v711_v42, %v7105_v25 }
  0xf4   : > { %v713_v45 = vpop.f32.mrf.mxu0  ;;  %v7160_v46 = vpop.f32.mrf.mxu1 }
  0xf5   : > { %10500 = vst [vmem:[#allocation12_spill] sm:$0xff] %v7221_v28  ;;  %v7237_v16 = vadd.f32 %v713_v45, %v7122_v31 }
  0xf6   : > { %v715_v49 = vpop.f32.mrf.mxu0  ;;  %v7164_v50 = vpop.f32.mrf.mxu1 }
  0xf7   : > { %10503 = vst [vmem:[#allocation15_spill] sm:$0xff] %v7237_v16 }
  0xf8   : > { %v7168_v52 = vpop.f32.mrf.mxu0  ;;  %v7170_v53 = vpop.f32.mrf.mxu1  ;;  %5712 = vmatmul.mubr.msk.bf16.gmra.mxu1 %vm652_vm1, %v6842_v4  ;;  %5717 = vmatmul.mubr.msk.bf16.gmra.mxu0 %vm652_vm1, %v6847_v5 }
  0xf9   : > { %3347 = vmatprep.mubr.bf16.mxu1 %v10104_v12  ;;  %3455 = vmatprep.mubr.bf16.mxu0 %v10104_v12 }
  0xfa   : > { %v7178_v54 = vpop.f32.mrf.mxu0  ;;  %v7180_v57 = vpop.f32.mrf.mxu1 }
  0xfc   : > { %v7186_v60 = vpop.f32.mrf.mxu0  ;;  %v7188_v61 = vpop.f32.mrf.mxu1 }
  0xfe   : > { %v7190_v0 = vpop.f32.mrf.mxu0  ;;  %v7192_v1 = vpop.f32.mrf.mxu1 }
 0x100   : > { %v7194_v2 = vpop.f32.mrf.mxu0  ;;  %v849_v3 = vpop.f32.mrf.mxu1  ;;  %5713 = vmatmul.mubr.msk.bf16.gmra.mxu1 %vm652_vm1, %v6870_v11  ;;  %5718 = vmatmul.mubr.msk.bf16.gmra.mxu0 %vm652_vm1, %v6875_v14 }
 0x101   : > { %3465 = vmatprep.mubr.bf16.mxu0 %v10104_v12  ;;  %3859 = vmatprep.mubr.bf16.mxu1 %v10104_v12  ;;  %v898_v29 = vadd.f32 %v849_v3, %v7215_v21  ;;  %v7245_v21 = vrot.slane %v4915_v27, %v6682_v15 }
 0x102   : > { %v7207_v10 = vpop.f32.mrf.mxu0  ;;  %v851_v17 = vpop.f32.mrf.mxu1 }
 0x103   : > { %v899_v25 = vadd.f32 %v851_v17, %v7221_v28  ;;  %v7252_v17 = vpop.permute.xlu1 %1158 }
 0x104   : > { %v7212_v19 = vpop.f32.mrf.mxu0  ;;  %v853_v20 = vpop.f32.mrf.mxu1  ;;  %10507 = vst [vmem:[#allocation18_spill] sm:$0xff] %v7252_v17 }
 0x106   : > { %v7217_v22 = vpop.f32.mrf.mxu0  ;;  %v855_v24 = vpop.f32.mrf.mxu1 }
 0x108   : > { %v859_v12 = vpop.f32.mrf.mxu1  ;;  %v1007_v13 = vpop.f32.mrf.mxu0  ;;  %5719 = vmatmul.mubr.msk.bf16.gmra.mxu0 %vm652_vm1, %v6902_v23  ;;  %5743 = vmatmul.mubr.msk.bf16.vlgmr.msra.gmra.mxu1 %vm652_vm1, %v6758_v47  ;;  %v900_v23 = vadd.f32 %v853_v20, %v7237_v16 }
 0x109   : > { %v7240_v42 = vadd.f32 %v1007_v13, %v898_v29  ;;  %3869 = vmatprep.mubr.bf16.mxu1 %v10505_v26  ;;  %3977 = vmatprep.mubr.bf16.mxu0 %v10505_v26  ;;  %v7254_v13 = vpop.permute.xlu0 %1163  ;;  %v7258_v29 = vadd.f32 %v715_v49, %v7122_v31  ;;  %v4492_v31 = vsel %vm668_vm0, %v7125_v32, 0  ;;  %v5042_v49 = vcombine.high %v7245_v21, %v7245_v21 }
 0x10a   : > { %v861_v3 = vpop.f32.mrf.mxu1  ;;  %v1009_v6 = vpop.f32.mrf.mxu0  ;;  %4394 = vmatpush1.bf16.msra.mxu1 %v4374_v34  ;;  %10508 = vst [vmem:[#allocation19_spill] sm:$0xff] %v7254_v13 }
 0x10b   : > { %10504 = vst [vmem:[#allocation16_spill] sm:$0xff] %v7240_v42  ;;  %v1126_v47 = vmul.f32 %v7162_v48, %v7240_v42  ;;  %v7250_v45 = vadd.f32 %v1009_v6, %v899_v25  ;;  %5810 = vmatprep.subr.msk.bf16.mxu1 %vm668_vm0, %v4924_v39  ;;  %10509 = vst [vmem:[#allocation20_spill] sm:$0xff] %v7258_v29  ;;  %v7267_v25 = vadd.f32 %v7168_v52, %v7120_v30 }
 0x10c   : > { %v863_v34 = vpop.f32.mrf.mxu1  ;;  %v1011_v28 = vpop.f32.mrf.mxu0  ;;  %v901_v6 = vadd.f32 %v855_v24, %v7258_v29  ;;  %v7283_v24 = vadd.f32 %v7186_v60, %v7131_v35 }
 0x10d   : > { %10506 = vst [vmem:[#allocation17_spill] sm:$0xff] %v7250_v45  ;;  %v1127_v15 = vmul.f32 %v7162_v48, %v7250_v45  ;;  %v1196_v20 = vadd.f32 %v7224_v33, %v1126_v47  ;;  %v7263_v27 = vadd.f32 %v1011_v28, %v900_v23  ;;  %10510 = vst [vmem:[#allocation21_spill] sm:$0xff] %v7267_v25  ;;  %v7294_v60 = vpop.permute.xlu1 %1103 }
 0x10e   : > { %v865_v42 = vpop.f32.mrf.mxu1  ;;  %v1013_v39 = vpop.f32.mrf.mxu0  ;;  %v7276_v45 = vadd.f32 %v7178_v54, %v7120_v30  ;;  %10512 = vst [vmem:[#allocation23_spill] sm:$0xff] %v7283_v24  ;;  %v902_v47 = vadd.f32 %v859_v12, %v7267_v25  ;;  %10513 = vst [vmem:[#allocation24_spill] sm:$0xff] %v7294_v60 }
 0x10f   : > { %v1197_v23 = vadd.f32 %v7224_v33, %v1127_v15  ;;  %v5585_v28 = vmul.f32 -1.442695, %v1196_v20  ;;  %v1128_v52 = vmul.f32 %v7182_v58, %v7263_v27  ;;  %v7286_v32 = vadd.f32 %v1013_v39, %v901_v6  ;;  %v7297_v12 = vpop.permute.xlu0 %1168 }
 0x110   : > { %10511 = vst [vmem:[#allocation22_spill] sm:$0xff] %v7276_v45  ;;  %v869_v29 = vpop.f32.mrf.mxu1  ;;  %v1017_v48 = vpop.f32.mrf.mxu0  ;;  %5744 = vmatmul.mubr.msk.bf16.gmra.mxu1 %vm652_vm1, %v6785_v55  ;;  %5749 = vmatmul.mubr.msk.bf16.vlgmr.msra.gmra.mxu0 %vm652_vm1, %v6790_v56  ;;  %v903_v30 = vadd.f32 %v861_v3, %v7276_v45  ;;  %10514 = vst [vmem:[#allocation25_spill] sm:$0xff] %v7297_v12  ;;  %v7301_v20 = vadd.f32 %v7190_v0, %v7131_v35 }
 0x111   : > { %5892 = vpow2.f32 %v5585_v28  ;;  %v5586_v54 = vmul.f32 -1.442695, %v1197_v23  ;;  %v1198_v15 = vadd.f32 %v7228_v9, %v1128_v52  ;;  %4512 = vmatpush1.bf16.msra.mxu0 %v4492_v31  ;;  %3879 = vmatprep.mubr.bf16.mxu1 %v10505_v26  ;;  %v1129_v55 = vmul.f32 %v7182_v58, %v7286_v32 }
 0x112   : > { %10515 = vst [vmem:[#allocation26_spill] sm:$0xff] %v7301_v20  ;;  %v7305_v56 = vadd.f32 %v1017_v48, %v902_v47  ;;  %v871_v3 = vpop.f32.mrf.mxu1  ;;  %v1019_v6 = vpop.f32.mrf.mxu0  ;;  %3987 = vmatprep.mubr.bf16.mxu0 %v10505_v26  ;;  %5816 = vmatprep.subr.msk.bf16.mxu0 %vm668_vm0, %v5042_v49  ;;  %v904_v39 = vadd.f32 %v863_v34, %v7283_v24  ;;  %v7317_v52 = vsel %vm668_vm0, %v7210_v18, 0  ;;  %v7331_v18 = vsel %vm668_vm0, %v7245_v21, 0 }
 0x113   : > { %5894 = vpow2.f32 %v5586_v54  ;;  %v5587_v31 = vmul.f32 -1.442695, %v1198_v15  ;;  %v7310_v23 = vadd.f32 %v1019_v6, %v903_v30  ;;  %v1199_v35 = vadd.f32 %v7228_v9, %v1129_v55 }
 0x114   : > { %10516 = vst [vmem:[#allocation27_spill] sm:$0xff] %v7305_v56  ;;  %v1130_v0 = vmul.f32 %v7184_v59, %v7305_v56  ;;  %v873_v28 = vpop.f32.mrf.mxu1  ;;  %v1021_v48 = vpop.f32.mrf.mxu0  ;;  %v905_v47 = vadd.f32 %v865_v42, %v7301_v20  ;;  %v7326_v30 = vadd.f32 %v7194_v2, %v7133_v36  ;;  %v7335_v42 = vadd.f32 %v7146_v40, %v7144_v38 }
 0x115   : > { %10517 = vst [vmem:[#allocation28_spill] sm:$0xff] %v7310_v23  ;;  %5896 = vpow2.f32 %v5587_v31  ;;  %v1131_v34 = vmul.f32 %v7184_v59, %v7310_v23  ;;  %v7322_v49 = vadd.f32 %v1021_v48, %v904_v39  ;;  %v5588_v54 = vmul.f32 -1.442695, %v1199_v35  ;;  %v7342_v35 = vpop.permute.xlu1 %1108 }
 0x116   : > { %10518 = vst [vmem:[#allocation29_spill] sm:$0xff] %v7326_v30  ;;  %v1200_v15 = vadd.f32 %v7252_v17, %v1130_v0  ;;  %v875_v55 = vpop.f32.mrf.mxu1  ;;  %v1023_v6 = vpop.f32.mrf.mxu0  ;;  %10519 = vst [vmem:[#allocation30_spill] sm:$0xff] %v7335_v42  ;;  %v7348_v48 = vadd.f32 %v7207_v10, %v7133_v36  ;;  %v906_v21 = vadd.f32 %v869_v29, %v7326_v30 }
 0x117   : > { %v1201_v39 = vadd.f32 %v7252_v17, %v1131_v34  ;;  %v1132_v31 = vmul.f32 %v7203_v7, %v7322_v49  ;;  %v7340_v2 = vadd.f32 %v1023_v6, %v905_v47  ;;  %10520 = vst [vmem:[#allocation31_spill] sm:$0xff] %v7342_v35  ;;  %v7344_v0 = vpop.permute.xlu0 %1173  ;;  %5898 = vpow2.f32 %v5588_v54 }
 0x118   : > { %10521 = vst [vmem:[#allocation32_spill] sm:$0xff] %v7344_v0  ;;  %10522 = vst [vmem:[#allocation33_spill] sm:$0xff] %v7348_v48  ;;  %v5589_v40 = vmul.f32 -1.442695, %v1200_v15  ;;  %v879_v23 = vpop.f32.mrf.mxu1  ;;  %v1027_v56 = vpop.f32.mrf.mxu0  ;;  %5745 = vmatmul.mubr.msk.bf16.gmra.mxu1 %vm652_vm1, %v6814_v62  ;;  %5750 = vmatmul.mubr.msk.bf16.gmra.mxu0 %vm652_vm1, %v6819_v63  ;;  %v7357_v47 = vadd.f32 %v7212_v19, %v7142_v37  ;;  %v7366_v62 = vadd.f32 %v7156_v43, %v7144_v38 }
 0x119   : > { %v5590_v34 = vmul.f32 -1.442695, %v1201_v39  ;;  %v1202_v36 = vadd.f32 %v7254_v13, %v1132_v31  ;;  %v1133_v10 = vmul.f32 %v7203_v7, %v7340_v2  ;;  %3889 = vmatprep.mubr.bf16.mxu1 %v10505_v26  ;;  %3997 = vmatprep.mubr.bf16.mxu0 %v10505_v26  ;;  %v907_v63 = vadd.f32 %v871_v3, %v7348_v48 }
 0x11a   : > { %10523 = vst [vmem:[#allocation34_spill] sm:$0xff] %v7357_v47  ;;  %10524 = vst [vmem:[#allocation35_spill] sm:$0xff] %v7366_v62  ;;  %5900 = vpow2.f32 %v5589_v40  ;;  %v7369_v29 = vadd.f32 %v1027_v56, %v906_v21  ;;  %v881_v19 = vpop.f32.mrf.mxu1  ;;  %v1029_v54 = vpop.f32.mrf.mxu0  ;;  %v908_v15 = vadd.f32 %v873_v28, %v7357_v47  ;;  %v7375_v31 = vadd.f32 %v7160_v46, %v7158_v44 }
 0x11b   : > { %5902 = vpow2.f32 %v5590_v34  ;;  %v5591_v6 = vmul.f32 -1.442695, %v1202_v36  ;;  %v1203_v39 = vadd.f32 %v7254_v13, %v1133_v10  ;;  %v7379_v38 = vadd.f32 %v7217_v22, %v7142_v37  ;;  %v7391_v46 = vpop.permute.xlu1 %1113  ;;  %v7393_v36 = vpop.permute.xlu0 %1178 }
 0x11c   : > { %10525 = vst [vmem:[#allocation36_spill] sm:$0xff] %v7369_v29  ;;  %10526 = vst [vmem:[#allocation37_spill] sm:$0xff] %v7375_v31  ;;  %v1134_v43 = vmul.f32 %v7205_v8, %v7369_v29  ;;  %v7383_v56 = vadd.f32 %v1029_v54, %v907_v63  ;;  %v883_v3 = vpop.f32.mrf.mxu1  ;;  %v1031_v21 = vpop.f32.mrf.mxu0  ;;  %v7387_v28 = vadd.f32 %v7164_v50, %v7158_v44 }
 0x11d   : > { %10527 = vst [vmem:[#allocation38_spill] sm:$0xff] %v7379_v38  ;;  %5904 = vpow2.f32 %v5591_v6  ;;  %v5592_v40 = vmul.f32 -1.442695, %v1203_v39  ;;  %v7389_v34 = vadd.f32 %v1031_v21, %v908_v15  ;;  %10531 = vst [vmem:[#allocation42_spill] sm:$0xff] %v7391_v46  ;;  %v7397_v22 = vadd.f32 %v7170_v53, %v7154_v41 }
 0x11e   : > { %10528 = vst [vmem:[#allocation39_spill] sm:$0xff] %v7383_v56  ;;  %10529 = vst [vmem:[#allocation40_spill] sm:$0xff] %v7387_v28  ;;  %v5893_v37 = vpop.eup %5892  ;;  %v909_v10 = vadd.f32 %v875_v55, %v7379_v38  ;;  %v1204_v63 = vadd.f32 %v7297_v12, %v1134_v43  ;;  %v1135_v44 = vmul.f32 %v7205_v8, %v7383_v56  ;;  %v885_v50 = vpop.f32.mrf.mxu1 }
 0x11f   : > { %10530 = vst [vmem:[#allocation41_spill] sm:$0xff] %v7389_v34  ;;  %10532 = vst [vmem:[#allocation43_spill] sm:$0xff] %v7393_v36  ;;  %v1033_v54 = vpop.f32.mrf.mxu0  ;;  %v7405_v15 = vadd.f32 %v7180_v57, %v7154_v41  ;;  %v1276_v6 = vadd.f32 1.0, %v5893_v37  ;;  %5906 = vpow2.f32 %v5592_v40  ;;  %v1136_v39 = vmul.f32 %v7294_v60, %v7389_v34 }
 0x120   : > { %10533 = vst [vmem:[#allocation44_spill] sm:$0xff] %v7397_v22  ;;  %v5895_v53 = vpop.eup %5894  ;;  %v910_v21 = vadd.f32 %v879_v23, %v7335_v42  ;;  %v5593_v55 = vmul.f32 -1.442695, %v1204_v63  ;;  %v1205_v43 = vadd.f32 %v7297_v12, %v1135_v44  ;;  %v7411_v29 = vadd.f32 %v1033_v54, %v909_v10  ;;  %v889_v56 = vpop.f32.mrf.mxu1  ;;  %5746 = vmatmul.mubr.msk.bf16.gmra.mxu1 %vm652_vm1, %v6842_v4 }
 0x121   : > { %10534 = vst [vmem:[#allocation45_spill] sm:$0xff] %v7405_v15  ;;  %v1037_v38 = vpop.f32.mrf.mxu0  ;;  %5751 = vmatmul.mubr.msk.bf16.gmra.mxu0 %vm652_vm1, %v6847_v5  ;;  %v1277_v41 = vadd.f32 1.0, %v5895_v53  ;;  %5908 = vrcp.f32 %v1276_v6  ;;  %v911_v57 = vadd.f32 %v881_v19, %v7366_v62  ;;  %v1206_v40 = vadd.f32 %v7344_v0, %v1136_v39  ;;  %3899 = vmatprep.mubr.bf16.mxu1 %v10505_v26  ;;  %v7426_v6 = vpop.permute.xlu1 %1118 }
 0x122   : > { %10535 = vst [vmem:[#allocation46_spill] sm:$0xff] %v7411_v29  ;;  %4007 = vmatprep.mubr.bf16.mxu0 %v10505_v26  ;;  %v5897_v23 = vpop.eup %5896  ;;  %5910 = vpow2.f32 %v5593_v55  ;;  %v5594_v37 = vmul.f32 -1.442695, %v1205_v43  ;;  %v1137_v10 = vmul.f32 %v7294_v60, %v7411_v29  ;;  %v7423_v4 = vadd.f32 %v1037_v38, %v910_v21  ;;  %v891_v63 = vpop.f32.mrf.mxu1  ;;  %10537 = vst [vmem:[#allocation48_spill] sm:$0xff] %v7426_v6 }
 0x123   : > { %v1039_v5 = vpop.f32.mrf.mxu0  ;;  %5912 = vrcp.f32 %v1277_v41  ;;  %v1278_v44 = vadd.f32 1.0, %v5897_v23  ;;  %v912_v19 = vadd.f32 %v883_v3, %v7375_v31  ;;  %v5595_v54 = vmul.f32 -1.442695, %v1206_v40  ;;  %v7428_v39 = vpop.permute.xlu0 %1183 }
 0x124   : > { %10536 = vst [vmem:[#allocation47_spill] sm:$0xff] %v7423_v4  ;;  %10538 = vst [vmem:[#allocation49_spill] sm:$0xff] %v7428_v39  ;;  %5914 = vpow2.f32 %v5594_v37  ;;  %v1207_v53 = vadd.f32 %v7344_v0, %v1137_v10  ;;  %v1138_v55 = vmul.f32 %v7342_v35, %v7423_v4  ;;  %v7433_v43 = vadd.f32 %v1039_v5, %v911_v57  ;;  %v893_v38 = vpop.f32.mrf.mxu1  ;;  %v5899_v29 = vpop.eup %5898 }
 0x125   : > { %v1041_v21 = vpop.f32.mrf.mxu0  ;;  %v7437_v41 = vadd.f32 %v7188_v61, %v7166_v51  ;;  %5916 = vrcp.f32 %v1278_v44  ;;  %v913_v3 = vadd.f32 %v885_v50, %v7387_v28  ;;  %v1279_v23 = vadd.f32 1.0, %v5899_v29 }
 0x126   : > { %10539 = vst [vmem:[#allocation50_spill] sm:$0xff] %v7433_v43  ;;  %v7440_v40 = vadd.f32 %v1041_v21, %v912_v19  ;;  %5918 = vpow2.f32 %v5595_v54  ;;  %v5596_v37 = vmul.f32 -1.442695, %v1207_v53  ;;  %v1208_v10 = vadd.f32 %v7393_v36, %v1138_v55  ;;  %v895_v4 = vpop.f32.mrf.mxu1 }
 0x127   : > { %10540 = vst [vmem:[#allocation51_spill] sm:$0xff] %v7437_v41  ;;  %v1043_v57 = vpop.f32.mrf.mxu0  ;;  %v5901_v5 = vpop.eup %5900  ;;  %v914_v34 = vadd.f32 %v889_v56, %v7397_v22  ;;  %v1139_v31 = vmul.f32 %v7342_v35, %v7433_v43  ;;  %5920 = vrcp.f32 %v1279_v23  ;;  %v915_v54 = vadd.f32 %v891_v63, %v7405_v15 }
 0x128   : > { %10541 = vst [vmem:[#allocation52_spill] sm:$0xff] %v7440_v40  ;;  %v1140_v61 = vmul.f32 %v7391_v46, %v7440_v40  ;;  %v7448_v44 = vadd.f32 %v1043_v57, %v913_v3  ;;  %v5903_v50 = vpop.eup %5902  ;;  %v1280_v29 = vadd.f32 1.0, %v5901_v5  ;;  %v5597_v19 = vmul.f32 -1.442695, %v1208_v10  ;;  %v7451_v55 = vpop.f32.mrf.mxu1  ;;  %5747 = vmatmul.mubr.msk.bf16.gmra.mxu1 %vm652_vm1, %v6870_v11 }
 0x129   : > { %v1047_v53 = vpop.f32.mrf.mxu0  ;;  %5752 = vmatmul.mubr.msk.bf16.gmra.mxu0 %vm652_vm1, %v6875_v14  ;;  %v1281_v56 = vadd.f32 1.0, %v5903_v50  ;;  %5922 = vpow2.f32 %v5596_v37  ;;  %v1209_v21 = vadd.f32 %v7393_v36, %v1139_v31  ;;  %v7458_v3 = vpop.permute.xlu1 %1123  ;;  %4411 = vmatprep.mubr.bf16.mxu1 %v10505_v26  ;;  %v916_v11 = vadd.f32 %v893_v38, %v7437_v41 }
 0x12a   : > { %10542 = vst [vmem:[#allocation53_spill] sm:$0xff] %v7448_v44  ;;  %10543 = vst [vmem:[#allocation54_spill] sm:$0xff] %v7458_v3  ;;  %v1210_v23 = vadd.f32 %v7428_v39, %v1140_v61  ;;  %v7461_v10 = vpop.permute.xlu0 %1188  ;;  %4017 = vmatprep.mubr.bf16.mxu0 %v10505_v26  ;;  %v5905_v63 = vpop.eup %5904  ;;  %5924 = vrcp.f32 %v1280_v29  ;;  %v1141_v14 = vmul.f32 %v7391_v46, %v7448_v44 }
 0x12b   : > { %10544 = vst [vmem:[#allocation55_spill] sm:$0xff] %v7461_v10  ;;  %v7468_v37 = vadd.f32 %v1047_v53, %v914_v34  ;;  %v1049_v31 = vpop.f32.mrf.mxu0  ;;  %v7470_v57 = vpop.f32.mrf.mxu1  ;;  %5926 = vrcp.f32 %v1281_v56  ;;  %v1282_v5 = vadd.f32 1.0, %v5905_v63  ;;  %v5598_v61 = vmul.f32 -1.442695, %v1209_v21 }
 0x12c   : > { %v5599_v50 = vmul.f32 -1.442695, %v1210_v23  ;;  %v5907_v40 = vpop.eup %5906  ;;  %5928 = vpow2.f32 %v5597_v19  ;;  %v1211_v43 = vadd.f32 %v7428_v39, %v1141_v14  ;;  %v7475_v38 = vadd.f32 %v1049_v31, %v915_v54 }
 0x12d   : > { %10545 = vst [vmem:[#allocation56_spill] sm:$0xff] %v7468_v37  ;;  %v1142_v29 = vmul.f32 %v7426_v6, %v7468_v37  ;;  %v1051_v41 = vpop.f32.mrf.mxu0  ;;  %v1657_v44 = vpop.f32.mrf.mxu1  ;;  %v7479_v34 = vadd.f32 %v7192_v1, %v7166_v51  ;;  %5930 = vrcp.f32 %v1282_v5  ;;  %v1283_v53 = vadd.f32 1.0, %v5907_v40 }
 0x12e   : > { %10546 = vst [vmem:[#allocation57_spill] sm:$0xff] %v7475_v38  ;;  %v7481_v56 = vadd.f32 %v1051_v41, %v916_v11  ;;  %v5909_v21 = vpop.eup %5908  ;;  %5932 = vpow2.f32 %v5598_v61  ;;  %v5600_v19 = vmul.f32 -1.442695, %v1211_v43  ;;  %v1143_v63 = vmul.f32 %v7426_v6, %v7475_v38  ;;  %v7489_v1 = vpop.permute.xlu1 %1193 }
 0x12f   : > { %10547 = vst [vmem:[#allocation58_spill] sm:$0xff] %v7479_v34  ;;  %v1212_v23 = vadd.f32 %v7461_v10, %v1142_v29  ;;  %v1053_v54 = vpop.f32.mrf.mxu0  ;;  %v7486_v14 = vpop.f32.mrf.mxu1  ;;  %5934 = vrcp.f32 %v1283_v53  ;;  %v917_v51 = vadd.f32 %v895_v4, %v7479_v34  ;;  %10549 = vst [vmem:[#allocation60_spill] sm:$0xff] %v7489_v1  ;;  %v1336_v43 = vsub.f32 1.0, %v5909_v21  ;;  %v10551_v53 = vld [vmem:[#allocation5_spill] sm:$0xff]  ;;  %v7503_v4 = vld [vmem:[%s10094_s3] sm:$0xff]  }
 0x130   : > { %10548 = vst [vmem:[#allocation59_spill] sm:$0xff] %v7481_v56  ;;  %v5911_v31 = vpop.eup %5910  ;;  %v1144_v41 = vmul.f32 %v7458_v3, %v7481_v56  ;;  %v7493_v40 = vpop.permute.xlu0 %1358  ;;  %5936 = vpow2.f32 %v5599_v50  ;;  %v1213_v29 = vadd.f32 %v7461_v10, %v1143_v63  ;;  %10552 = vst [vmem:[#allocation5_spill] sm:$0xff] %v7503_v4  ;;  %5777 = vmatmul.mubr.msk.bf16.vlgmr.msra.gmra.mxu1 %vm652_vm1, %v7503_v4 }
 0x131   : > { %10550 = vst [vmem:[#allocation61_spill] sm:$0xff] %v7493_v40  ;;  %v5913_v11 = vpop.eup %5912  ;;  %v1284_v5 = vadd.f32 1.0, %v5911_v31  ;;  %v5601_v61 = vmul.f32 -1.442695, %v1212_v23  ;;  %v7496_v38 = vpop.f32.mrf.mxu1  ;;  %5753 = vmatmul.mubr.msk.bf16.gmra.mxu0 %vm652_vm1, %v10551_v53  ;;  %5938 = vpow2.f32 %v5600_v19  ;;  %v1406_v63 = vmul.f32 %v7493_v40, %v1336_v43  ;;  %4421 = vmatprep.mubr.bf16.mxu1 %v10505_v26 }
 0x132   : > { %v1771_v37 = vpop.f32.mrf.mxu0  ;;  %v5915_v56 = vpop.eup %5914  ;;  %v1214_v50 = vadd.f32 %v7489_v1, %v1144_v41  ;;  %v1337_v23 = vsub.f32 1.0, %v5913_v11  ;;  %4529 = vmatprep.mubr.bf16.mxu0 %v10505_v26  ;;  %v5602_v10 = vmul.f32 -1.442695, %v1213_v29  ;;  %v7513_v34 = vadd.f32 %v1053_v54, %v917_v51  ;;  %4946 = vmatpush1.bf16.msra.mxu1 %v7317_v52  ;;  %v10555_v52 = vld [vmem:[#allocation11_spill] sm:$0xff] }
 0x133   : > { %v7511_v31 = vpop.eup %5916  ;;  %5940 = vrcp.f32 %v1284_v5  ;;  %v1285_v53 = vadd.f32 1.0, %v5915_v56  ;;  %v7515_v6 = vpop.f32.mrf.mxu1  ;;  %v7537_v35 = vadd.f32 %v5909_v21, %v1406_v63 }
 0x134   : > { %10553 = vst [vmem:[#allocation62_spill] sm:$0xff] %v7513_v34  ;;  %v1773_v39 = vpop.f32.mrf.mxu0  ;;  %v5919_v19 = vpop.eup %5918  ;;  %5942 = vpow2.f32 %v5601_v61  ;;  %v5603_v41 = vmul.f32 -1.442695, %v1214_v50  ;;  %v1338_v43 = vsub.f32 1.0, %v7511_v31  ;;  %v1407_v46 = vmul.f32 %v7493_v40, %v1337_v23  ;;  %v10556_v50 = vld [vmem:[#allocation12_spill] sm:$0xff] }
 0x135   : > { %5944 = vrcp.f32 %v1285_v53  ;;  %v1286_v15 = vadd.f32 1.0, %v5919_v19  ;;  %v1145_v56 = vmul.f32 %v7458_v3, %v7513_v34  ;;  %v7522_v5 = vpop.f32.mrf.mxu1  ;;  %v5921_v36 = vpop.eup %5920  ;;  %v1702_v61 = vadd.f32 %v7451_v55, %v10555_v52 }
 0x136   : > { %v7524_v54 = vpop.f32.mrf.mxu0  ;;  %5946 = vpow2.f32 %v5602_v10  ;;  %v1703_v22 = vadd.f32 %v7470_v57, %v10556_v50  ;;  %v7532_v23 = vadd.f32 %v1657_v44, %v7237_v16  ;;  %v7534_v53 = vpop.permute.xlu1 %1363  ;;  %v1339_v34 = vsub.f32 1.0, %v5921_v36 }
 0x137   : > { %10557 = vst [vmem:[#allocation63_spill] sm:$0xff] %v7534_v53  ;;  %v5923_v19 = vpop.eup %5922  ;;  %v1408_v3 = vmul.f32 %v7534_v53, %v1338_v43  ;;  %v1215_v29 = vadd.f32 %v7489_v1, %v1145_v56  ;;  %v7540_v51 = vpop.f32.mrf.mxu1  ;;  %5948 = vpow2.f32 %v5603_v41  ;;  %v7544_v57 = vadd.f32 %v5913_v11, %v1407_v46  ;;  %v7565_v46 = vld [vmem:[%s10095_s4] sm:$0xff]  }
 0x138   : > { %v7542_v55 = vpop.f32.mrf.mxu0  ;;  %v5925_v10 = vpop.eup %5924  ;;  %v1287_v52 = vadd.f32 1.0, %v5923_v19  ;;  %v7546_v44 = vadd.f32 %v1771_v37, %v1702_v61  ;;  %5950 = vrcp.f32 %v1286_v15  ;;  %v1409_v43 = vmul.f32 %v7534_v53, %v1339_v34  ;;  %v7558_v19 = vld [vmem:[%s10094_s3 + $0x8] sm:$0xff]   ;;  %10560 = vst [vmem:[#allocation66_spill] sm:$0xff] %v7565_v46  ;;  %v10561_v34 = vld [vmem:[#allocation6_spill] sm:$0xff] }
 0x139   : > { %v7548_v16 = vpop.eup %5926  ;;  %v5604_v21 = vmul.f32 -1.442695, %v1215_v29  ;;  %v1340_v63 = vsub.f32 1.0, %v5925_v10  ;;  %v7551_v50 = vpop.f32.mrf.mxu1  ;;  %10559 = vst [vmem:[#allocation65_spill] sm:$0xff] %v7558_v19  ;;  %5778 = vmatmul.mubr.msk.bf16.gmra.mxu1 %vm652_vm1, %v7558_v19  ;;  %5783 = vmatmul.mubr.msk.bf16.vlgmr.msra.gmra.mxu0 %vm652_vm1, %v7565_v46  ;;  %v7574_v29 = vadd.f32 %v1773_v39, %v1703_v22  ;;  %v10564_v53 = vld [vmem:[#allocation20_spill] sm:$0xff]  ;;  %v7601_v19 = vadd.f32 %v7511_v31, %v1408_v3 }
 0x13a   : > { %10558 = vst [vmem:[#allocation64_spill] sm:$0xff] %v7546_v44  ;;  %v7553_v56 = vpop.f32.mrf.mxu0  ;;  %v5929_v15 = vpop.eup %5928  ;;  %v1341_v37 = vsub.f32 1.0, %v7548_v16  ;;  %5952 = vrcp.f32 %v1287_v52  ;;  %v1840_v11 = vmul.f32 %v7546_v44, %v10561_v34  ;;  %5064 = vmatpush1.bf16.msra.mxu0 %v7331_v18  ;;  %4431 = vmatprep.mubr.bf16.mxu1 %v10505_v26  ;;  %v7582_v28 = vadd.f32 %v7486_v14, %v10564_v53 }
 0x13b   : > { %v7572_v41 = vpop.permute.xlu0 %1368  ;;  %10563 = vst [vmem:[#allocation68_spill] sm:$0xff] %v7574_v29  ;;  %v7578_v61 = vpop.eup %5930  ;;  %v1288_v1 = vadd.f32 1.0, %v5929_v15  ;;  %5954 = vpow2.f32 %v5604_v21  ;;  %4539 = vmatprep.mubr.bf16.mxu0 %v10505_v26  ;;  %v7592_v18 = vadd.f32 %v7496_v38, %v7267_v25  ;;  %v7603_v40 = vadd.f32 %v5921_v36, %v1409_v43 }
 0x13c   : > { %10562 = vst [vmem:[#allocation67_spill] sm:$0xff] %v7572_v41  ;;  %v1410_v52 = vmul.f32 %v7572_v41, %v1340_v63  ;;  %v7585_v46 = vpop.f32.mrf.mxu1  ;;  %v7587_v44 = vpop.f32.mrf.mxu0  ;;  %v1860_v39 = vadd.f32 %v1840_v11, %v7224_v33  ;;  %v1342_v14 = vsub.f32 1.0, %v7578_v61  ;;  %v1841_v63 = vmul.f32 %v7574_v29, %v10561_v34 }
 0x13d   : > { %v5933_v22 = vpop.eup %5932  ;;  %v7595_v21 = vpop.permute.xlu1 %1373  ;;  %v7607_v38 = vadd.f32 %v7515_v6, %v7276_v45  ;;  %5956 = vrcp.f32 %v1288_v1  ;;  %v1411_v34 = vmul.f32 %v7572_v41, %v1341_v37  ;;  %v7619_v6 = vadd.f32 %v7524_v54, %v7532_v23  ;;  %v10568_v23 = vld [vmem:[#allocation16_spill] sm:$0xff] }
 0x13e   : > { %10565 = vst [vmem:[#allocation69_spill] sm:$0xff] %v7595_v21  ;;  %v5935_v15 = vpop.eup %5934  ;;  %v1289_v53 = vadd.f32 1.0, %v5933_v22  ;;  %v7609_v25 = vpop.f32.mrf.mxu1  ;;  %v5618_v62 = vmul.f32 -1.442695, %v1860_v39  ;;  %v7614_v3 = vadd.f32 %v5925_v10, %v1410_v52  ;;  %v1861_v36 = vadd.f32 %v1841_v63, %v7224_v33 }
 0x13f   : > { %v7611_v11 = vpop.f32.mrf.mxu0  ;;  %v5937_v0 = vpop.eup %5936  ;;  %v1343_v60 = vsub.f32 1.0, %v5935_v15  ;;  %10566 = vst [vmem:[#allocation70_spill] sm:$0xff] %v7619_v6  ;;  %v1412_v37 = vmul.f32 %v7595_v21, %v1342_v14  ;;  %v1842_v54 = vmul.f32 %v7619_v6, %v7182_v58  ;;  %v1446_v33 = vmul.f32 %v7537_v35, %v10568_v23 }
 0x140   : > { %v5939_v22 = vpop.eup %5938  ;;  %5958 = vrcp.f32 %v1289_v53  ;;  %v7621_v31 = vpop.f32.mrf.mxu1  ;;  %v1290_v1 = vadd.f32 1.0, %v5937_v0  ;;  %v5619_v63 = vmul.f32 -1.442695, %v1861_v36  ;;  %v7642_v0 = vld [vmem:[%s10094_s3 + $0x10] sm:$0xff]   ;;  %v7655_v14 = vadd.f32 %v7522_v5, %v7283_v24 }
 0x141   : > { %v7623_v43 = vpop.f32.mrf.mxu0  ;;  %v7625_v45 = vpop.eup %5940  ;;  %v1291_v39 = vadd.f32 1.0, %v5939_v22  ;;  %5960 = vpow2.f32 %v5618_v62  ;;  %v1413_v52 = vmul.f32 %v7595_v21, %v1343_v60  ;;  %10569 = vst [vmem:[#allocation16_spill] sm:$0xff] %v7642_v0  ;;  %5779 = vmatmul.mubr.msk.bf16.gmra.mxu1 %vm652_vm1, %v7642_v0  ;;  %v7649_v60 = vld [vmem:[%s10095_s4 + $0x8] sm:$0xff]  }
 0x142   : > { %v7628_v53 = vpop.permute.xlu0 %1378  ;;  %v5943_v10 = vpop.eup %5942  ;;  %10570 = vst [vmem:[#allocation72_spill] sm:$0xff] %v7649_v60  ;;  %5784 = vmatmul.mubr.msk.bf16.gmra.mxu0 %vm652_vm1, %v7649_v60  ;;  %v10572_v36 = vld [vmem:[#allocation17_spill] sm:$0xff]  ;;  %4441 = vmatprep.mubr.bf16.mxu1 %v10505_v26  ;;  %v7664_v60 = vadd.f32 %v7548_v16, %v1411_v34  ;;  %v7680_v34 = vadd.f32 %v7542_v55, %v7582_v28 }
 0x143   : > { %10567 = vst [vmem:[#allocation71_spill] sm:$0xff] %v7628_v53  ;;  %v7635_v41 = vpop.f32.mrf.mxu1  ;;  %v7637_v29 = vpop.f32.mrf.mxu0  ;;  %5962 = vrcp.f32 %v1291_v39  ;;  %v1292_v62 = vadd.f32 1.0, %v5943_v10  ;;  %v1447_v23 = vmul.f32 %v7544_v57, %v10572_v36  ;;  %4549 = vmatprep.mubr.bf16.mxu0 %v10505_v26  ;;  %v1862_v39 = vadd.f32 %v1842_v54, %v7228_v9 }
 0x144   : > { %v5945_v35 = vpop.eup %5944  ;;  %v7657_v22 = vpop.permute.xlu1 %1468  ;;  %5964 = vpow2.f32 %v5619_v63  ;;  %v7672_v57 = vadd.f32 %v7578_v61, %v1412_v37  ;;  %v1344_v36 = vsub.f32 1.0, %v7625_v45  ;;  %v7675_v4 = vadd.f32 %v5935_v15, %v1413_v52 }
 0x145   : > { %10571 = vst [vmem:[#allocation73_spill] sm:$0xff] %v7657_v22  ;;  %v5947_v21 = vpop.eup %5946  ;;  %v1345_v6 = vsub.f32 1.0, %v5945_v35  ;;  %v7667_v10 = vpop.f32.mrf.mxu1  ;;  %5966 = vrcp.f32 %v1290_v1  ;;  %v5620_v12 = vmul.f32 -1.442695, %v1862_v39  ;;  %v1516_v16 = vmul.f32 %v7657_v22, %v1446_v33 }
 0x146   : > { %v7669_v5 = vpop.f32.mrf.mxu0  ;;  %v1293_v24 = vadd.f32 1.0, %v5947_v21  ;;  %v5949_v0 = vpop.eup %5948  ;;  %5968 = vrcp.f32 %v1292_v62  ;;  %v1517_v1 = vmul.f32 %v7657_v22, %v1447_v23  ;;  %v7694_v33 = vadd.f32 %v7540_v51, %v7301_v20 }
 0x147   : > { %v7682_v63 = vpop.f32.mrf.mxu1  ;;  %v7686_v21 = vpop.eup %5950  ;;  %v1294_v61 = vadd.f32 1.0, %v5949_v0  ;;  %v1415_v15 = vmul.f32 %v7628_v53, %v1345_v6  ;;  %5970 = vpow2.f32 %v5620_v12  ;;  %v1843_v28 = vmul.f32 %v7680_v34, %v7182_v58 }
 0x148   : > { %v7684_v54 = vpop.f32.mrf.mxu0  ;;  %v7690_v37 = vpop.eup %5952  ;;  %v7700_v55 = vadd.f32 %v7553_v56, %v7592_v18  ;;  %5972 = vrcp.f32 %v1293_v24  ;;  %v1414_v6 = vmul.f32 %v7628_v53, %v1344_v36  ;;  %v7709_v12 = vadd.f32 %v7551_v50, %v7326_v30  ;;  %v7725_v50 = vld [vmem:[%s10094_s3 + $0x18] sm:$0xff]  }
 0x149   : > { %v7702_v52 = vpop.permute.xlu0 %1473  ;;  %v5955_v62 = vpop.eup %5954  ;;  %v1448_v51 = vmul.f32 %v7601_v19, %v7263_v27  ;;  %5974 = vrcp.f32 %v1294_v61  ;;  %v1863_v56 = vadd.f32 %v1843_v28, %v7228_v9  ;;  %v1449_v24 = vmul.f32 %v7603_v40, %v7286_v32  ;;  %5780 = vmatmul.mubr.msk.bf16.gmra.mxu1 %vm652_vm1, %v7725_v50  ;;  %v7732_v27 = vld [vmem:[%s10095_s4 + $0x10] sm:$0xff]  }
 0x14a   : > { %10573 = vst [vmem:[#allocation17_spill] sm:$0xff] %v7700_v55  ;;  %10574 = vst [vmem:[#allocation74_spill] sm:$0xff] %v7702_v52  ;;  %v7704_v0 = vpop.f32.mrf.mxu0  ;;  %v7713_v23 = vpop.f32.mrf.mxu1  ;;  %v1844_v18 = vmul.f32 %v7700_v55, %v7184_v59  ;;  %5785 = vmatmul.mubr.msk.bf16.gmra.mxu0 %vm652_vm1, %v7732_v27  ;;  %v1295_v19 = vadd.f32 1.0, %v5955_v62  ;;  %v7736_v32 = vadd.f32 %v5945_v35, %v1415_v15  ;;  %4451 = vmatprep.mubr.bf16.mxu1 %v10505_v26 }
 0x14b   : > { %v1518_v40 = vmul.f32 %v7702_v52, %v1448_v51  ;;  %v7741_v36 = vadd.f32 %v7587_v44, %v7607_v38  ;;  %v7744_v61 = vpop.eup %5956  ;;  %v1347_v28 = vsub.f32 1.0, %v7690_v37  ;;  %v5621_v30 = vmul.f32 -1.442695, %v1863_v56  ;;  %4559 = vmatprep.mubr.bf16.mxu0 %v10505_v26 }
 0x14c   : > { %v7720_v39 = vpop.f32.mrf.mxu0  ;;  %v1864_v9 = vadd.f32 %v1844_v18, %v7252_v17  ;;  %v1519_v20 = vmul.f32 %v7702_v52, %v1449_v24  ;;  %v7758_v38 = vadd.f32 %v7611_v11, %v7655_v14  ;;  %v1346_v51 = vsub.f32 1.0, %v7686_v21  ;;  %v7761_v56 = vpop.f32.mrf.mxu1 }
 0x14d   : > { %v7752_v35 = vpop.eup %5958  ;;  %v1536_v15 = vadd.f32 %v1518_v40, %v1516_v16  ;;  %v1845_v44 = vmul.f32 %v7741_v36, %v7184_v59  ;;  %v7764_v24 = vadd.f32 %v7625_v45, %v1414_v6  ;;  %5976 = vpow2.f32 %v5621_v30  ;;  %v7771_v14 = vpop.permute.xlu0 %1478 }
 0x14e   : > { %v7749_v62 = vpop.f32.mrf.mxu0  ;;  %10575 = vst [vmem:[#allocation75_spill] sm:$0xff] %v7758_v38  ;;  %v5961_v18 = vpop.eup %5960  ;;  %v5622_v58 = vmul.f32 -1.442695, %v1864_v9  ;;  %v1551_v53 = vadd.f32 %v1519_v20, %v1517_v1  ;;  %5978 = vrcp.f32 %v1295_v19  ;;  %v1846_v11 = vmul.f32 %v7758_v38, %v7203_v7  ;;  %10576 = vst [vmem:[#allocation76_spill] sm:$0xff] %v7771_v14  ;;  %v10578_v20 = vld [vmem:[#allocation27_spill] sm:$0xff]  ;;  %v10579_v1 = vld [vmem:[#allocation28_spill] sm:$0xff] }
 0x14f   : > { %v1940_v16 = vadd.f32 1.0, %v5961_v18  ;;  %v1865_v40 = vadd.f32 %v1845_v44, %v7252_v17  ;;  %v7777_v45 = vadd.f32 %v7585_v46, %v7348_v48  ;;  %v7779_v9 = vpop.permute.xlu1 %1383  ;;  %v1450_v30 = vmul.f32 %v7614_v3, %v10578_v20  ;;  %v7789_v38 = vpop.f32.mrf.mxu1 }
 0x150   : > { %v7766_v55 = vpop.f32.mrf.mxu0  ;;  %v7773_v59 = vpop.eup %5962  ;;  %5980 = vpow2.f32 %v5622_v58  ;;  %10577 = vst [vmem:[#allocation77_spill] sm:$0xff] %v7779_v9  ;;  %v1451_v6 = vmul.f32 %v7664_v60, %v10579_v1  ;;  %v1866_v17 = vadd.f32 %v1846_v11, %v7254_v13  ;;  %v1416_v58 = vmul.f32 %v7779_v9, %v1346_v51  ;;  %v7811_v51 = vld [vmem:[%s10095_s4 + $0x18] sm:$0xff]  }
 0x151   : > { %v5965_v44 = vpop.eup %5964  ;;  %5982 = vrcp.f32 %v1940_v16  ;;  %v5623_v18 = vmul.f32 -1.442695, %v1865_v40  ;;  %v7795_v3 = vadd.f32 %v7609_v25, %v7357_v47  ;;  %v1417_v60 = vmul.f32 %v7779_v9, %v1347_v28  ;;  %v7804_v16 = vld [vmem:[%s10094_s3 + $0x20] sm:$0xff]   ;;  %10581 = vst [vmem:[#allocation28_spill] sm:$0xff] %v7811_v51 }
 0x152   : > { %v7785_v19 = vpop.f32.mrf.mxu0  ;;  %v7791_v46 = vpop.eup %5966  ;;  %v1941_v48 = vadd.f32 1.0, %v5965_v44  ;;  %v1520_v20 = vmul.f32 %v7771_v14, %v1450_v30  ;;  %10580 = vst [vmem:[#allocation27_spill] sm:$0xff] %v7804_v16  ;;  %5781 = vmatmul.mubr.msk.bf16.gmra.mxu1 %vm652_vm1, %v7804_v16  ;;  %5786 = vmatmul.mubr.msk.bf16.gmra.mxu0 %vm652_vm1, %v7811_v51  ;;  %v1349_v25 = vsub.f32 1.0, %v7752_v35  ;;  %v5624_v28 = vmul.f32 -1.442695, %v1866_v17 }
 0x153   : > { %5984 = vpow2.f32 %v5623_v18  ;;  %v1521_v40 = vmul.f32 %v7771_v14, %v1451_v6  ;;  %4569 = vmatprep.mubr.bf16.mxu0 %v10505_v26  ;;  %4963 = vmatprep.mubr.bf16.mxu1 %v10505_v26  ;;  %v7819_v11 = vpop.eup %5968  ;;  %v7824_v47 = vadd.f32 %v7623_v43, %v7694_v33  ;;  %v7829_v17 = vadd.f32 %v7686_v21, %v1416_v58  ;;  %v7835_v16 = vpop.f32.mrf.mxu1 }
 0x154   : > { %v7799_v1 = vpop.f32.mrf.mxu0  ;;  %5986 = vrcp.f32 %v1941_v48  ;;  %v1537_v44 = vadd.f32 %v1536_v15, %v1520_v20  ;;  %v5971_v18 = vpop.eup %5970  ;;  %v7833_v51 = vadd.f32 %v7637_v29, %v7709_v12  ;;  %v7840_v43 = vadd.f32 %v7690_v37, %v1417_v60 }
 0x155   : > { %10582 = vst [vmem:[#allocation78_spill] sm:$0xff] %v7824_v47  ;;  %5988 = vpow2.f32 %v5624_v28  ;;  %v1552_v6 = vadd.f32 %v1551_v53, %v1521_v40  ;;  %v7837_v48 = vpop.eup %5972  ;;  %v1942_v15 = vadd.f32 1.0, %v5971_v18  ;;  %v1847_v33 = vmul.f32 %v7824_v47, %v7203_v7  ;;  %v7844_v20 = vpop.permute.xlu1 %1388  ;;  %v10587_v28 = vld [vmem:[#allocation38_spill] sm:$0xff]  ;;  %v10603_v47 = vld [vmem:[#allocation61_spill] sm:$0xff] }
 0x156   : > { %v7826_v9 = vpop.f32.mrf.mxu0  ;;  %10583 = vst [vmem:[#allocation79_spill] sm:$0xff] %v7833_v51  ;;  %10584 = vst [vmem:[#allocation80_spill] sm:$0xff] %v7844_v20  ;;  %v1348_v21 = vsub.f32 1.0, %v7744_v61  ;;  %v7847_v53 = vpop.permute.xlu0 %1483  ;;  %v1848_v29 = vmul.f32 %v7833_v51, %v7205_v8  ;;  %v1419_v12 = vmul.f32 %v7844_v20, %v1349_v25  ;;  %v1452_v37 = vmul.f32 %v7672_v57, %v7322_v49  ;;  %v10588_v51 = vld [vmem:[#allocation25_spill] sm:$0xff]  ;;  %v7884_v25 = vld [vmem:[%s10095_s4 + $0x20] sm:$0xff]  }
 0x157   : > { %10585 = vst [vmem:[#allocation81_spill] sm:$0xff] %v7847_v53  ;;  %v7849_v58 = vpop.eup %5974  ;;  %v1453_v60 = vmul.f32 %v7675_v4, %v7340_v2  ;;  %5990 = vrcp.f32 %v1942_v15  ;;  %v7860_v40 = vadd.f32 %v7621_v31, %v10587_v28  ;;  %v1867_v18 = vadd.f32 %v1847_v33, %v7254_v13  ;;  %v7873_v4 = vpop.f32.mrf.mxu1  ;;  %10590 = vst [vmem:[#allocation84_spill] sm:$0xff] %v7884_v25  ;;  %v10598_v28 = vld [vmem:[#allocation24_spill] sm:$0xff] }
 0x158   : > { %10586 = vst [vmem:[#allocation82_spill] sm:$0xff] %v7849_v58  ;;  %v7865_v30 = vadd.f32 %v7635_v41, %v7335_v42  ;;  %v7867_v7 = vpop.f32.mrf.mxu0  ;;  %v1868_v49 = vadd.f32 %v1848_v29, %v10588_v51  ;;  %v1522_v57 = vmul.f32 %v7847_v53, %v1452_v37  ;;  %v1418_v33 = vmul.f32 %v7844_v20, %v1348_v21  ;;  %v10591_v29 = vld [vmem:[#allocation5_spill] sm:$0xff] }
 0x159   : > { %v1523_v2 = vmul.f32 %v7847_v53, %v1453_v60  ;;  %v5625_v15 = vmul.f32 -1.442695, %v1867_v18  ;;  %v7879_v41 = vadd.f32 %v7669_v5, %v7777_v45  ;;  %v7891_v18 = vadd.f32 %v7752_v35, %v1419_v12  ;;  %v7919_v13 = vpop.permute.xlu1 %1393 }
 0x15a   : > { %5787 = vmatmul.mubr.msk.bf16.gmra.mxu0 %vm652_vm1, %v7884_v25  ;;  %5811 = vmatmul.mubr.msk.bf16.vlgmr.msra.gmra.mxu1 %vm652_vm1, %v10591_v29  ;;  %v5977_v37 = vpop.eup %5976  ;;  %v5626_v60 = vmul.f32 -1.442695, %v1868_v49  ;;  %v1538_v21 = vadd.f32 %v1537_v44, %v1522_v57  ;;  %v7901_v29 = vadd.f32 %v7684_v54, %v7795_v3  ;;  %v7903_v49 = vpop.f32.mrf.mxu0  ;;  %v10595_v44 = vld [vmem:[#allocation35_spill] sm:$0xff]  ;;  %v1350_v12 = vsub.f32 1.0, %v7791_v46 }
 0x15b   : > { %10589 = vst [vmem:[#allocation83_spill] sm:$0xff] %v7879_v41  ;;  %v1553_v31 = vadd.f32 %v1552_v6, %v1523_v2  ;;  %4973 = vmatprep.mubr.bf16.mxu1 %v10505_v26  ;;  %5081 = vmatprep.mubr.bf16.mxu0 %v10505_v26  ;;  %v7895_v5 = vpop.eup %5978  ;;  %v1943_v45 = vadd.f32 1.0, %v5977_v37  ;;  %5992 = vpow2.f32 %v5625_v15  ;;  %v1849_v42 = vmul.f32 %v7879_v41, %v7205_v8  ;;  %v7910_v57 = vpop.permute.xlu0 %1488  ;;  %v10597_v2 = vld [vmem:[#allocation36_spill] sm:$0xff] }
 0x15c   : > { %10592 = vst [vmem:[#allocation5_spill] sm:$0xff] %v7895_v5  ;;  %10593 = vst [vmem:[#allocation85_spill] sm:$0xff] %v7901_v29  ;;  %5994 = vpow2.f32 %v5626_v60  ;;  %v7907_v6 = vadd.f32 %v7667_v10, %v10595_v44  ;;  %v1454_v15 = vmul.f32 %v7764_v24, %v10597_v2  ;;  %v7914_v37 = vpop.f32.mrf.mxu1  ;;  %v1850_v60 = vmul.f32 %v7901_v29, %v10598_v28  ;;  %v10601_v24 = vld [vmem:[#allocation39_spill] sm:$0xff]  ;;  %v7929_v29 = vpop.f32.mrf.mxu0 }
 0x15d   : > { %10594 = vst [vmem:[#allocation86_spill] sm:$0xff] %v7903_v49  ;;  %v5981_v35 = vpop.eup %5980  ;;  %10596 = vst [vmem:[#allocation87_spill] sm:$0xff] %v7910_v57  ;;  %5996 = vrcp.f32 %v1943_v45  ;;  %v1869_v3 = vadd.f32 %v1849_v42, %v10588_v51  ;;  %v10600_v20 = vsub.f32 1.0, %v7773_v59  ;;  %v1455_v2 = vmul.f32 %v7736_v32, %v10601_v24 }
 0x15e   : > { %v5983_v8 = vpop.eup %5982  ;;  %v1944_v54 = vadd.f32 1.0, %v5981_v35  ;;  %10599 = vst [vmem:[#allocation36_spill] sm:$0xff] %v7919_v13  ;;  %v10602_v35 = vld [vmem:[#allocation32_spill] sm:$0xff]  ;;  %v1524_v51 = vmul.f32 %v7910_v57, %v1454_v15  ;;  %v1420_v53 = vmul.f32 %v7919_v13, %v1350_v12  ;;  %v7934_v49 = vpop.f32.mrf.mxu1  ;;  %v10605_v15 = vld [vmem:[#allocation66_spill] sm:$0xff] }
 0x15f   : > { %v2000_v44 = vsub.f32 1.0, %v5983_v8  ;;  %v1421_v41 = vmul.f32 %v7919_v13, %v10600_v20  ;;  %v5627_v45 = vmul.f32 -1.442695, %v1869_v3  ;;  %v1870_v42 = vadd.f32 %v1850_v60, %v10602_v35  ;;  %v10604_v60 = vld [vmem:[#allocation65_spill] sm:$0xff] }
 0x160   : > { %v5985_v58 = vpop.eup %5984  ;;  %5998 = vrcp.f32 %v1944_v54  ;;  %v1525_v20 = vmul.f32 %v7910_v57, %v1455_v2  ;;  %v7936_v3 = vadd.f32 %v1538_v21, %v1524_v51  ;;  %v7948_v51 = vadd.f32 %v7744_v61, %v1418_v33  ;;  %v7963_v61 = vpop.f32.mrf.mxu1 }
 0x161   : > { %v5987_v25 = vpop.eup %5986  ;;  %v2020_v10 = vmul.f32 %v2000_v44, %v10603_v47  ;;  %v1945_v5 = vadd.f32 1.0, %v5985_v58  ;;  %6000 = vpow2.f32 %v5627_v45  ;;  %v5628_v54 = vmul.f32 -1.442695, %v1870_v42  ;;  %v7954_v45 = vpop.f32.mrf.mxu0 }
 0x162   : > { %v5989_v32 = vpop.eup %5988  ;;  %v2001_v24 = vsub.f32 1.0, %v5987_v25  ;;  %5812 = vmatmul.mubr.msk.bf16.gmra.mxu1 %vm652_vm1, %v10604_v60  ;;  %5817 = vmatmul.mubr.msk.bf16.vlgmr.msra.gmra.mxu0 %vm652_vm1, %v10605_v15  ;;  %v7942_v12 = vadd.f32 %v1553_v31, %v1525_v20  ;;  %v7952_v21 = vadd.f32 %v7704_v0, %v7860_v40  ;;  %10608 = vst [vmem:[#allocation66_spill] sm:$0xff] %v7954_v45  ;;  %v1352_v40 = vsub.f32 1.0, %v7819_v11  ;;  %v10632_v45 = vld [vmem:[#allocation49_spill] sm:$0xff] }
 0x163   : > { %v2040_v44 = vadd.f32 %v5983_v8, %v2020_v10  ;;  %6002 = vrcp.f32 %v1945_v5  ;;  %v1946_v58 = vadd.f32 1.0, %v5989_v32  ;;  %4983 = vmatprep.mubr.bf16.mxu1 %v10505_v26  ;;  %5091 = vmatprep.mubr.bf16.mxu0 %v10505_v26  ;;  %v10609_v5 = vld [vmem:[#allocation64_spill] sm:$0xff]  ;;  %v10610_v10 = vld [vmem:[#allocation37_spill] sm:$0xff]  ;;  %v7961_v20 = vadd.f32 %v7720_v39, %v7865_v30  ;;  %v10613_v39 = vld [vmem:[#allocation31_spill] sm:$0xff] }
 0x164   : > { %10606 = vst [vmem:[#allocation39_spill] sm:$0xff] %v7942_v12  ;;  %v2021_v2 = vmul.f32 %v2001_v24, %v10603_v47  ;;  %6004 = vpow2.f32 %v5628_v54  ;;  %10607 = vst [vmem:[#allocation65_spill] sm:$0xff] %v7952_v21  ;;  %v5991_v8 = vpop.eup %5990  ;;  %v1716_v42 = vadd.f32 %v7682_v63, %v10610_v10  ;;  %v1851_v0 = vmul.f32 %v7952_v21, %v10598_v28  ;;  %v10612_v63 = vld [vmem:[#allocation40_spill] sm:$0xff]  ;;  %v10620_v28 = vld [vmem:[#allocation43_spill] sm:$0xff] }
 0x165   : > { %v2060_v31 = vmul.f32 %v2040_v44, %v10609_v5  ;;  %6006 = vrcp.f32 %v1946_v58  ;;  %10611 = vst [vmem:[#allocation64_spill] sm:$0xff] %v7961_v20  ;;  %v2002_v32 = vsub.f32 1.0, %v5991_v8  ;;  %v7969_v24 = vadd.f32 %v7791_v46, %v1420_v53  ;;  %v10615_v58 = vld [vmem:[#allocation44_spill] sm:$0xff]  ;;  %v7986_v46 = vpop.permute.xlu1 %1398  ;;  %v10617_v53 = vld [vmem:[#allocation41_spill] sm:$0xff] }
 0x166   : > { %v2041_v33 = vadd.f32 %v5987_v25, %v2021_v2  ;;  %v7972_v54 = vadd.f32 %v7773_v59, %v1421_v41  ;;  %v7976_v60 = vadd.f32 %v7713_v23, %v10612_v63  ;;  %v1852_v30 = vmul.f32 %v7961_v20, %v10613_v39  ;;  %v10614_v25 = vld [vmem:[#allocation63_spill] sm:$0xff]  ;;  %10616 = vst [vmem:[#allocation88_spill] sm:$0xff] %v7986_v46  ;;  %v7990_v41 = vpop.f32.mrf.mxu0  ;;  %v10619_v5 = vld [vmem:[#allocation68_spill] sm:$0xff]  ;;  %v10625_v20 = vld [vmem:[#allocation46_spill] sm:$0xff] }
 0x167   : > { %v2022_v15 = vmul.f32 %v2002_v32, %v10614_v25  ;;  %v1871_v44 = vadd.f32 %v1851_v0, %v10602_v35  ;;  %v7984_v2 = vadd.f32 %v7761_v56, %v10615_v58  ;;  %v1456_v59 = vmul.f32 %v7829_v17, %v10617_v53  ;;  %10618 = vst [vmem:[#allocation41_spill] sm:$0xff] %v7990_v41  ;;  %v8000_v56 = vpop.permute.xlu0 %1493  ;;  %v8002_v58 = vpop.f32.mrf.mxu1 }
 0x168   : > { %v5993_v23 = vpop.eup %5992  ;;  %v2061_v63 = vmul.f32 %v2041_v33, %v10619_v5  ;;  %v2080_v10 = vmul.f32 %v2060_v31, %v7657_v22  ;;  %v1872_v32 = vadd.f32 %v1852_v30, %v10620_v28  ;;  %v10621_v0 = vsub.f32 1.0, %v7837_v48  ;;  %10622 = vst [vmem:[#allocation68_spill] sm:$0xff] %v8000_v56  ;;  %v10623_v33 = vld [vmem:[#allocation16_spill] sm:$0xff] }
 0x169   : > { %v5995_v47 = vpop.eup %5994  ;;  %v2042_v17 = vadd.f32 %v5991_v8, %v2022_v15  ;;  %v1947_v53 = vadd.f32 1.0, %v5993_v23  ;;  %v5629_v41 = vmul.f32 -1.442695, %v1871_v44  ;;  %v8005_v13 = vmul.f32 %v7986_v46, %v1352_v40  ;;  %v10624_v31 = vld [vmem:[#allocation72_spill] sm:$0xff]  ;;  %v10627_v40 = vld [vmem:[#allocation70_spill] sm:$0xff] }
 0x16a   : > { %v7998_v35 = vmul.f32 %v7986_v46, %v10621_v0  ;;  %5813 = vmatmul.mubr.msk.bf16.gmra.mxu1 %vm652_vm1, %v10623_v33  ;;  %5818 = vmatmul.mubr.msk.bf16.gmra.mxu0 %vm652_vm1, %v10624_v31  ;;  %v5997_v30 = vpop.eup %5996  ;;  %v1948_v5 = vadd.f32 1.0, %v5995_v47  ;;  %v5630_v0 = vmul.f32 -1.442695, %v1872_v32  ;;  %v1457_v21 = vmul.f32 %v7840_v43, %v10625_v20  ;;  %v8023_v47 = vpop.f32.mrf.mxu0  ;;  %v10629_v43 = vld [vmem:[#allocation45_spill] sm:$0xff] }
 0x16b   : > { %v8015_v8 = vadd.f32 %v7749_v62, %v7907_v6  ;;  %4993 = vmatprep.mubr.bf16.mxu1 %v10505_v26  ;;  %5101 = vmatprep.mubr.bf16.mxu0 %v10505_v26  ;;  %v2062_v15 = vmul.f32 %v2042_v17, %v10627_v40  ;;  %v2003_v44 = vsub.f32 1.0, %v5997_v30  ;;  %6008 = vrcp.f32 %v1947_v53  ;;  %10628 = vst [vmem:[#allocation72_spill] sm:$0xff] %v8023_v47  ;;  %v8032_v33 = vpop.f32.mrf.mxu1  ;;  %v10630_v40 = vld [vmem:[#allocation42_spill] sm:$0xff] }
 0x16c   : > { %v8021_v23 = vmul.f32 %v8000_v56, %v1456_v59  ;;  %6010 = vrcp.f32 %v1948_v5  ;;  %v1719_v20 = vadd.f32 %v7789_v38, %v10629_v43  ;;  %v8030_v6 = vadd.f32 %v7766_v55, %v1716_v42  ;;  %v10631_v42 = vld [vmem:[#allocation67_spill] sm:$0xff] }
 0x16d   : > { %10626 = vst [vmem:[#allocation16_spill] sm:$0xff] %v8015_v8  ;;  %v5999_v32 = vpop.eup %5998  ;;  %v1853_v62 = vmul.f32 %v8015_v8, %v10613_v39  ;;  %v2023_v17 = vmul.f32 %v2003_v44, %v10614_v25  ;;  %v2082_v59 = vmul.f32 %v2062_v15, %v7702_v52  ;;  %6012 = vpow2.f32 %v5629_v41  ;;  %v8041_v44 = vpop.f32.mrf.mxu0 }
 0x16e   : > { %v2004_v53 = vsub.f32 1.0, %v5999_v32  ;;  %v6001_v31 = vpop.eup %6000  ;;  %v2081_v5 = vmul.f32 %v2061_v63, %v7657_v22  ;;  %6014 = vpow2.f32 %v5630_v0  ;;  %v1854_v43 = vmul.f32 %v8030_v6, %v10630_v40  ;;  %v10633_v63 = vld [vmem:[#allocation47_spill] sm:$0xff] }
 0x16f   : > { %v1873_v38 = vadd.f32 %v1853_v62, %v10620_v28  ;;  %v2043_v55 = vadd.f32 %v5997_v30, %v2023_v17  ;;  %v2100_v47 = vadd.f32 %v2082_v59, %v2080_v10  ;;  %v1949_v8 = vadd.f32 1.0, %v6001_v31  ;;  %v8046_v62 = vpop.f32.mrf.mxu1 }
 0x170   : > { %v6003_v39 = vpop.eup %6002  ;;  %v2024_v46 = vmul.f32 %v2004_v53, %v10631_v42  ;;  %v1874_v12 = vadd.f32 %v1854_v43, %v10632_v45  ;;  %v1458_v0 = vmul.f32 %v7948_v51, %v10633_v63  ;;  %v10634_v51 = vld [vmem:[#allocation17_spill] sm:$0xff] }
 0x171   : > { %v6005_v25 = vpop.eup %6004  ;;  %v2005_v15 = vsub.f32 1.0, %v6003_v39  ;;  %v5631_v41 = vmul.f32 -1.442695, %v1873_v38  ;;  %v2063_v22 = vmul.f32 %v2043_v55, %v7680_v34  ;;  %6016 = vrcp.f32 %v1949_v8  ;;  %v8068_v38 = vpop.f32.mrf.mxu1 }
 0x172   : > { %v6007_v28 = vpop.eup %6006  ;;  %v2044_v30 = vadd.f32 %v5999_v32, %v2024_v46  ;;  %v1950_v17 = vadd.f32 1.0, %v6005_v25  ;;  %5814 = vmatmul.mubr.msk.bf16.gmra.mxu1 %vm652_vm1, %v7725_v50  ;;  %5819 = vmatmul.mubr.msk.bf16.gmra.mxu0 %vm652_vm1, %v7732_v27  ;;  %v5632_v53 = vmul.f32 -1.442695, %v1874_v12  ;;  %v8059_v25 = vmul.f32 %v8000_v56, %v1457_v21  ;;  %v8061_v50 = vpop.permute.xlu0 %1498  ;;  %v10636_v32 = vld [vmem:[#allocation69_spill] sm:$0xff]  ;;  %v10637_v12 = vld [vmem:[#allocation50_spill] sm:$0xff] }
 0x173   : > { %v2025_v10 = vmul.f32 %v2005_v15, %v10631_v42  ;;  %v2006_v43 = vsub.f32 1.0, %v6007_v28  ;;  %6018 = vpow2.f32 %v5631_v41  ;;  %5003 = vmatprep.mubr.bf16.mxu1 %v10505_v26  ;;  %5111 = vmatprep.mubr.bf16.mxu0 %v10505_v26  ;;  %v2083_v46 = vmul.f32 %v2063_v22, %v7702_v52  ;;  %10635 = vst [vmem:[#allocation46_spill] sm:$0xff] %v8061_v50  ;;  %v8063_v27 = vpop.f32.mrf.mxu0  ;;  %v10638_v41 = vld [vmem:[#allocation51_spill] sm:$0xff] }
 0x174   : > { %v2064_v34 = vmul.f32 %v2044_v30, %v10634_v51  ;;  %6020 = vrcp.f32 %v1950_v17  ;;  %v1459_v31 = vmul.f32 %v7891_v18, %v10637_v12  ;;  %v8075_v21 = vadd.f32 %v7785_v19, %v7976_v60  ;;  %v10639_v60 = vld [vmem:[#allocation48_spill] sm:$0xff]  ;;  %v10645_v12 = vld [vmem:[#allocation75_spill] sm:$0xff] }
 0x175   : > { %v2045_v8 = vadd.f32 %v6003_v39, %v2025_v10  ;;  %v2026_v59 = vmul.f32 %v2006_v43, %v10636_v32  ;;  %6022 = vpow2.f32 %v5632_v53  ;;  %v8070_v55 = vadd.f32 %v2083_v46, %v2081_v5  ;;  %v10647_v42 = vld [vmem:[#allocation71_spill] sm:$0xff] }
 0x176   : > { %v2084_v22 = vmul.f32 %v2064_v34, %v7771_v14  ;;  %v8079_v15 = vadd.f32 %v7799_v1, %v7984_v2  ;;  %v1720_v63 = vadd.f32 %v7835_v16, %v10638_v41  ;;  %v8084_v18 = vmul.f32 %v8061_v50, %v1458_v0  ;;  %v8094_v2 = vpop.f32.mrf.mxu0  ;;  %v10640_v0 = vld [vmem:[#allocation58_spill] sm:$0xff]  ;;  %v10642_v34 = vld [vmem:[#allocation55_spill] sm:$0xff] }
 0x177   : > { %v2046_v39 = vadd.f32 %v6007_v28, %v2026_v59  ;;  %v8087_v5 = vadd.f32 %v7826_v9, %v1719_v20  ;;  %v2065_v30 = vmul.f32 %v2045_v8, %v7741_v36  ;;  %v1855_v19 = vmul.f32 %v8075_v21, %v10630_v40  ;;  %v10641_v9 = vld [vmem:[#allocation11_spill] sm:$0xff] }
 0x178   : > { %v2101_v17 = vadd.f32 %v2100_v47, %v2084_v22  ;;  %v1856_v1 = vmul.f32 %v8079_v15, %v10639_v60  ;;  %v6009_v28 = vpop.eup %6008  ;;  %v8097_v16 = vmul.f32 %v8061_v50, %v1459_v31  ;;  %v1721_v10 = vadd.f32 %v7873_v4, %v10640_v0  ;;  %v8107_v47 = vpop.f32.mrf.mxu1  ;;  %v10643_v59 = vld [vmem:[#allocation27_spill] sm:$0xff]  ;;  %v10644_v4 = vld [vmem:[#allocation28_spill] sm:$0xff] }
 0x179   : > { %v8103_v20 = vadd.f32 %v7914_v37, %v10641_v9  ;;  %v1857_v36 = vmul.f32 %v8087_v5, %v10639_v60  ;;  %v6011_v43 = vpop.eup %6010  ;;  %v2007_v53 = vsub.f32 1.0, %v6009_v28  ;;  %v1875_v51 = vadd.f32 %v1855_v19, %v10632_v45  ;;  %v10646_v0 = vld [vmem:[#allocation12_spill] sm:$0xff]  ;;  %v10649_v60 = vld [vmem:[#allocation86_spill] sm:$0xff] }
 0x17a   : > { %v1876_v46 = vadd.f32 %v1856_v1, %v10642_v34  ;;  %v8112_v8 = vadd.f32 %v7867_v7, %v1720_v63  ;;  %5815 = vmatmul.mubr.msk.bf16.gmra.mxu1 %vm652_vm1, %v10643_v59  ;;  %5820 = vmatmul.mubr.msk.bf16.gmra.mxu0 %vm652_vm1, %v10644_v4  ;;  %v6013_v37 = vpop.eup %6012  ;;  %v2066_v31 = vmul.f32 %v2046_v39, %v10645_v12  ;;  %v2008_v22 = vsub.f32 1.0, %v6011_v43  ;;  %v8127_v4 = vpop.f32.mrf.mxu0 }
 0x17b   : > { %v1877_v9 = vadd.f32 %v1857_v36, %v10642_v34  ;;  %v8122_v19 = vadd.f32 %v7934_v49, %v10646_v0  ;;  %5121 = vmatprep.mubr.bf16.mxu0 %v10505_v26  ;;  %v6015_v7 = vpop.eup %6014  ;;  %v2085_v63 = vmul.f32 %v2065_v30, %v7771_v14  ;;  %v2027_v1 = vmul.f32 %v2007_v53, %v10636_v32  ;;  %v8130_v34 = vpop.f32.mrf.mxu1  ;;  %v10648_v0 = vld [vmem:[#allocation54_spill] sm:$0xff]  ;;  %v10651_v32 = vld [vmem:[#allocation15_spill] sm:$0xff] }
 0x17c   : > { %v1951_v59 = vadd.f32 1.0, %v6013_v37  ;;  %v5633_v52 = vmul.f32 -1.442695, %v1875_v51  ;;  %v2028_v39 = vmul.f32 %v2008_v22, %v10647_v42  ;;  %v1952_v12 = vadd.f32 1.0, %v6015_v7  ;;  %v10650_v51 = vld [vmem:[#allocation81_spill] sm:$0xff]  ;;  %v8144_v45 = vpop.f32.mrf.mxu0 }
 0x17d   : > { %v5634_v41 = vmul.f32 -1.442695, %v1876_v46  ;;  %v5635_v36 = vmul.f32 -1.442695, %v1877_v9  ;;  %v2047_v49 = vadd.f32 %v6009_v28, %v2027_v1  ;;  %v1858_v26 = vmul.f32 %v8112_v8, %v10648_v0  ;;  %v10652_v46 = vld [vmem:[#allocation78_spill] sm:$0xff]  ;;  %v10653_v1 = vld [vmem:[#allocation60_spill] sm:$0xff] }
 0x17e   : > { %6024 = vrcp.f32 %v1951_v59  ;;  %v8135_v30 = vadd.f32 %v10649_v60, %v1721_v10  ;;  %v6017_v53 = vpop.eup %6016  ;;  %v2048_v37 = vadd.f32 %v6011_v43, %v2028_v39  ;;  %v2086_v14 = vmul.f32 %v2066_v31, %v10650_v51  ;;  %10654 = vst [vmem:[#allocation70_spill] sm:$0xff] %v8144_v45  ;;  %v10655_v10 = vld [vmem:[#allocation79_spill] sm:$0xff]  ;;  %v8149_v39 = vpop.f32.mrf.mxu1 }
 0x17f   : > { %6026 = vrcp.f32 %v1952_v12  ;;  %v8140_v22 = vadd.f32 %v7963_v61, %v10651_v32  ;;  %v2067_v7 = vmul.f32 %v2047_v49, %v10652_v46  ;;  %v2009_v28 = vsub.f32 1.0, %v6017_v53  ;;  %v8153_v46 = vpop.permute.xlu1 %1403 }
 0x180   : > { %v6019_v9 = vpop.eup %6018  ;;  %6028 = vpow2.f32 %v5633_v52  ;;  %v1878_v59 = vadd.f32 %v1858_v26, %v10653_v1  ;;  %v2068_v40 = vmul.f32 %v2048_v37, %v10655_v10  ;;  %v1859_v31 = vmul.f32 %v8135_v30, %v10648_v0  ;;  %10656 = vst [vmem:[#allocation47_spill] sm:$0xff] %v8153_v46  ;;  %v10657_v26 = vld [vmem:[#allocation84_spill] sm:$0xff]  ;;  %v10658_v0 = vld [vmem:[#allocation77_spill] sm:$0xff] }
 0x181   : > { %v6021_v60 = vpop.eup %6020  ;;  %v1953_v43 = vadd.f32 1.0, %v6019_v9  ;;  %6030 = vpow2.f32 %v5634_v41  ;;  %v2116_v12 = vadd.f32 %v8070_v55, %v2085_v63  ;;  %v2029_v49 = vmul.f32 %v2009_v28, %v10647_v42  ;;  %v8160_v63 = vpop.f32.mrf.mxu0 }
 0x182   : > { %v6023_v61 = vpop.eup %6022  ;;  %v2010_v52 = vsub.f32 1.0, %v6021_v60  ;;  %6032 = vpow2.f32 %v5635_v36  ;;  %5821 = vmatmul.mubr.msk.bf16.gmra.mxu0 %vm652_vm1, %v10657_v26  ;;  %v2102_v37 = vadd.f32 %v2101_v17, %v2086_v14  ;;  %v5636_v9 = vmul.f32 -1.442695, %v1878_v59  ;;  %10659 = vst [vmem:[#allocation17_spill] sm:$0xff] %v8160_v63  ;;  %v10661_v14 = vld [vmem:[#allocation82_spill] sm:$0xff] }
 0x183   : > { %6034 = vrcp.f32 %v1953_v43  ;;  %v1954_v41 = vadd.f32 1.0, %v6023_v61  ;;  %v2087_v10 = vmul.f32 %v2067_v7, %v10650_v51  ;;  %v2049_v32 = vadd.f32 %v6017_v53, %v2029_v49  ;;  %v8170_v43 = vpop.f32.mrf.mxu1  ;;  %v10663_v53 = vld [vmem:[#allocation83_spill] sm:$0xff]  ;;  %v10664_v49 = vld [vmem:[#allocation6_spill] sm:$0xff]  ;;  %v8183_v51 = vpop.permute.xlu1 %1503 }
 0x184   : > { %v2030_v45 = vmul.f32 %v2010_v52, %v10658_v0  ;;  %v1879_v55 = vadd.f32 %v1859_v31, %v10653_v1  ;;  %v2088_v28 = vmul.f32 %v2068_v40, %v7910_v57  ;;  %v8165_v36 = vadd.f32 %v7929_v29, %v8103_v20  ;;  %v10665_v40 = vld [vmem:[#allocation5_spill] sm:$0xff]  ;;  %10668 = vst [vmem:[#allocation27_spill] sm:$0xff] %v8183_v51 }
 0x185   : > { %6036 = vrcp.f32 %v1954_v41  ;;  %v10662_v17 = vsub.f32 1.0, %v10661_v14  ;;  %v2069_v7 = vmul.f32 %v2049_v32, %v10663_v53  ;;  %v10666_v26 = vsub.f32 1.0, %v10665_v40 }
 0x186   : > { %10660 = vst [vmem:[#allocation50_spill] sm:$0xff] %v8165_v36  ;;  %v2050_v61 = vadd.f32 %v6021_v60, %v2030_v45  ;;  %6038 = vpow2.f32 %v5636_v9  ;;  %v5637_v31 = vmul.f32 -1.442695, %v1879_v55  ;;  %v2392_v52 = vmul.f32 %v8165_v36, %v10664_v49  ;;  %v10669_v45 = vld [vmem:[#allocation20_spill] sm:$0xff]  ;;  %v8190_v9 = vpop.f32.mrf.mxu0  ;;  %v10671_v55 = vld [vmem:[#allocation13_spill] sm:$0xff] }
 0x187   : > { %v1424_v59 = vmul.f32 %v8153_v46, %v10662_v17  ;;  %v1425_v41 = vmul.f32 %v8153_v46, %v10666_v26  ;;  %v1442_v29 = vadd.f32 %v7819_v11, %v8005_v13  ;;  %v1443_v20 = vadd.f32 %v7837_v48, %v7998_v35  ;;  %v10667_v17 = vld [vmem:[#allocation85_spill] sm:$0xff]  ;;  %10670 = vst [vmem:[#allocation28_spill] sm:$0xff] %v8190_v9  ;;  %v10672_v11 = vld [vmem:[#allocation52_spill] sm:$0xff]  ;;  %v8198_v26 = vpop.f32.mrf.mxu1 }
 0x188   : > { %v2070_v42 = vmul.f32 %v2050_v61, %v10667_v17  ;;  %6040 = vpow2.f32 %v5637_v31  ;;  %v8187_v32 = vadd.f32 %v8002_v58, %v10669_v45  ;;  %v2412_v53 = vadd.f32 %v2392_v52, %v10671_v55  ;;  %v10673_v35 = vld [vmem:[#allocation53_spill] sm:$0xff]  ;;  %10674 = vst [vmem:[#allocation75_spill] sm:$0xff] %v8198_v26  ;;  %v8202_v58 = vpop.permute.xlu0 %1508  ;;  %v10677_v52 = vld [vmem:[#allocation56_spill] sm:$0xff] }
 0x189   : > { %v1444_v60 = vadd.f32 %v10661_v14, %v1424_v59  ;;  %v1445_v13 = vadd.f32 %v10665_v40, %v1425_v41  ;;  %v1460_v48 = vmul.f32 %v7969_v24, %v10672_v11  ;;  %v1461_v61 = vmul.f32 %v7972_v54, %v10673_v35  ;;  %10675 = vst [vmem:[#allocation86_spill] sm:$0xff] %v8202_v58  ;;  %v10676_v14 = vld [vmem:[#allocation21_spill] sm:$0xff]  ;;  %v10679_v54 = vld [vmem:[#allocation59_spill] sm:$0xff] }
 0x18a   : > { %v2117_v31 = vadd.f32 %v2116_v12, %v2087_v10  ;;  %v8200_v17 = vadd.f32 %v2102_v37, %v2088_v28  ;;  %v8206_v59 = vadd.f32 %v8032_v33, %v10676_v14  ;;  %v1462_v45 = vmul.f32 %v1442_v29, %v10677_v52  ;;  %v10678_v11 = vld [vmem:[#allocation57_spill] sm:$0xff]  ;;  %v8213_v10 = vpop.permute.xlu1 %1513  ;;  %v10681_v28 = vld [vmem:[#allocation62_spill] sm:$0xff]  ;;  %v8217_v14 = vpop.f32.mrf.mxu0 }
 0x18b   : > { %v6025_v40 = vpop.eup %6024  ;;  %v2089_v41 = vmul.f32 %v2069_v7, %v7910_v57  ;;  %v5652_v24 = vmul.f32 -1.442695, %v2412_v53  ;;  %v1463_v1 = vmul.f32 %v1443_v20, %v10678_v11  ;;  %v1464_v35 = vmul.f32 %v1444_v60, %v10679_v54  ;;  %10680 = vst [vmem:[#allocation78_spill] sm:$0xff] %v8213_v10  ;;  %10682 = vst [vmem:[#allocation79_spill] sm:$0xff] %v8217_v14  ;;  %v8221_v60 = vpop.f32.mrf.mxu1  ;;  %v10685_v57 = vld [vmem:[#allocation80_spill] sm:$0xff] }
 0x18c   : > { %v6027_v36 = vpop.eup %6026  ;;  %v2011_v12 = vsub.f32 1.0, %v6025_v40  ;;  %v2090_v37 = vmul.f32 %v2070_v42, %v8000_v56  ;;  %v1465_v9 = vmul.f32 %v1445_v13, %v10681_v28  ;;  %v1530_v33 = vmul.f32 %v8183_v51, %v1460_v48  ;;  %10683 = vst [vmem:[#allocation84_spill] sm:$0xff] %v8221_v60  ;;  %v10684_v48 = vld [vmem:[#allocation39_spill] sm:$0xff] }
 0x18d   : > { %v6029_v29 = vpop.eup %6028  ;;  %v2012_v52 = vsub.f32 1.0, %v6027_v36  ;;  %6042 = vpow2.f32 %v5652_v24  ;;  %v1531_v7 = vmul.f32 %v8183_v51, %v1461_v61  ;;  %v1532_v20 = vmul.f32 %v8202_v58, %v1462_v45 }
 0x18e   : > { %v6031_v53 = vpop.eup %6030  ;;  %v2031_v42 = vmul.f32 %v2011_v12, %v10658_v0  ;;  %v1955_v11 = vadd.f32 1.0, %v6029_v29  ;;  %v1540_v13 = vadd.f32 %v7936_v3, %v8021_v23  ;;  %v1555_v54 = vadd.f32 %v10684_v48, %v8059_v25  ;;  %v8232_v29 = vpop.f32.mrf.mxu0 }
 0x18f   : > { %v6033_v28 = vpop.eup %6032  ;;  %v2032_v14 = vmul.f32 %v2012_v52, %v10685_v57  ;;  %v1956_v24 = vadd.f32 1.0, %v6031_v53  ;;  %v1533_v61 = vmul.f32 %v8202_v58, %v1463_v1  ;;  %v1534_v45 = vmul.f32 %v8213_v10, %v1464_v35  ;;  %10686 = vst [vmem:[#allocation82_spill] sm:$0xff] %v8232_v29  ;;  %v8235_v48 = vpop.f32.mrf.mxu1 }
 0x190   : > { %v6035_v63 = vpop.eup %6034  ;;  %v2051_v60 = vadd.f32 %v6025_v40, %v2031_v42  ;;  %6044 = vrcp.f32 %v1955_v11  ;;  %v1957_v26 = vadd.f32 1.0, %v6033_v28  ;;  %v1541_v12 = vadd.f32 %v1540_v13, %v8084_v18  ;;  %v10687_v40 = vld [vmem:[#allocation66_spill] sm:$0xff]  ;;  %v10688_v18 = vld [vmem:[#allocation65_spill] sm:$0xff]  ;;  %v10689_v28 = vld [vmem:[#allocation64_spill] sm:$0xff] }
 0x191   : > { %v2052_v3 = vadd.f32 %v6027_v36, %v2032_v14  ;;  %v2013_v23 = vsub.f32 1.0, %v6035_v63  ;;  %6046 = vrcp.f32 %v1956_v24  ;;  %v1556_v25 = vadd.f32 %v1555_v54, %v8097_v16 }
 0x192   : > { %v6037_v52 = vpop.eup %6036  ;;  %6048 = vrcp.f32 %v1957_v26  ;;  %v1535_v1 = vmul.f32 %v8213_v10, %v1465_v9  ;;  %v1542_v35 = vadd.f32 %v1541_v12, %v1530_v33  ;;  %v8240_v53 = vadd.f32 %v10687_v40, %v8122_v19  ;;  %v8247_v9 = vpop.f32.mrf.mxu0  ;;  %v10690_v40 = vld [vmem:[#allocation36_spill] sm:$0xff] }
 0x193   : > { %v6039_v42 = vpop.eup %6038  ;;  %v2071_v11 = vmul.f32 %v2051_v60, %v10688_v18  ;;  %v2033_v36 = vmul.f32 %v2013_v23, %v10685_v57  ;;  %v2014_v14 = vsub.f32 1.0, %v6037_v52  ;;  %v1557_v13 = vadd.f32 %v1556_v25, %v1531_v7  ;;  %v8250_v60 = vpop.f32.mrf.mxu1  ;;  %v10691_v25 = vld [vmem:[#allocation16_spill] sm:$0xff] }
 0x194   : > { %v2072_v16 = vmul.f32 %v2052_v3, %v10689_v28  ;;  %v1958_v54 = vadd.f32 1.0, %v6039_v42  ;;  %v1543_v24 = vadd.f32 %v1542_v35, %v1532_v20  ;;  %v2393_v26 = vmul.f32 %v8240_v53, %v10664_v49 }
 0x195   : > { %v6041_v33 = vpop.eup %6040  ;;  %v2118_v12 = vadd.f32 %v2117_v31, %v2089_v41  ;;  %v2053_v19 = vadd.f32 %v6035_v63, %v2033_v36  ;;  %v2034_v0 = vmul.f32 %v2014_v14, %v10690_v40  ;;  %v1558_v29 = vadd.f32 %v1557_v13, %v1533_v61  ;;  %v8257_v41 = vpop.f32.mrf.mxu0  ;;  %v10694_v13 = vld [vmem:[#allocation72_spill] sm:$0xff] }
 0x196   : > { %6050 = vrcp.f32 %v1958_v54  ;;  %v1959_v23 = vadd.f32 1.0, %v6041_v33  ;;  %v1544_v7 = vadd.f32 %v1543_v24, %v1534_v45  ;;  %v2104_v3 = vadd.f32 %v8200_v17, %v2090_v37  ;;  %v10692_v17 = vld [vmem:[#allocation41_spill] sm:$0xff] }
 0x197   : > { %v2091_v20 = vmul.f32 %v2071_v11, %v8000_v56  ;;  %v2073_v35 = vmul.f32 %v2053_v19, %v10691_v25  ;;  %v2054_v42 = vadd.f32 %v6037_v52, %v2034_v0  ;;  %v1559_v18 = vadd.f32 %v1558_v29, %v1535_v1  ;;  %v8265_v11 = vpop.f32.mrf.mxu1  ;;  %v10693_v52 = vld [vmem:[#allocation22_spill] sm:$0xff] }
 0x198   : > { %v2092_v28 = vmul.f32 %v2072_v16, %v8061_v50  ;;  %6052 = vrcp.f32 %v1959_v23  ;;  %v1545_v63 = vrot.slane %v1544_v7, 4  ;;  %v2413_v31 = vadd.f32 %v2393_v26, %v10671_v55 }
 0x199   : > { %v2074_v61 = vmul.f32 %v2054_v42, %v8030_v6  ;;  %v2093_v45 = vmul.f32 %v2073_v35, %v8061_v50  ;;  %v1560_v36 = vrot.slane %v1559_v18, 4  ;;  %v8263_v37 = vadd.f32 %v10692_v17, %v8140_v22  ;;  %v10695_v22 = vld [vmem:[#allocation7_spill] sm:$0xff]  ;;  %v10697_v42 = vld [vmem:[#allocation26_spill] sm:$0xff]  ;;  %v10703_v50 = vld [vmem:[#allocation9_spill] sm:$0xff] }
 0x19a   : > { %v6043_v0 = vpop.eup %6042  ;;  %v1546_v29 = vadd.f32 %v1545_v63, %v1544_v7  ;;  %v2259_v1 = vadd.f32 %v8046_v62, %v10693_v52  ;;  %v5653_v14 = vmul.f32 -1.442695, %v2413_v31  ;;  %v8271_v16 = vadd.f32 %v10694_v13, %v8187_v32  ;;  %v8278_v7 = vpop.f32.mrf.mxu0  ;;  %v10696_v32 = vld [vmem:[#allocation23_spill] sm:$0xff]  ;;  %v10698_v63 = vld [vmem:[#allocation14_spill] sm:$0xff] }
 0x19b   : > { %v2492_v6 = vadd.f32 1.0, %v6043_v0  ;;  %v1561_v54 = vadd.f32 %v1560_v36, %v1559_v18  ;;  %v2094_v24 = vmul.f32 %v2074_v61, %v8183_v51  ;;  %v2119_v26 = vadd.f32 %v2118_v12, %v2091_v20 }
 0x19c   : > { %v2105_v33 = vadd.f32 %v2104_v3, %v2092_v28  ;;  %6054 = vpow2.f32 %v5653_v14  ;;  %v2394_v19 = vmul.f32 %v8263_v37, %v10695_v22  ;;  %v2395_v23 = vmul.f32 %v8271_v16, %v10695_v22  ;;  %v8286_v3 = vpop.f32.mrf.mxu1 }
 0x19d   : > { %v6045_v62 = vpop.eup %6044  ;;  %6056 = vrcp.f32 %v2492_v6  ;;  %v8280_v25 = vadd.f32 %v2119_v26, %v2093_v45  ;;  %v2260_v35 = vadd.f32 %v8068_v38, %v10696_v32  ;;  %v2261_v12 = vadd.f32 %v8107_v47, %v10697_v42  ;;  %v8295_v26 = vpop.f32.mrf.mxu0  ;;  %v10699_v42 = vld [vmem:[#allocation88_spill] sm:$0xff] }
 0x19e   : > { %v6047_v20 = vpop.eup %6046  ;;  %v2015_v18 = vsub.f32 1.0, %v6045_v62  ;;  %v1547_v28 = vrot.slane %v1546_v29, 2  ;;  %v2414_v31 = vadd.f32 %v2394_v19, %v10698_v63  ;;  %v2415_v61 = vadd.f32 %v2395_v23, %v10698_v63  ;;  %v10700_v19 = vld [vmem:[#allocation29_spill] sm:$0xff]  ;;  %v10701_v63 = vld [vmem:[#allocation8_spill] sm:$0xff] }
 0x19f   : > { %v6049_v36 = vpop.eup %6048  ;;  %v2016_v17 = vsub.f32 1.0, %v6047_v20  ;;  %v1562_v0 = vrot.slane %v1561_v54, 2  ;;  %v2106_v45 = vadd.f32 %v2105_v33, %v2094_v24  ;;  %v8292_v14 = vadd.f32 %v8041_v44, %v8206_v59  ;;  %v8305_v44 = vpop.f32.mrf.mxu1 }
 0x1a0   : > { %v2035_v38 = vmul.f32 %v2015_v18, %v10690_v40  ;;  %v2017_v47 = vsub.f32 1.0, %v6049_v36  ;;  %v5654_v13 = vmul.f32 -1.442695, %v2414_v31  ;;  %v5655_v6 = vmul.f32 -1.442695, %v2415_v61 }
 0x1a1   : > { %v2036_v22 = vmul.f32 %v2016_v17, %v10699_v42  ;;  %v2262_v23 = vadd.f32 %v8130_v34, %v10700_v19  ;;  %v2396_v32 = vmul.f32 %v8292_v14, %v10701_v63  ;;  %v8303_v24 = vadd.f32 %v8063_v27, %v2259_v1  ;;  %v10702_v17 = vld [vmem:[#allocation18_spill] sm:$0xff] }
 0x1a2   : > { %v2055_v59 = vadd.f32 %v6045_v62, %v2035_v38  ;;  %v2037_v33 = vmul.f32 %v2017_v47, %v10699_v42  ;;  %6058 = vpow2.f32 %v5654_v13  ;;  %v8309_v18 = vadd.f32 %v8094_v2, %v2260_v35  ;;  %v8317_v38 = vpop.f32.mrf.mxu0 }
 0x1a3   : > { %v6051_v31 = vpop.eup %6050  ;;  %v2056_v61 = vadd.f32 %v6047_v20, %v2036_v22  ;;  %6060 = vpow2.f32 %v5655_v6  ;;  %v2416_v34 = vadd.f32 %v2396_v32, %v10702_v17  ;;  %v2397_v19 = vmul.f32 %v8303_v24, %v10701_v63  ;;  %v8323_v20 = vpop.f32.mrf.mxu1  ;;  %v10704_v63 = vld [vmem:[#allocation19_spill] sm:$0xff] }
 0x1a4   : > { %v2075_v27 = vmul.f32 %v2055_v59, %v8075_v21  ;;  %v2057_v1 = vadd.f32 %v6049_v36, %v2037_v33  ;;  %v2018_v52 = vsub.f32 1.0, %v6051_v31  ;;  %v2398_v62 = vmul.f32 %v8309_v18, %v10703_v50 }
 0x1a5   : > { %v6053_v47 = vpop.eup %6052  ;;  %v2076_v2 = vmul.f32 %v2056_v61, %v8079_v15  ;;  %v8320_v35 = vadd.f32 %v1547_v28, %v1546_v29  ;;  %v5656_v22 = vmul.f32 -1.442695, %v2416_v34  ;;  %v2417_v32 = vadd.f32 %v2397_v19, %v10702_v17  ;;  %v10705_v61 = vld [vmem:[#allocation33_spill] sm:$0xff] }
 0x1a6   : > { %v2077_v13 = vmul.f32 %v2057_v1, %v8087_v5  ;;  %v2038_v21 = vmul.f32 %v2018_v52, %v8153_v46  ;;  %v2019_v36 = vsub.f32 1.0, %v6053_v47  ;;  %v8327_v6 = vadd.f32 %v1562_v0, %v1561_v54  ;;  %v8335_v5 = vpop.f32.mrf.mxu0  ;;  %v10706_v54 = vld [vmem:[#allocation34_spill] sm:$0xff] }
 0x1a7   : > { %v2095_v59 = vmul.f32 %v2075_v27, %v8183_v51  ;;  %6062 = vpow2.f32 %v5656_v22  ;;  %v5657_v33 = vmul.f32 -1.442695, %v2417_v32  ;;  %v2418_v15 = vadd.f32 %v2398_v62, %v10704_v63  ;;  %v8342_v62 = vpop.f32.mrf.mxu1 }
 0x1a8   : > { %v2058_v29 = vadd.f32 %v6051_v31, %v2038_v21  ;;  %v2039_v28 = vmul.f32 %v2019_v36, %v8153_v46  ;;  %v2096_v19 = vmul.f32 %v2076_v2, %v8202_v58  ;;  %v2263_v34 = vadd.f32 %v8149_v39, %v10705_v61  ;;  %v10712_v46 = vld [vmem:[#allocation10_spill] sm:$0xff]  ;;  %v1569_v61 = vpop.permute.xlu0 %1568 }
 0x1a9   : > { %v6055_v52 = vpop.eup %6054  ;;  %6064 = vpow2.f32 %v5657_v33  ;;  %v2264_v0 = vadd.f32 %v8170_v43, %v10706_v54  ;;  %v5658_v27 = vmul.f32 -1.442695, %v2418_v15  ;;  %v8340_v1 = vadd.f32 %v8127_v4, %v2261_v12  ;;  %v8351_v15 = vpop.f32.mrf.mxu0 }
 0x1aa   : > { %v6057_v31 = vpop.eup %6056  ;;  %v2078_v22 = vmul.f32 %v2058_v29, %v8112_v8  ;;  %v2059_v2 = vadd.f32 %v6053_v47, %v2039_v28  ;;  %v2097_v32 = vmul.f32 %v2077_v13, %v8202_v58  ;;  %v2493_v39 = vadd.f32 1.0, %v6055_v52  ;;  %v10707_v8 = vld [vmem:[#allocation61_spill] sm:$0xff]  ;;  %v10708_v29 = vld [vmem:[#allocation38_spill] sm:$0xff]  ;;  %v10709_v13 = vld [vmem:[#allocation75_spill] sm:$0xff] }
 0x1ab   : > { %v2552_v21 = vsub.f32 1.0, %v6057_v31  ;;  %v2121_v36 = vadd.f32 %v8280_v25, %v2095_v59  ;;  %6066 = vpow2.f32 %v5658_v27  ;;  %v2399_v43 = vmul.f32 %v8340_v1, %v10703_v50  ;;  %v10710_v25 = vld [vmem:[#allocation70_spill] sm:$0xff]  ;;  %v8360_v27 = vpop.f32.mrf.mxu1  ;;  %v10725_v58 = vld [vmem:[#allocation73_spill] sm:$0xff] }
 0x1ac   : > { %v2079_v33 = vmul.f32 %v2059_v2, %v8135_v30  ;;  %v2098_v4 = vmul.f32 %v2078_v22, %v8213_v10  ;;  %v2107_v12 = vadd.f32 %v2106_v45, %v2096_v19  ;;  %6068 = vrcp.f32 %v2493_v39  ;;  %v10711_v45 = vld [vmem:[#allocation17_spill] sm:$0xff] }
 0x1ad   : > { %v2572_v47 = vmul.f32 %v2552_v21, %v10707_v8  ;;  %v2265_v28 = vadd.f32 %v10709_v13, %v10708_v29  ;;  %v2419_v52 = vadd.f32 %v2399_v43, %v10704_v63  ;;  %v8358_v59 = vadd.f32 %v10710_v25, %v2262_v23  ;;  %v10713_v29 = vld [vmem:[#allocation28_spill] sm:$0xff] }
 0x1ae   : > { %v2099_v30 = vmul.f32 %v2079_v33, %v8213_v10  ;;  %v2108_v2 = vadd.f32 %v2107_v12, %v2098_v4  ;;  %v2122_v22 = vadd.f32 %v2121_v36, %v2097_v32  ;;  %v8364_v19 = vadd.f32 %v10711_v45, %v2263_v34  ;;  %v8373_v36 = vpop.f32.mrf.mxu0  ;;  %v10714_v34 = vld [vmem:[#allocation50_spill] sm:$0xff]  ;;  %v10715_v4 = vld [vmem:[#allocation25_spill] sm:$0xff]  ;;  %v10719_v10 = vld [vmem:[#allocation24_spill] sm:$0xff] }
 0x1af   : > { %v6059_v39 = vpop.eup %6058  ;;  %v2592_v54 = vadd.f32 %v6057_v31, %v2572_v47  ;;  %v5659_v21 = vmul.f32 -1.442695, %v2419_v52  ;;  %v2400_v13 = vmul.f32 %v8358_v59, %v10712_v46  ;;  %v8369_v43 = vadd.f32 %v10713_v29, %v2264_v0  ;;  %v8377_v47 = vpop.f32.mrf.mxu1 }
 0x1b0   : > { %v6061_v23 = vpop.eup %6060  ;;  %v2109_v25 = vrot.slane %v2108_v2, 4  ;;  %v2123_v63 = vadd.f32 %v2122_v22, %v2099_v30  ;;  %v2494_v50 = vadd.f32 1.0, %v6059_v39  ;;  %v2401_v32 = vmul.f32 %v8364_v19, %v10712_v46  ;;  %v10716_v30 = vld [vmem:[#allocation4_spill] sm:$0xff] }
 0x1b1   : > { %v2612_v33 = vmul.f32 %v2592_v54, %v10714_v34  ;;  %v2495_v31 = vadd.f32 1.0, %v6061_v23  ;;  %6070 = vpow2.f32 %v5659_v21  ;;  %v2420_v12 = vadd.f32 %v2400_v13, %v10715_v4  ;;  %v10720_v13 = vld [vmem:[#allocation30_spill] sm:$0xff]  ;;  %v10721_v46 = vld [vmem:[#allocation84_spill] sm:$0xff] }
 0x1b2   : > { %v2110_v0 = vadd.f32 %v2109_v25, %v2108_v2  ;;  %v2124_v29 = vrot.slane %v2123_v63, 4  ;;  %6072 = vrcp.f32 %v2494_v50  ;;  %v2421_v52 = vadd.f32 %v2401_v32, %v10715_v4  ;;  %v8390_v50 = vpop.f32.mrf.mxu0 }
 0x1b3   : > { %6074 = vrcp.f32 %v2495_v31  ;;  %v10717_v22 = vsub.s32 0, %v10716_v30  ;;  %v5660_v39 = vmul.f32 -1.442695, %v2420_v12  ;;  %v2402_v54 = vmul.f32 %v8369_v43, %v10719_v10  ;;  %10722 = vst [vmem:[#allocation5_spill] sm:$0xff] %v8390_v50  ;;  %v10723_v31 = vld [vmem:[#allocation32_spill] sm:$0xff]  ;;  %v8396_v12 = vpop.f32.mrf.mxu1  ;;  %v10729_v50 = vld [vmem:[#allocation82_spill] sm:$0xff] }
 0x1b4   : > { %v6063_v23 = vpop.eup %6062  ;;  %v2111_v21 = vrot.slane %v2110_v0, 2  ;;  %v8386_v34 = vadd.f32 %v2124_v29, %v2123_v63  ;;  %v2266_v2 = vadd.f32 %v10721_v46, %v10720_v13  ;;  %v5661_v25 = vmul.f32 -1.442695, %v2421_v52  ;;  %v10726_v63 = vld [vmem:[#allocation35_spill] sm:$0xff]  ;;  %v10727_v46 = vld [vmem:[#allocation37_spill] sm:$0xff]  ;;  %v10728_v13 = vld [vmem:[#allocation40_spill] sm:$0xff] }
 0x1b5   : > { %v8382_v45 = vrot.slane %v1569_v61, %v10717_v22  ;;  %v2496_v32 = vadd.f32 1.0, %v6063_v23  ;;  %6076 = vpow2.f32 %v5660_v39  ;;  %v2422_v4 = vadd.f32 %v2402_v54, %v10723_v31  ;;  %v10724_v61 = vld [vmem:[#allocation79_spill] sm:$0xff] }
 0x1b6   : > { %v8394_v22 = vadd.f32 %v10724_v61, %v2265_v28  ;;  %v6065_v17 = vpop.eup %6064  ;;  %v8399_v51 = vmul.f32 %v2612_v33, %v10725_v58  ;;  %v2267_v29 = vadd.f32 %v8235_v48, %v10726_v63  ;;  %6078 = vpow2.f32 %v5661_v25  ;;  %v8417_v25 = vpop.f32.mrf.mxu0 }
 0x1b7   : > { %10718 = vst [vmem:[#allocation83_spill] sm:$0xff] %v8382_v45  ;;  %v2268_v52 = vadd.f32 %v8250_v60, %v10727_v46  ;;  %6080 = vrcp.f32 %v2496_v32  ;;  %v2497_v39 = vadd.f32 1.0, %v6065_v17  ;;  %v5662_v23 = vmul.f32 -1.442695, %v2422_v4  ;;  %10730 = vst [vmem:[#allocation85_spill] sm:$0xff] %v8417_v25 }
 0x1b8   : > { %v2403_v28 = vmul.f32 %v8394_v22, %v10719_v10  ;;  %v6067_v54 = vpop.eup %6066  ;;  %v8407_v61 = vadd.f32 %v2111_v21, %v2110_v0  ;;  %v2269_v33 = vadd.f32 %v8265_v11, %v10728_v13  ;;  %v8412_v42 = vadd.f32 %v10729_v50, %v2266_v2  ;;  %v8421_v0 = vpop.f32.mrf.mxu1  ;;  %v10731_v11 = vld [vmem:[#allocation31_spill] sm:$0xff] }
 0x1b9   : > { %v8415_v48 = vadd.f32 %v8247_v9, %v2267_v29  ;;  %v6069_v60 = vpop.eup %6068  ;;  %6082 = vrcp.f32 %v2497_v39  ;;  %v2498_v4 = vadd.f32 1.0, %v6067_v54  ;;  %v10732_v29 = vld [vmem:[#allocation44_spill] sm:$0xff]  ;;  %v8430_v39 = vadd.f32 %v8257_v41, %v2268_v52  ;;  %v10733_v54 = vld [vmem:[#allocation43_spill] sm:$0xff] }
 0x1ba   : > { %v2423_v32 = vadd.f32 %v2403_v28, %v10723_v31  ;;  %v2553_v21 = vsub.f32 1.0, %v6069_v60  ;;  %6084 = vpow2.f32 %v5662_v23  ;;  %v2404_v2 = vmul.f32 %v8412_v42, %v10731_v11  ;;  %v8438_v31 = vpop.f32.mrf.mxu0  ;;  %v8447_v52 = vpop.f32.mrf.mxu1 }
 0x1bb   : > { %v2405_v9 = vmul.f32 %v8415_v48, %v10731_v11  ;;  %6086 = vrcp.f32 %v2498_v4  ;;  %v2270_v13 = vadd.f32 %v8286_v3, %v10732_v29  ;;  %v8436_v46 = vadd.f32 %v8278_v7, %v2269_v33  ;;  %10735 = vst [vmem:[#allocation53_spill] sm:$0xff] %v8438_v31  ;;  %v10736_v4 = vld [vmem:[#allocation45_spill] sm:$0xff]  ;;  %v10737_v11 = vld [vmem:[#allocation42_spill] sm:$0xff] }
 0x1bc   : > { %v5663_v50 = vmul.f32 -1.442695, %v2423_v32  ;;  %v2573_v28 = vmul.f32 %v2553_v21, %v10707_v8  ;;  %v2424_v17 = vadd.f32 %v2404_v2, %v10733_v54  ;;  %v2271_v32 = vadd.f32 %v8305_v44, %v10736_v4  ;;  %v10739_v29 = vld [vmem:[#allocation49_spill] sm:$0xff]  ;;  %v10740_v44 = vld [vmem:[#allocation48_spill] sm:$0xff] }
 0x1bd   : > { %v2425_v23 = vadd.f32 %v2405_v9, %v10733_v54  ;;  %10734 = vst [vmem:[#allocation52_spill] sm:$0xff] %v8436_v46  ;;  %v2406_v3 = vmul.f32 %v8430_v39, %v10737_v11  ;;  %v8445_v41 = vadd.f32 %v8295_v26, %v2270_v13  ;;  %v2407_v7 = vmul.f32 %v8436_v46, %v10737_v11  ;;  %v8462_v11 = vpop.f32.mrf.mxu1 }
 0x1be   : > { %6088 = vpow2.f32 %v5663_v50  ;;  %v6071_v21 = vpop.eup %6070  ;;  %v2593_v2 = vadd.f32 %v6069_v60, %v2573_v28  ;;  %v5664_v9 = vmul.f32 -1.442695, %v2424_v17  ;;  %v8455_v63 = vadd.f32 %v8317_v38, %v2271_v32  ;;  %v8459_v17 = vpop.f32.mrf.mxu0  ;;  %v10745_v32 = vld [vmem:[#allocation51_spill] sm:$0xff] }
 0x1bf   : > { %10738 = vst [vmem:[#allocation56_spill] sm:$0xff] %v8445_v41  ;;  %v5665_v8 = vmul.f32 -1.442695, %v2425_v23  ;;  %v6073_v33 = vpop.eup %6072  ;;  %v2499_v50 = vadd.f32 1.0, %v6071_v21  ;;  %v2426_v54 = vadd.f32 %v2406_v3, %v10739_v29  ;;  %v2408_v4 = vmul.f32 %v8445_v41, %v10740_v44  ;;  %10742 = vst [vmem:[#allocation59_spill] sm:$0xff] %v8459_v17  ;;  %v10743_v21 = vld [vmem:[#allocation55_spill] sm:$0xff] }
 0x1c0   : > { %10741 = vst [vmem:[#allocation57_spill] sm:$0xff] %v8455_v63  ;;  %v6075_v26 = vpop.eup %6074  ;;  %v2613_v13 = vmul.f32 %v2593_v2, %v8240_v53  ;;  %v2554_v10 = vsub.f32 1.0, %v6073_v33  ;;  %6090 = vpow2.f32 %v5664_v9  ;;  %v2427_v60 = vadd.f32 %v2407_v7, %v10739_v29  ;;  %v10744_v41 = vld [vmem:[#allocation63_spill] sm:$0xff]  ;;  %v8470_v46 = vpop.f32.mrf.mxu0 }
 0x1c1   : > { %v2555_v28 = vsub.f32 1.0, %v6075_v26  ;;  %6092 = vrcp.f32 %v2499_v50  ;;  %v5666_v23 = vmul.f32 -1.442695, %v2426_v54  ;;  %v2428_v3 = vadd.f32 %v2408_v4, %v10743_v21 }
 0x1c2   : > { %v6077_v31 = vpop.eup %6076  ;;  %v2574_v38 = vmul.f32 %v2554_v10, %v10744_v41  ;;  %6094 = vpow2.f32 %v5665_v8  ;;  %v2272_v53 = vadd.f32 %v8323_v20, %v10745_v32  ;;  %v5667_v2 = vmul.f32 -1.442695, %v2427_v60  ;;  %v8473_v60 = vpop.f32.mrf.mxu1 }
 0x1c3   : > { %v6079_v9 = vpop.eup %6078  ;;  %v2575_v7 = vmul.f32 %v2555_v28, %v10744_v41  ;;  %v2500_v29 = vadd.f32 1.0, %v6077_v31  ;;  %6096 = vpow2.f32 %v5666_v23  ;;  %v5668_v17 = vmul.f32 -1.442695, %v2428_v3  ;;  %v10749_v41 = vld [vmem:[#allocation54_spill] sm:$0xff] }
 0x1c4   : > { %v6081_v50 = vpop.eup %6080  ;;  %v2594_v54 = vadd.f32 %v6073_v33, %v2574_v38  ;;  %v2501_v25 = vadd.f32 1.0, %v6079_v9  ;;  %6098 = vpow2.f32 %v5667_v2  ;;  %v2409_v4 = vmul.f32 %v8455_v63, %v10740_v44  ;;  %v10747_v2 = vld [vmem:[#allocation67_spill] sm:$0xff] }
 0x1c5   : > { %v2633_v10 = vmul.f32 %v2613_v13, %v10725_v58  ;;  %v2595_v8 = vadd.f32 %v6075_v26, %v2575_v7  ;;  %v2556_v20 = vsub.f32 1.0, %v6081_v50  ;;  %6100 = vrcp.f32 %v2500_v29  ;;  %v10748_v29 = vld [vmem:[#allocation74_spill] sm:$0xff] }
 0x1c6   : > { %v6083_v28 = vpop.eup %6082  ;;  %v2614_v31 = vmul.f32 %v2594_v54, %v8263_v37  ;;  %6102 = vrcp.f32 %v2501_v25  ;;  %v2429_v33 = vadd.f32 %v2409_v4, %v10743_v21  ;;  %v8478_v23 = vadd.f32 %v8335_v5, %v2272_v53  ;;  %v8485_v25 = vpop.f32.mrf.mxu0 }
 0x1c7   : > { %v6085_v3 = vpop.eup %6084  ;;  %v2615_v38 = vmul.f32 %v2595_v8, %v8271_v16  ;;  %v2576_v9 = vmul.f32 %v2556_v20, %v10747_v2  ;;  %v2557_v13 = vsub.f32 1.0, %v6083_v28  ;;  %6104 = vpow2.f32 %v5668_v17  ;;  %v8489_v4 = vpop.f32.mrf.mxu1 }
 0x1c8   : > { %10746 = vst [vmem:[#allocation62_spill] sm:$0xff] %v8478_v23  ;;  %v6087_v26 = vpop.eup %6086  ;;  %v2634_v7 = vmul.f32 %v2614_v31, %v10748_v29  ;;  %v2502_v58 = vadd.f32 1.0, %v6085_v3  ;;  %v5669_v32 = vmul.f32 -1.442695, %v2429_v33  ;;  %v2410_v37 = vmul.f32 %v8478_v23, %v10749_v41  ;;  %v10751_v33 = vld [vmem:[#allocation60_spill] sm:$0xff]  ;;  %v8501_v23 = vpop.f32.mrf.mxu0 }
 0x1c9   : > { %v2635_v5 = vmul.f32 %v2615_v38, %v10748_v29  ;;  %v2596_v53 = vadd.f32 %v6081_v50, %v2576_v9  ;;  %v2577_v54 = vmul.f32 %v2557_v13, %v10747_v2  ;;  %v2558_v16 = vsub.f32 1.0, %v6087_v26  ;;  %v10752_v9 = vld [vmem:[#allocation69_spill] sm:$0xff] }
 0x1ca   : > { %v10750_v17 = vrot.slane %v8386_v34, 2  ;;  %v2652_v31 = vadd.f32 %v2634_v7, %v8399_v51  ;;  %6106 = vrcp.f32 %v2502_v58  ;;  %v2430_v3 = vadd.f32 %v2410_v37, %v10751_v33  ;;  %v8506_v7 = vpop.f32.mrf.mxu1 }
 0x1cb   : > { %v6089_v8 = vpop.eup %6088  ;;  %v2667_v21 = vadd.f32 %v2635_v5, %v2633_v10  ;;  %v2616_v38 = vmul.f32 %v2596_v53, %v8292_v14  ;;  %v2597_v50 = vadd.f32 %v6083_v28, %v2577_v54  ;;  %v2578_v13 = vmul.f32 %v2558_v16, %v10752_v9 }
 0x1cc   : > { %v8494_v20 = vadd.f32 %v10750_v17, %v8386_v34  ;;  %v2503_v29 = vadd.f32 1.0, %v6089_v8  ;;  %6108 = vpow2.f32 %v5669_v32  ;;  %v5670_v2 = vmul.f32 -1.442695, %v2430_v3  ;;  %v10753_v17 = vld [vmem:[#allocation76_spill] sm:$0xff] }
 0x1cd   : > { %v1549_v44 = vrot.slane %v8320_v35, 1  ;;  %v6091_v34 = vpop.eup %6090  ;;  %v2636_v63 = vmul.f32 %v2616_v38, %v10753_v17  ;;  %v2617_v51 = vmul.f32 %v2597_v50, %v8303_v24  ;;  %v2598_v58 = vadd.f32 %v6087_v26, %v2578_v13  ;;  %v8513_v38 = vpop.f32.mrf.mxu0  ;;  %v10754_v13 = vld [vmem:[#allocation81_spill] sm:$0xff] }
 0x1ce   : > { %v1564_v10 = vrot.slane %v8327_v6, 1  ;;  %v6093_v14 = vpop.eup %6092  ;;  %6110 = vrcp.f32 %v2503_v29  ;;  %v2504_v28 = vadd.f32 1.0, %v6091_v34 }
 0x1cf   : > { %v1550_v32 = vadd.f32 %v1549_v44, %v8320_v35  ;;  %v6095_v37 = vpop.eup %6094  ;;  %v2653_v5 = vadd.f32 %v2652_v31, %v2636_v63  ;;  %v2637_v53 = vmul.f32 %v2617_v51, %v10753_v17  ;;  %v2618_v54 = vmul.f32 %v2598_v58, %v8309_v18  ;;  %v8517_v31 = vpop.f32.mrf.mxu1 }
 0x1d0   : > { %v2559_v16 = vsub.f32 1.0, %v6093_v14  ;;  %v6097_v8 = vpop.eup %6096  ;;  %6112 = vrcp.f32 %v2504_v28  ;;  %v2505_v24 = vadd.f32 1.0, %v6095_v37  ;;  %v1565_v26 = vadd.f32 %v1564_v10, %v8327_v6 }
 0x1d1   : > { %v1575_v3 = vadd.f32 %v8382_v45, %v1550_v32  ;;  %v6099_v29 = vpop.eup %6098  ;;  %v2668_v50 = vadd.f32 %v2667_v21, %v2637_v53  ;;  %v2638_v35 = vmul.f32 %v2618_v54, %v10754_v13  ;;  %v2506_v44 = vadd.f32 1.0, %v6097_v8  ;;  %v8522_v8 = vpop.f32.mrf.mxu0 }
 0x1d2   : > { %v2579_v63 = vmul.f32 %v2559_v16, %v10752_v9  ;;  %v6101_v18 = vpop.eup %6100  ;;  %6114 = vrcp.f32 %v2505_v24  ;;  %v2507_v34 = vadd.f32 1.0, %v6099_v29  ;;  %v1576_v51 = vadd.f32 %v8382_v45, %v1565_v26  ;;  %v10755_v29 = vld [vmem:[#allocation71_spill] sm:$0xff] }
 0x1d3   : > { %v6568_v58 = vmov 1966171168   ;;  %v6103_v10 = vpop.eup %6102  ;;  %v8520_v28 = vadd.f32 %v2653_v5, %v2638_v35  ;;  %v2560_v21 = vsub.f32 1.0, %v6101_v18  ;;  %6116 = vrcp.f32 %v2506_v44  ;;  %v10756_v5 = vld [vmem:[#allocation58_spill] sm:$0xff] }
 0x1d4   : > { %v1581_v6 = vunpack.c.l.s4 %v6568_v58  ;;  %v2599_v32 = vadd.f32 %v6093_v14, %v2579_v63  ;;  %v6105_v37 = vpop.eup %6104  ;;  %v2561_v53 = vsub.f32 1.0, %v6103_v10  ;;  %6118 = vrcp.f32 %v2507_v34  ;;  %v8526_v58 = vpop.f32.mrf.mxu1 }
 0x1d5   : > { %v1579_v54 = vcombine.low %v1575_v3, %v1576_v51  ;;  %v2580_v26 = vmul.f32 %v2560_v21, %v10755_v29  ;;  %v2508_v17 = vadd.f32 1.0, %v6105_v37  ;;  %6120 = vpow2.f32 %v5670_v2  ;;  %v8540_v37 = vpop.f32.mrf.mxu0 }
 0x1d6   : > { %v1582_v16 = vunpack.c.0.s8 %v1581_v6  ;;  %v2619_v24 = vmul.f32 %v2599_v32, %v8340_v1  ;;  %v2581_v14 = vmul.f32 %v2561_v53, %v10755_v29  ;;  %v2273_v35 = vadd.f32 %v8342_v62, %v10756_v5  ;;  %v8558_v53 = vpop.f32.mrf.mxu1 }
 0x1d7   : > { %v2113_v3 = vrot.slane %v8407_v61, 1  ;;  %v6107_v44 = vpop.eup %6106  ;;  %v2600_v34 = vadd.f32 %v6101_v18, %v2580_v26  ;;  %6122 = vrcp.f32 %v2508_v17  ;;  %v2128_v2 = vrot.slane %v8494_v20, 1 }
 0x1d8   : > { %v8533_v63 = vsub.s32 %v1582_v16, %v10716_v30  ;;  %v2639_v1 = vmul.f32 %v2619_v24, %v10754_v13  ;;  %v2601_v51 = vadd.f32 %v6103_v10, %v2581_v14  ;;  %v2562_v6 = vsub.f32 1.0, %v6107_v44  ;;  %v10762_v16 = vld [vmem:[#allocation77_spill] sm:$0xff] }
 0x1d9   : > { %v2114_v21 = vadd.f32 %v2113_v3, %v8407_v61  ;;  %v6109_v62 = vpop.eup %6108  ;;  %v10758_v18 = vlaneseq  ;;  %v10759_v17 = vmov 0  ;;  %v2129_v10 = vadd.f32 %v2128_v2, %v8494_v20  ;;  %v10763_v2 = vld [vmem:[#allocation11_spill] sm:$0xff] }
 0x1da   : > { %10757 = vst [vmem:[#allocation39_spill] sm:$0xff] %v8533_v63  ;;  %v1586_v32 = vrot.slane %v1579_v54, %v8533_v63  ;;  %v8547_v30 = vadd.f32 %v2668_v50, %v2639_v1  ;;  %v8556_v61 = vadd.f32 %v8351_v15, %v2273_v35  ;;  %v2620_v54 = vmul.f32 %v2600_v34, %v8358_v59  ;;  %v8571_v59 = vpop.f32.mrf.mxu0 }
 0x1db   : > { %vm8550_vm2 = vcmp.lt.s32.totalorder %v10758_v18, 256  ;;  %v2582_v24 = vmul.f32 %v2562_v6, %v10762_v16  ;;  %v2509_v26 = vadd.f32 1.0, %v6109_v62  ;;  %v6111_v14 = vpop.eup %6110  ;;  %v2621_v3 = vmul.f32 %v2601_v51, %v8364_v19  ;;  %v10764_v19 = vld [vmem:[#allocation12_spill] sm:$0xff]  ;;  %v8578_v62 = vpop.f32.mrf.mxu1 }
 0x1dc   : > { %v10760_v17 = vsel %vm8550_vm2, 4294967295, %v10759_v17  ;;  %v1593_v50 = vrot.slane %v1586_v32, %v8533_v63  ;;  %v2130_v1 = vadd.f32 %v2114_v21, %v8382_v45  ;;  %v2131_v18 = vadd.f32 %v2129_v10, %v8382_v45 }
 0x1dd   : > { %10761 = vst [vmem:[#allocation66_spill] sm:$0xff] %v10760_v17  ;;  %v2411_v15 = vmul.f32 %v8556_v61, %v10749_v41  ;;  %v2602_v20 = vadd.f32 %v6107_v44, %v2582_v24  ;;  %v2563_v35 = vsub.f32 1.0, %v6111_v14  ;;  %6124 = vrcp.f32 %v2509_v26  ;;  %v6113_v34 = vpop.eup %6112  ;;  %v10765_v44 = vld [vmem:[#allocation87_spill] sm:$0xff] }
 0x1de   : > { %1599 = vst.msk [vmem:[%s8545_s19] ss:$8 sm:$0x3] %vm8550_vm2, %v1593_v50  ;;  %v2806_v6 = vadd.f32 %v8360_v27, %v10763_v2  ;;  %v2807_v51 = vadd.f32 %v8377_v47, %v10764_v19  ;;  %v2134_v32 = vcombine.low %v2130_v1, %v2131_v18  ;;  %v2640_v10 = vmul.f32 %v2620_v54, %v10765_v44  ;;  %v10766_v50 = vld [vmem:[#allocation15_spill] sm:$0xff]  ;;  %v8591_v19 = vpop.f32.mrf.mxu0 }
 0x1df   : > { %v2431_v21 = vadd.f32 %v2411_v15, %v10751_v33  ;;  %v2583_v24 = vmul.f32 %v2563_v35, %v10762_v16  ;;  %v2564_v26 = vsub.f32 1.0, %v6113_v34  ;;  %v2808_v13 = vadd.f32 %v8396_v12, %v10766_v50  ;;  %v6115_v41 = vpop.eup %6114 }
 0x1e0   : > { %v2641_v29 = vmul.f32 %v2621_v3, %v10765_v44  ;;  %v2141_v27 = vrot.slane %v2134_v32, %v8533_v63  ;;  %v8587_v47 = vadd.f32 %v8373_v36, %v2806_v6  ;;  %v6117_v1 = vpop.eup %6116  ;;  %v2622_v18 = vmul.f32 %v2602_v20, %v8369_v43  ;;  %v8596_v36 = vpop.f32.mrf.mxu1 }
 0x1e1   : > { %v5671_v2 = vmul.f32 -1.442695, %v2431_v21  ;;  %v2603_v15 = vadd.f32 %v6111_v14, %v2583_v24  ;;  %v2584_v54 = vmul.f32 %v2564_v26, %v10685_v57  ;;  %v2565_v35 = vsub.f32 1.0, %v6115_v41  ;;  %v6119_v12 = vpop.eup %6118 }
 0x1e2   : > { %v2566_v50 = vsub.f32 1.0, %v6117_v1  ;;  %v2148_v3 = vrot.slane %v2141_v27, %v8533_v63  ;;  %v2944_v32 = vmul.f32 %v8587_v47, %v10664_v49  ;;  %v6121_v6 = vpop.eup %6120  ;;  %v2655_v43 = vadd.f32 %v8520_v28, %v2640_v10  ;;  %v10767_v10 = vld [vmem:[#allocation20_spill] sm:$0xff] }
 0x1e3   : > { %6126 = vpow2.f32 %v5671_v2  ;;  %v2623_v14 = vmul.f32 %v2603_v15, %v8394_v22  ;;  %v2604_v20 = vadd.f32 %v6113_v34, %v2584_v54  ;;  %v2585_v21 = vmul.f32 %v2565_v35, %v10685_v57  ;;  %v8610_v34 = vpop.f32.mrf.mxu0  ;;  %v8613_v35 = vpop.f32.mrf.mxu1 }
 0x1e4   : > { %v2586_v24 = vmul.f32 %v2566_v50, %v10690_v40  ;;  %v2567_v26 = vsub.f32 1.0, %v6119_v12  ;;  %v2510_v44 = vadd.f32 1.0, %v6121_v6  ;;  %5638 = vst.msk [vmem:[%s8545_s19 + $0x1] ss:$8 sm:$0x3] %vm8550_vm2, %v2148_v3  ;;  %v2964_v2 = vadd.f32 %v2944_v32, %v10671_v55  ;;  %v6123_v27 = vpop.eup %6122  ;;  %v10768_v32 = vld [vmem:[#allocation46_spill] sm:$0xff] }
 0x1e5   : > { %v2642_v33 = vmul.f32 %v2622_v18, %v8000_v56  ;;  %v2624_v16 = vmul.f32 %v2604_v20, %v8412_v42  ;;  %v2605_v28 = vadd.f32 %v6115_v41, %v2585_v21  ;;  %v2809_v22 = vadd.f32 %v8421_v0, %v10767_v10  ;;  %v10769_v0 = vld [vmem:[#allocation88_spill] sm:$0xff]  ;;  %v10770_v10 = vld [vmem:[#allocation5_spill] sm:$0xff] }
 0x1e6   : > { %v2606_v15 = vadd.f32 %v6117_v1, %v2586_v24  ;;  %v2587_v50 = vmul.f32 %v2567_v26, %v10690_v40  ;;  %v2568_v54 = vsub.f32 1.0, %v6123_v27  ;;  %6128 = vrcp.f32 %v2510_v44  ;;  %v10771_v26 = vld [vmem:[#allocation21_spill] sm:$0xff] }
 0x1e7   : > { %v2643_v3 = vmul.f32 %v2623_v14, %v8000_v56  ;;  %v2644_v6 = vmul.f32 %v2624_v16, %v10768_v32  ;;  %v2625_v18 = vmul.f32 %v2605_v28, %v8415_v48  ;;  %v5686_v42 = vmul.f32 -1.442695, %v2964_v2  ;;  %v8626_v14 = vpop.f32.mrf.mxu0  ;;  %v8633_v28 = vpop.f32.mrf.mxu1 }
 0x1e8   : > { %v2626_v41 = vmul.f32 %v2606_v15, %v8430_v39  ;;  %v2607_v20 = vadd.f32 %v6119_v12, %v2587_v50  ;;  %v2588_v21 = vmul.f32 %v2568_v54, %v10769_v0  ;;  %v8621_v1 = vadd.f32 %v10770_v10, %v2807_v51  ;;  %v10772_v39 = vld [vmem:[#allocation22_spill] sm:$0xff]  ;;  %v10775_v10 = vld [vmem:[#allocation85_spill] sm:$0xff] }
 0x1e9   : > { %v2670_v24 = vadd.f32 %v8547_v30, %v2641_v29  ;;  %v2656_v44 = vadd.f32 %v2655_v43, %v2642_v33  ;;  %v2810_v40 = vadd.f32 %v8447_v52, %v10771_v26  ;;  %6130 = vpow2.f32 %v5686_v42  ;;  %v10773_v29 = vld [vmem:[#allocation27_spill] sm:$0xff]  ;;  %v10774_v30 = vld [vmem:[#allocation52_spill] sm:$0xff]  ;;  %v10779_v26 = vld [vmem:[#allocation53_spill] sm:$0xff] }
 0x1ea   : > { %v6125_v16 = vpop.eup %6124  ;;  %v2645_v48 = vmul.f32 %v2625_v18, %v10768_v32  ;;  %v2608_v2 = vadd.f32 %v6123_v27, %v2588_v21  ;;  %v2811_v12 = vadd.f32 %v8462_v11, %v10772_v39  ;;  %v2945_v51 = vmul.f32 %v8621_v1, %v10664_v49  ;;  %v10776_v18 = vld [vmem:[#allocation23_spill] sm:$0xff]  ;;  %v10777_v42 = vld [vmem:[#allocation56_spill] sm:$0xff] }
 0x1eb   : > { %v2646_v33 = vmul.f32 %v2626_v41, %v10773_v29  ;;  %v2627_v43 = vmul.f32 %v2607_v20, %v10774_v30  ;;  %v2569_v52 = vsub.f32 1.0, %v6125_v16  ;;  %v8638_v15 = vadd.f32 %v10775_v10, %v2808_v13  ;;  %v10778_v32 = vld [vmem:[#allocation7_spill] sm:$0xff]  ;;  %v8650_v30 = vpop.f32.mrf.mxu0 }
 0x1ec   : > { %v2671_v50 = vadd.f32 %v2670_v24, %v2643_v3  ;;  %v2657_v54 = vadd.f32 %v2656_v44, %v2644_v6  ;;  %v2965_v27 = vadd.f32 %v2945_v51, %v10671_v55  ;;  %v2812_v11 = vadd.f32 %v8473_v60, %v10776_v18  ;;  %v10780_v6 = vld [vmem:[#allocation26_spill] sm:$0xff]  ;;  %v10781_v44 = vld [vmem:[#allocation59_spill] sm:$0xff] }
 0x1ed   : > { %v2628_v21 = vmul.f32 %v2608_v2, %v10777_v42  ;;  %v2589_v39 = vmul.f32 %v2569_v52, %v10769_v0  ;;  %v2946_v41 = vmul.f32 %v8638_v15, %v10778_v32  ;;  %v8648_v20 = vadd.f32 %v10779_v26, %v2809_v22  ;;  %v8659_v2 = vpop.f32.mrf.mxu1  ;;  %v10782_v22 = vld [vmem:[#allocation14_spill] sm:$0xff]  ;;  %v10783_v42 = vld [vmem:[#allocation8_spill] sm:$0xff] }
 0x1ee   : > { %v8652_v13 = vadd.f32 %v2671_v50, %v2645_v48  ;;  %v5687_v3 = vmul.f32 -1.442695, %v2965_v27  ;;  %v2813_v24 = vadd.f32 %v8489_v4, %v10780_v6  ;;  %v8657_v60 = vadd.f32 %v10781_v44, %v2810_v40  ;;  %v10784_v40 = vld [vmem:[#allocation86_spill] sm:$0xff] }
 0x1ef   : > { %v2658_v52 = vadd.f32 %v2657_v54, %v2646_v33  ;;  %v8662_v10 = vmul.f32 %v2627_v43, %v10773_v29  ;;  %v2966_v26 = vadd.f32 %v2946_v41, %v10782_v22  ;;  %v2947_v48 = vmul.f32 %v8648_v20, %v10778_v32  ;;  %v8674_v43 = vpop.f32.mrf.mxu0  ;;  %v10785_v54 = vld [vmem:[#allocation29_spill] sm:$0xff] }
 0x1f0   : > { %v6127_v51 = vpop.eup %6126  ;;  %v2609_v50 = vadd.f32 %v6125_v16, %v2589_v39  ;;  %6132 = vpow2.f32 %v5687_v3  ;;  %v2948_v4 = vmul.f32 %v8657_v60, %v10783_v42  ;;  %v2648_v44 = vmul.f32 %v2628_v21, %v10784_v40  ;;  %v10786_v16 = vld [vmem:[#allocation18_spill] sm:$0xff] }
 0x1f1   : > { %v2511_v27 = vadd.f32 1.0, %v6127_v51  ;;  %v5688_v0 = vmul.f32 -1.442695, %v2966_v26  ;;  %v2967_v6 = vadd.f32 %v2947_v48, %v10782_v22  ;;  %v8672_v33 = vadd.f32 %v8470_v46, %v2811_v12  ;;  %v8682_v51 = vpop.f32.mrf.mxu1  ;;  %v10787_v48 = vld [vmem:[#allocation33_spill] sm:$0xff] }
 0x1f2   : > { %v2814_v41 = vadd.f32 %v8506_v7, %v10785_v54  ;;  %v2968_v39 = vadd.f32 %v2948_v4, %v10786_v16  ;;  %v8680_v3 = vadd.f32 %v8485_v25, %v2812_v11  ;;  %v2815_v46 = vadd.f32 %v8517_v31, %v10787_v48  ;;  %v10789_v54 = vld [vmem:[#allocation9_spill] sm:$0xff]  ;;  %v10790_v48 = vld [vmem:[#allocation47_spill] sm:$0xff] }
 0x1f3   : > { %6134 = vrcp.f32 %v2511_v27  ;;  %v6129_v21 = vpop.eup %6128  ;;  %v5689_v26 = vmul.f32 -1.442695, %v2967_v6  ;;  %v2949_v12 = vmul.f32 %v8672_v33, %v10783_v42  ;;  %v10788_v27 = vld [vmem:[#allocation57_spill] sm:$0xff]  ;;  %v2659_v25 = vadd.f32 %v2658_v52, %v2648_v44  ;;  %v8695_v6 = vpop.f32.mrf.mxu0  ;;  %v10791_v42 = vld [vmem:[#allocation34_spill] sm:$0xff] }
 0x1f4   : > { %6136 = vpow2.f32 %v5688_v0  ;;  %v2629_v29 = vmul.f32 %v2609_v50, %v10788_v27  ;;  %v2570_v18 = vsub.f32 1.0, %v6129_v21  ;;  %v5690_v7 = vmul.f32 -1.442695, %v2968_v39  ;;  %v10792_v39 = vld [vmem:[#allocation19_spill] sm:$0xff]  ;;  %v8701_v32 = vpop.f32.mrf.mxu1 }
 0x1f5   : > { %v2950_v4 = vmul.f32 %v8680_v3, %v10789_v54  ;;  %6138 = vpow2.f32 %v5689_v26  ;;  %v2969_v11 = vadd.f32 %v2949_v12, %v10786_v16  ;;  %v8693_v0 = vadd.f32 %v8501_v23, %v2813_v24 }
 0x1f6   : > { %v6131_v31 = vpop.eup %6130  ;;  %v2590_v22 = vmul.f32 %v2570_v18, %v10790_v48  ;;  %6140 = vpow2.f32 %v5690_v7  ;;  %v2816_v50 = vadd.f32 %v8526_v58, %v10791_v42  ;;  %v8706_v23 = vadd.f32 %v8513_v38, %v2814_v41  ;;  %v10793_v58 = vld [vmem:[#allocation38_spill] sm:$0xff] }
 0x1f7   : > { %v2970_v27 = vadd.f32 %v2950_v4, %v10792_v39  ;;  %v3044_v52 = vadd.f32 1.0, %v6131_v31  ;;  %v5691_v44 = vmul.f32 -1.442695, %v2969_v11  ;;  %v2951_v26 = vmul.f32 %v8693_v0, %v10789_v54  ;;  %v10794_v31 = vld [vmem:[#allocation10_spill] sm:$0xff]  ;;  %v8719_v54 = vpop.f32.mrf.mxu0 }
 0x1f8   : > { %v8709_v24 = vmul.f32 %v2629_v29, %v10784_v40  ;;  %v2610_v18 = vadd.f32 %v6129_v21, %v2590_v22  ;;  %v8712_v7 = vadd.f32 %v8522_v8, %v2815_v46  ;;  %v2817_v4 = vadd.f32 %v8558_v53, %v10793_v58  ;;  %v10795_v38 = vld [vmem:[#allocation62_spill] sm:$0xff]  ;;  %v8727_v22 = vpop.f32.mrf.mxu1 }
 0x1f9   : > { %v5692_v12 = vmul.f32 -1.442695, %v2970_v27  ;;  %6142 = vrcp.f32 %v3044_v52  ;;  %v2971_v11 = vadd.f32 %v2951_v26, %v10792_v39  ;;  %v2952_v42 = vmul.f32 %v8706_v23, %v10794_v31  ;;  %v10796_v21 = vld [vmem:[#allocation30_spill] sm:$0xff]  ;;  %v10797_v27 = vld [vmem:[#allocation25_spill] sm:$0xff] }
 0x1fa   : > { %v2630_v41 = vmul.f32 %v2610_v18, %v10795_v38  ;;  %6144 = vpow2.f32 %v5691_v44  ;;  %v2953_v29 = vmul.f32 %v8712_v7, %v10794_v31  ;;  %v8725_v8 = vadd.f32 %v8540_v37, %v2816_v50  ;;  %v10798_v26 = vld [vmem:[#allocation78_spill] sm:$0xff]  ;;  %v10799_v44 = vld [vmem:[#allocation24_spill] sm:$0xff]  ;;  %v8747_v39 = vpop.f32.mrf.mxu1 }
 0x1fb   : > { %6146 = vpow2.f32 %v5692_v12  ;;  %v5693_v53 = vmul.f32 -1.442695, %v2971_v11  ;;  %v2818_v46 = vadd.f32 %v8578_v62, %v10796_v21  ;;  %v2972_v52 = vadd.f32 %v2952_v42, %v10797_v27  ;;  %v10801_v12 = vld [vmem:[#allocation35_spill] sm:$0xff]  ;;  %v8744_v42 = vpop.f32.mrf.mxu0 }
 0x1fc   : > { %v2650_v40 = vmul.f32 %v2630_v41, %v10798_v26  ;;  %v2973_v18 = vadd.f32 %v2953_v29, %v10797_v27  ;;  %v2954_v38 = vmul.f32 %v8725_v8, %v10799_v44  ;;  %v8737_v58 = vadd.f32 %v8571_v59, %v2817_v4  ;;  %v10803_v27 = vld [vmem:[#allocation32_spill] sm:$0xff]  ;;  %v10804_v4 = vld [vmem:[#allocation37_spill] sm:$0xff]  ;;  %v8763_v55 = vpop.f32.mrf.mxu1 }
 0x1fd   : > { %v6133_v37 = vpop.eup %6132  ;;  %6148 = vpow2.f32 %v5693_v53  ;;  %v5694_v50 = vmul.f32 -1.442695, %v2972_v52  ;;  %v2819_v11 = vadd.f32 %v8596_v36, %v10801_v12  ;;  %v8742_v62 = vadd.f32 %v8591_v19, %v2818_v46  ;;  %v10805_v52 = vld [vmem:[#allocation31_spill] sm:$0xff]  ;;  %v8757_v16 = vpop.f32.mrf.mxu0 }
 0x1fe   : > { %10800 = vst [vmem:[#allocation65_spill] sm:$0xff] %v8737_v58  ;;  %v2660_v41 = vadd.f32 %v2659_v25, %v2650_v40  ;;  %v3045_v21 = vadd.f32 1.0, %v6133_v37  ;;  %v5695_v29 = vmul.f32 -1.442695, %v2973_v18  ;;  %v2974_v31 = vadd.f32 %v2954_v38, %v10803_v27  ;;  %v10806_v37 = vld [vmem:[#allocation43_spill] sm:$0xff] }
 0x1ff   : > { %10802 = vst [vmem:[#allocation64_spill] sm:$0xff] %v8742_v62  ;;  %6150 = vpow2.f32 %v5694_v50  ;;  %v2820_v53 = vadd.f32 %v8613_v35, %v10804_v4  ;;  %v2955_v36 = vmul.f32 %v8737_v58, %v10799_v44  ;;  %v2956_v19 = vmul.f32 %v8742_v62, %v10805_v52 }
 0x200   : > { %v6135_v59 = vpop.eup %6134  ;;  %v2661_v12 = vrot.slane %v2660_v41, 4  ;;  %6152 = vrcp.f32 %v3045_v21  ;;  %v5696_v25 = vmul.f32 -1.442695, %v2974_v31  ;;  %v8761_v62 = vadd.f32 %v8610_v34, %v2819_v11 }
 0x201   : > { %v6137_v46 = vpop.eup %6136  ;;  %v2571_v40 = vsub.f32 1.0, %v6135_v59  ;;  %6154 = vpow2.f32 %v5695_v29  ;;  %v2975_v38 = vadd.f32 %v2955_v36, %v10803_v27  ;;  %v2976_v50 = vadd.f32 %v2956_v19, %v10806_v37 }
 0x202   : > { %v3046_v18 = vadd.f32 1.0, %v6137_v46  ;;  %v6139_v35 = vpop.eup %6138  ;;  %v2662_v4 = vadd.f32 %v2661_v12, %v2660_v41  ;;  %6156 = vpow2.f32 %v5696_v25  ;;  %v2957_v58 = vmul.f32 %v8761_v62, %v10805_v52  ;;  %v10807_v41 = vld [vmem:[#allocation40_spill] sm:$0xff] }
 0x203   : > { %v2591_v44 = vmul.f32 %v2571_v40, %v10790_v48  ;;  %v6141_v21 = vpop.eup %6140  ;;  %v3047_v31 = vadd.f32 1.0, %v6139_v35  ;;  %v5697_v29 = vmul.f32 -1.442695, %v2975_v38  ;;  %v5698_v46 = vmul.f32 -1.442695, %v2976_v50  ;;  %v8774_v40 = vpop.f32.mrf.mxu0 }
 0x204   : > { %6158 = vrcp.f32 %v3046_v18  ;;  %v2663_v36 = vrot.slane %v2662_v4, 2  ;;  %v3048_v19 = vadd.f32 1.0, %v6141_v21  ;;  %v2673_v12 = vadd.f32 %v8652_v13, %v8662_v10  ;;  %v8780_v18 = vpop.f32.mrf.mxu1  ;;  %v10808_v10 = vld [vmem:[#allocation42_spill] sm:$0xff] }
 0x205   : > { %v2611_v27 = vadd.f32 %v6135_v59, %v2591_v44  ;;  %6160 = vrcp.f32 %v3047_v31  ;;  %v2821_v34 = vadd.f32 %v8633_v28, %v10807_v41  ;;  %v8772_v11 = vadd.f32 %v8626_v14, %v2820_v53  ;;  %v10810_v31 = vld [vmem:[#allocation49_spill] sm:$0xff] }
 0x206   : > { %v8776_v25 = vpop.eup %6142  ;;  %6162 = vrcp.f32 %v3048_v19  ;;  %v2977_v59 = vadd.f32 %v2957_v58, %v10806_v37  ;;  %v2674_v13 = vadd.f32 %v2673_v12, %v8709_v24  ;;  %v2664_v50 = vadd.f32 %v2663_v36, %v2662_v4  ;;  %v8791_v24 = vpop.f32.mrf.mxu0  ;;  %v10811_v36 = vld [vmem:[#allocation44_spill] sm:$0xff] }
 0x207   : > { %v2631_v44 = vmul.f32 %v2611_v27, %v8556_v61  ;;  %v6145_v38 = vpop.eup %6144  ;;  %6164 = vpow2.f32 %v5697_v29  ;;  %v2958_v28 = vmul.f32 %v8772_v11, %v10808_v10  ;;  %v8786_v14 = vadd.f32 %v8650_v30, %v2821_v34  ;;  %v8795_v34 = vpop.f32.mrf.mxu1 }
 0x208   : > { %v6147_v53 = vpop.eup %6146  ;;  %v3049_v61 = vadd.f32 1.0, %v6145_v38  ;;  %6166 = vpow2.f32 %v5698_v46  ;;  %v3104_v58 = vsub.f32 1.0, %v8776_v25  ;;  %v5699_v21 = vmul.f32 -1.442695, %v2977_v59 }
 0x209   : > { %10809 = vst [vmem:[#allocation16_spill] sm:$0xff] %v8786_v14  ;;  %v2651_v35 = vmul.f32 %v2631_v44, %v10798_v26  ;;  %v3050_v27 = vadd.f32 1.0, %v6147_v53  ;;  %v2978_v19 = vadd.f32 %v2958_v28, %v10810_v31  ;;  %v2959_v30 = vmul.f32 %v8786_v14, %v10808_v10 }
 0x20a   : > { %v6149_v29 = vpop.eup %6148  ;;  %6168 = vrcp.f32 %v3049_v61  ;;  %v2822_v46 = vadd.f32 %v8659_v2, %v10811_v36  ;;  %v2665_v59 = vrot.slane %v2664_v50, 1  ;;  %v8806_v36 = vpop.f32.mrf.mxu1 }
 0x20b   : > { %v2675_v12 = vadd.f32 %v2674_v13, %v2651_v35  ;;  %6170 = vrcp.f32 %v3050_v27  ;;  %v3051_v4 = vadd.f32 1.0, %v6149_v29  ;;  %v5700_v44 = vmul.f32 -1.442695, %v2978_v19  ;;  %v10812_v13 = vld [vmem:[#allocation61_spill] sm:$0xff]  ;;  %v8804_v27 = vpop.f32.mrf.mxu0 }
 0x20c   : > { %v6151_v38 = vpop.eup %6150  ;;  %6172 = vpow2.f32 %v5699_v21  ;;  %v2979_v28 = vadd.f32 %v2959_v30, %v10810_v31  ;;  %v3124_v35 = vmul.f32 %v3104_v58, %v10812_v13  ;;  %v8802_v10 = vadd.f32 %v8674_v43, %v2822_v46  ;;  %10814 = vst [vmem:[#allocation72_spill] sm:$0xff] %v8804_v27  ;;  %v10815_v31 = vld [vmem:[#allocation45_spill] sm:$0xff] }
 0x20d   : > { %v2676_v53 = vrot.slane %v2675_v12, 4  ;;  %v6153_v26 = vpop.eup %6152  ;;  %6174 = vrcp.f32 %v3051_v4  ;;  %v3052_v61 = vadd.f32 1.0, %v6151_v38  ;;  %v2823_v58 = vadd.f32 %v8682_v51, %v10815_v31  ;;  %v10816_v4 = vld [vmem:[#allocation48_spill] sm:$0xff]  ;;  %v8814_v52 = vpop.f32.mrf.mxu0 }
 0x20e   : > { %10813 = vst [vmem:[#allocation41_spill] sm:$0xff] %v8802_v10  ;;  %v6155_v29 = vpop.eup %6154  ;;  %v3105_v2 = vsub.f32 1.0, %v6153_v26  ;;  %6176 = vpow2.f32 %v5700_v44  ;;  %v5701_v19 = vmul.f32 -1.442695, %v2979_v28  ;;  %v2960_v38 = vmul.f32 %v8802_v10, %v10816_v4  ;;  %10818 = vst [vmem:[#allocation75_spill] sm:$0xff] %v8814_v52  ;;  %v8820_v10 = vpop.f32.mrf.mxu1  ;;  %v10822_v52 = vld [vmem:[#allocation51_spill] sm:$0xff] }
 0x20f   : > { %v2677_v41 = vadd.f32 %v2676_v53, %v2675_v12  ;;  %v6157_v21 = vpop.eup %6156  ;;  %6178 = vrcp.f32 %v3052_v61  ;;  %v3053_v30 = vadd.f32 1.0, %v6155_v29  ;;  %v2666_v12 = vadd.f32 %v2665_v59, %v2664_v50  ;;  %v10817_v53 = vld [vmem:[#allocation55_spill] sm:$0xff]  ;;  %10819 = vst [vmem:[#allocation70_spill] sm:$0xff] %v8820_v10 }
 0x210   : > { %v3125_v37 = vmul.f32 %v3105_v2, %v10812_v13  ;;  %v3054_v48 = vadd.f32 1.0, %v6157_v21  ;;  %6180 = vpow2.f32 %v5701_v19  ;;  %v2980_v28 = vadd.f32 %v2960_v38, %v10817_v53  ;;  %v10820_v19 = vld [vmem:[#allocation63_spill] sm:$0xff]  ;;  %v8833_v27 = vpop.f32.mrf.mxu1 }
 0x211   : > { %v6159_v43 = vpop.eup %6158  ;;  %v2678_v46 = vrot.slane %v2677_v41, 2  ;;  %6182 = vrcp.f32 %v3053_v30  ;;  %v3144_v51 = vadd.f32 %v8776_v25, %v3124_v35  ;;  %v8818_v31 = vadd.f32 %v8695_v6, %v2823_v58  ;;  %v8826_v35 = vpop.f32.mrf.mxu0 }
 0x212   : > { %v3106_v44 = vsub.f32 1.0, %v6159_v43  ;;  %v6161_v61 = vpop.eup %6160  ;;  %6184 = vrcp.f32 %v3054_v48  ;;  %v3145_v21 = vadd.f32 %v6153_v26, %v3125_v37  ;;  %v5702_v30 = vmul.f32 -1.442695, %v2980_v28  ;;  %v10821_v26 = vld [vmem:[#allocation67_spill] sm:$0xff] }
 0x213   : > { %v2679_v29 = vadd.f32 %v2678_v46, %v2677_v41  ;;  %v6163_v2 = vpop.eup %6162  ;;  %v3107_v59 = vsub.f32 1.0, %v6161_v61  ;;  %v2961_v41 = vmul.f32 %v8818_v31, %v10816_v4  ;;  %v8831_v28 = vadd.f32 %v8701_v32, %v10822_v52 }
 0x214   : > { %v3126_v50 = vmul.f32 %v3106_v44, %v10820_v19  ;;  %v6165_v13 = vpop.eup %6164  ;;  %v3108_v14 = vsub.f32 1.0, %v6163_v2  ;;  %6186 = vpow2.f32 %v5702_v30  ;;  %v2682_v4 = vadd.f32 %v2666_v12, %v8382_v45 }
 0x215   : > { %v2680_v38 = vrot.slane %v2679_v29, 1  ;;  %v6167_v46 = vpop.eup %6166  ;;  %v3127_v48 = vmul.f32 %v3107_v59, %v10820_v19  ;;  %v3055_v6 = vadd.f32 1.0, %v6165_v13  ;;  %v3165_v13 = vmul.f32 %v3145_v21, %v8621_v1 }
 0x216   : > { %v3146_v25 = vadd.f32 %v6159_v43, %v3126_v50  ;;  %v3128_v37 = vmul.f32 %v3108_v14, %v10821_v26  ;;  %v3056_v44 = vadd.f32 1.0, %v6167_v46  ;;  %v3164_v43 = vmul.f32 %v3144_v51, %v8587_v47  ;;  %v8845_v47 = vpop.f32.mrf.mxu0  ;;  %v10845_v17 = vld [vmem:[#allocation70_spill] sm:$0xff] }
 0x217   : > { %v2681_v58 = vadd.f32 %v2680_v38, %v2679_v29  ;;  %v6169_v10 = vpop.eup %6168  ;;  %6188 = vrcp.f32 %v3055_v6  ;;  %v3147_v32 = vadd.f32 %v6161_v61, %v3127_v48  ;;  %v8842_v46 = vadd.f32 %v8727_v22, %v10756_v5 }
 0x218   : > { %v6171_v50 = vpop.eup %6170  ;;  %v3166_v14 = vmul.f32 %v3146_v25, %v8638_v15  ;;  %v3109_v59 = vsub.f32 1.0, %v6169_v10  ;;  %6190 = vrcp.f32 %v3056_v44  ;;  %v2981_v12 = vadd.f32 %v2961_v41, %v10817_v53  ;;  %v8848_v15 = vpop.f32.mrf.mxu1  ;;  %v10823_v44 = vld [vmem:[#allocation73_spill] sm:$0xff] }
 0x219   : > { %v2683_v29 = vadd.f32 %v2681_v58, %v8382_v45  ;;  %v6173_v30 = vpop.eup %6172  ;;  %v3110_v38 = vsub.f32 1.0, %v6171_v50  ;;  %v3148_v21 = vadd.f32 %v6163_v2, %v3128_v37  ;;  %v3184_v61 = vmul.f32 %v3164_v43, %v10823_v44  ;;  %v10824_v45 = vld [vmem:[#allocation74_spill] sm:$0xff] }
 0x21a   : > { %v6175_v1 = vpop.eup %6174  ;;  %v3129_v6 = vmul.f32 %v3109_v59, %v10821_v26  ;;  %v3057_v58 = vadd.f32 1.0, %v6173_v30  ;;  %v3185_v48 = vmul.f32 %v3165_v13, %v10823_v44  ;;  %v3186_v53 = vmul.f32 %v3166_v14, %v10824_v45  ;;  %v8857_v30 = vpop.f32.mrf.mxu0 }
 0x21b   : > { %v2686_v51 = vcombine.low %v2682_v4, %v2683_v29  ;;  %v6177_v25 = vpop.eup %6176  ;;  %v3130_v22 = vmul.f32 %v3110_v38, %v10752_v9  ;;  %v3111_v5 = vsub.f32 1.0, %v6175_v1  ;;  %v3167_v37 = vmul.f32 %v3147_v32, %v8648_v20  ;;  %v8861_v14 = vpop.f32.mrf.mxu1  ;;  %v10825_v32 = vld [vmem:[#allocation71_spill] sm:$0xff] }
 0x21c   : > { %v6179_v52 = vpop.eup %6178  ;;  %v3149_v4 = vadd.f32 %v6169_v10, %v3129_v6  ;;  %6192 = vrcp.f32 %v3057_v58  ;;  %v3168_v44 = vmul.f32 %v3148_v21, %v8657_v60  ;;  %v5703_v26 = vmul.f32 -1.442695, %v2981_v12 }
 0x21d   : > { %v2693_v41 = vrot.slane %v2686_v51, %v8533_v63  ;;  %v6181_v2 = vpop.eup %6180  ;;  %v3150_v29 = vadd.f32 %v6171_v50, %v3130_v22  ;;  %v3131_v59 = vmul.f32 %v3111_v5, %v10752_v9  ;;  %v3112_v43 = vsub.f32 1.0, %v6179_v52 }
 0x21e   : > { %v6183_v13 = vpop.eup %6182  ;;  %v3058_v51 = vadd.f32 1.0, %v6177_v25  ;;  %v3169_v6 = vmul.f32 %v3149_v4, %v8672_v33  ;;  %v3204_v5 = vadd.f32 %v3186_v53, %v3184_v61  ;;  %v3187_v60 = vmul.f32 %v3167_v37, %v10824_v45  ;;  %v10826_v4 = vld [vmem:[#allocation77_spill] sm:$0xff]  ;;  %v8879_v61 = vpop.f32.mrf.mxu1 }
 0x21f   : > { %v2700_v38 = vrot.slane %v2693_v41, %v8533_v63  ;;  %v6185_v10 = vpop.eup %6184  ;;  %v3151_v20 = vadd.f32 %v6175_v1, %v3131_v59  ;;  %v3132_v50 = vmul.f32 %v3112_v43, %v10825_v32  ;;  %v3113_v58 = vsub.f32 1.0, %v6183_v13  ;;  %v8871_v63 = vpop.f32.mrf.mxu0 }
 0x220   : > { %v3114_v22 = vsub.f32 1.0, %v6185_v10  ;;  %6194 = vrcp.f32 %v3058_v51  ;;  %v3059_v41 = vadd.f32 1.0, %v6181_v2  ;;  %v3170_v12 = vmul.f32 %v3150_v29, %v8680_v3  ;;  %v10827_v2 = vld [vmem:[#allocation76_spill] sm:$0xff] }
 0x221   : > { %5672 = vst.msk [vmem:[%s8545_s19 + $0x2] ss:$8 sm:$0x3] %vm8550_vm2, %v2700_v38  ;;  %v3152_v21 = vadd.f32 %v6179_v52, %v3132_v50  ;;  %v3133_v25 = vmul.f32 %v3113_v58, %v10825_v32  ;;  %v6187_v33 = vpop.eup %6186  ;;  %v3171_v1 = vmul.f32 %v3151_v20, %v8693_v0  ;;  %v8877_v53 = vadd.f32 %v8719_v54, %v8831_v28  ;;  %v10828_v0 = vld [vmem:[#allocation54_spill] sm:$0xff]  ;;  %v10829_v54 = vld [vmem:[#allocation81_spill] sm:$0xff] }
 0x222   : > { %v3134_v59 = vmul.f32 %v3114_v22, %v10826_v4  ;;  %6196 = vrcp.f32 %v3059_v41  ;;  %v3188_v37 = vmul.f32 %v3168_v44, %v10827_v2  ;;  %v3189_v3 = vmul.f32 %v3169_v6, %v10827_v2  ;;  %v8888_v44 = vpop.f32.mrf.mxu0 }
 0x223   : > { %v3172_v52 = vmul.f32 %v3152_v21, %v8706_v23  ;;  %v3153_v29 = vadd.f32 %v6183_v13, %v3133_v25  ;;  %v3060_v51 = vadd.f32 1.0, %v6187_v33  ;;  %6198 = vpow2.f32 %v5703_v26  ;;  %v10830_v13 = vld [vmem:[#allocation60_spill] sm:$0xff]  ;;  %v8892_v21 = vpop.f32.mrf.mxu1  ;;  %v10831_v33 = vld [vmem:[#allocation87_spill] sm:$0xff] }
 0x224   : > { %v6189_v43 = vpop.eup %6188  ;;  %v3154_v38 = vadd.f32 %v6185_v10, %v3134_v59  ;;  %v2962_v20 = vmul.f32 %v8877_v53, %v10828_v0  ;;  %v3219_v58 = vadd.f32 %v3187_v60, %v3185_v48  ;;  %v3190_v28 = vmul.f32 %v3170_v12, %v10829_v54 }
 0x225   : > { %v6191_v50 = vpop.eup %6190  ;;  %v3173_v22 = vmul.f32 %v3153_v29, %v8712_v7  ;;  %v3115_v41 = vsub.f32 1.0, %v6189_v43  ;;  %v3191_v6 = vmul.f32 %v3171_v1, %v10829_v54  ;;  %6200 = vrcp.f32 %v3060_v51  ;;  %v10832_v54 = vld [vmem:[#allocation11_spill] sm:$0xff] }
 0x226   : > { %v3116_v23 = vsub.f32 1.0, %v6191_v50  ;;  %v2982_v10 = vadd.f32 %v2962_v20, %v10830_v13  ;;  %v3205_v26 = vadd.f32 %v3204_v5, %v3188_v37  ;;  %v3220_v25 = vadd.f32 %v3219_v58, %v3189_v3  ;;  %v10833_v37 = vld [vmem:[#allocation12_spill] sm:$0xff] }
 0x227   : > { %v3192_v59 = vmul.f32 %v3172_v52, %v10831_v33  ;;  %v3135_v48 = vmul.f32 %v3115_v41, %v10826_v4  ;;  %v3174_v60 = vmul.f32 %v3154_v38, %v8725_v8  ;;  %v8900_v1 = vadd.f32 %v8744_v42, %v8842_v46  ;;  %v8907_v52 = vpop.f32.mrf.mxu0  ;;  %v8909_v41 = vpop.f32.mrf.mxu1  ;;  %v10834_v46 = vld [vmem:[#allocation15_spill] sm:$0xff] }
 0x228   : > { %v3136_v7 = vmul.f32 %v3116_v23, %v10685_v57  ;;  %v5704_v12 = vmul.f32 -1.442695, %v2982_v10  ;;  %v3206_v51 = vadd.f32 %v3205_v26, %v3190_v28  ;;  %v3193_v20 = vmul.f32 %v3173_v22, %v10831_v33  ;;  %v10844_v33 = vld [vmem:[#allocation22_spill] sm:$0xff] }
 0x229   : > { %v6193_v29 = vpop.eup %6192  ;;  %v3358_v5 = vadd.f32 %v8747_v39, %v10832_v54  ;;  %v3359_v3 = vadd.f32 %v8763_v55, %v10833_v37  ;;  %v3221_v8 = vadd.f32 %v3220_v25, %v3191_v6  ;;  %v3155_v38 = vadd.f32 %v6189_v43, %v3135_v48  ;;  %v10835_v48 = vld [vmem:[#allocation65_spill] sm:$0xff]  ;;  %v10842_v37 = vld [vmem:[#allocation14_spill] sm:$0xff] }
 0x22a   : > { %v3117_v58 = vsub.f32 1.0, %v6193_v29  ;;  %6202 = vpow2.f32 %v5704_v12  ;;  %v3207_v42 = vadd.f32 %v3206_v51, %v3192_v59  ;;  %v3360_v28 = vadd.f32 %v8780_v18, %v10834_v46  ;;  %v8934_v12 = vpop.f32.mrf.mxu1 }
 0x22b   : > { %v2963_v22 = vmul.f32 %v8900_v1, %v10828_v0  ;;  %v8916_v39 = vadd.f32 %v8757_v16, %v3358_v5  ;;  %v3194_v55 = vmul.f32 %v3174_v60, %v8000_v56  ;;  %v3156_v23 = vadd.f32 %v6191_v50, %v3136_v7  ;;  %v8929_v16 = vpop.f32.mrf.mxu0  ;;  %v10836_v5 = vld [vmem:[#allocation20_spill] sm:$0xff] }
 0x22c   : > { %v3137_v6 = vmul.f32 %v3117_v58, %v10685_v57  ;;  %v8921_v43 = vadd.f32 %v8774_v40, %v3359_v3  ;;  %v3222_v26 = vadd.f32 %v3221_v8, %v3193_v20  ;;  %v8927_v59 = vadd.f32 %v8791_v24, %v3360_v28  ;;  %v10837_v8 = vld [vmem:[#allocation13_spill] sm:$0xff]  ;;  %v10838_v24 = vld [vmem:[#allocation7_spill] sm:$0xff] }
 0x22d   : > { %v6195_v10 = vpop.eup %6194  ;;  %v2983_v25 = vadd.f32 %v2963_v22, %v10830_v13  ;;  %v3496_v18 = vmul.f32 %v8916_v39, %v10664_v49  ;;  %v3175_v60 = vmul.f32 %v3155_v38, %v10835_v48  ;;  %v3361_v3 = vadd.f32 %v8795_v34, %v10836_v5  ;;  %v10839_v22 = vld [vmem:[#allocation64_spill] sm:$0xff]  ;;  %v10841_v48 = vld [vmem:[#allocation21_spill] sm:$0xff]  ;;  %v8947_v5 = vpop.f32.mrf.mxu0 }
 0x22e   : > { %v3157_v50 = vadd.f32 %v6193_v29, %v3137_v6  ;;  %v3118_v7 = vsub.f32 1.0, %v6195_v10  ;;  %v3497_v40 = vmul.f32 %v8921_v43, %v10664_v49  ;;  %v3498_v28 = vmul.f32 %v8927_v59, %v10838_v24  ;;  %v10840_v38 = vld [vmem:[#allocation36_spill] sm:$0xff] }
 0x22f   : > { %v6197_v51 = vpop.eup %6196  ;;  %v5705_v20 = vmul.f32 -1.442695, %v2983_v25  ;;  %v3516_v58 = vadd.f32 %v3496_v18, %v10837_v8  ;;  %v3176_v46 = vmul.f32 %v3156_v23, %v10839_v22  ;;  %v3362_v49 = vadd.f32 %v8806_v36, %v10841_v48 }
 0x230   : > { %v3138_v29 = vmul.f32 %v3118_v7, %v10840_v38  ;;  %v3119_v6 = vsub.f32 1.0, %v6197_v51  ;;  %v6199_v13 = vpop.eup %6198  ;;  %v3517_v25 = vadd.f32 %v3497_v40, %v10837_v8  ;;  %v3518_v34 = vadd.f32 %v3498_v28, %v10842_v37  ;;  %v8951_v7 = vpop.f32.mrf.mxu1  ;;  %v10843_v40 = vld [vmem:[#allocation46_spill] sm:$0xff] }
 0x231   : > { %6204 = vpow2.f32 %v5705_v20  ;;  %v5720_v0 = vmul.f32 -1.442695, %v3516_v58  ;;  %v3195_v18 = vmul.f32 %v3175_v60, %v8000_v56  ;;  %v3177_v54 = vmul.f32 %v3157_v50, %v8761_v62  ;;  %v10846_v62 = vld [vmem:[#allocation72_spill] sm:$0xff] }
 0x232   : > { %v3158_v23 = vadd.f32 %v6195_v10, %v3138_v29  ;;  %v3061_v22 = vadd.f32 1.0, %v6199_v13  ;;  %v6201_v57 = vpop.eup %6200  ;;  %v3139_v36 = vmul.f32 %v3119_v6, %v10840_v38  ;;  %v5721_v20 = vmul.f32 -1.442695, %v3517_v25  ;;  %v10847_v10 = vld [vmem:[#allocation75_spill] sm:$0xff]  ;;  %v8964_v29 = vpop.f32.mrf.mxu0  ;;  %v10849_v25 = vld [vmem:[#allocation8_spill] sm:$0xff] }
 0x233   : > { %6206 = vpow2.f32 %v5720_v0  ;;  %v5722_v58 = vmul.f32 -1.442695, %v3518_v34  ;;  %v3208_v48 = vadd.f32 %v3207_v42, %v3194_v55  ;;  %v3196_v8 = vmul.f32 %v3176_v46, %v10843_v40  ;;  %v10848_v46 = vld [vmem:[#allocation23_spill] sm:$0xff]  ;;  %v8969_v55 = vpop.f32.mrf.mxu1 }
 0x234   : > { %v3178_v28 = vmul.f32 %v3158_v23, %v8772_v11  ;;  %v3363_v60 = vadd.f32 %v10845_v17, %v10844_v33  ;;  %v3120_v56 = vsub.f32 1.0, %v6201_v57  ;;  %6208 = vrcp.f32 %v3061_v22  ;;  %v10850_v23 = vld [vmem:[#allocation27_spill] sm:$0xff] }
 0x235   : > { %v8959_v13 = vadd.f32 %v10846_v62, %v3361_v3  ;;  %v8962_v50 = vadd.f32 %v10847_v10, %v3362_v49  ;;  %v3223_v0 = vadd.f32 %v3222_v26, %v3195_v18  ;;  %v3197_v42 = vmul.f32 %v3177_v54, %v10843_v40  ;;  %v10851_v54 = vld [vmem:[#allocation26_spill] sm:$0xff]  ;;  %v10887_v33 = vld [vmem:[#allocation55_spill] sm:$0xff] }
 0x236   : > { %6210 = vpow2.f32 %v5721_v20  ;;  %v3364_v11 = vadd.f32 %v8833_v27, %v10848_v46  ;;  %v3159_v6 = vadd.f32 %v6197_v51, %v3139_v36  ;;  %v3209_v34 = vadd.f32 %v3208_v48, %v3196_v8  ;;  %v10852_v20 = vld [vmem:[#allocation88_spill] sm:$0xff]  ;;  %v10853_v10 = vld [vmem:[#allocation18_spill] sm:$0xff]  ;;  %v10854_v8 = vld [vmem:[#allocation29_spill] sm:$0xff] }
 0x237   : > { %v6203_v17 = vpop.eup %6202  ;;  %6212 = vpow2.f32 %v5722_v58  ;;  %v3499_v3 = vmul.f32 %v8959_v13, %v10838_v24  ;;  %v3500_v49 = vmul.f32 %v8962_v50, %v10849_v25  ;;  %v3198_v26 = vmul.f32 %v3178_v28, %v10850_v23  ;;  %v8984_v58 = vpop.f32.mrf.mxu0  ;;  %v10865_v46 = vld [vmem:[#allocation32_spill] sm:$0xff] }
 0x238   : > { %v3062_v18 = vadd.f32 1.0, %v6203_v17  ;;  %v3365_v22 = vadd.f32 %v8848_v15, %v10851_v54  ;;  %v3140_v27 = vmul.f32 %v3120_v56, %v10852_v20  ;;  %v8982_v36 = vadd.f32 %v8826_v35, %v3363_v60  ;;  %v8993_v15 = vpop.f32.mrf.mxu1  ;;  %v10855_v56 = vld [vmem:[#allocation16_spill] sm:$0xff] }
 0x239   : > { %v3519_v62 = vadd.f32 %v3499_v3, %v10842_v37  ;;  %v3520_v51 = vadd.f32 %v3500_v49, %v10853_v10  ;;  %v8986_v40 = vadd.f32 %v3223_v0, %v3197_v42  ;;  %v3366_v48 = vadd.f32 %v8861_v14, %v10854_v8  ;;  %v10856_v0 = vld [vmem:[#allocation33_spill] sm:$0xff]  ;;  %v10861_v8 = vld [vmem:[#allocation38_spill] sm:$0xff] }
 0x23a   : > { %6214 = vrcp.f32 %v3062_v18  ;;  %v8991_v28 = vadd.f32 %v8845_v47, %v3364_v11  ;;  %v3179_v17 = vmul.f32 %v3159_v6, %v10855_v56  ;;  %v3501_v35 = vmul.f32 %v8982_v36, %v10849_v25  ;;  %v10857_v18 = vld [vmem:[#allocation9_spill] sm:$0xff]  ;;  %v10859_v56 = vld [vmem:[#allocation19_spill] sm:$0xff] }
 0x23b   : > { %v5723_v3 = vmul.f32 -1.442695, %v3519_v62  ;;  %v5724_v49 = vmul.f32 -1.442695, %v3520_v51  ;;  %v8998_v60 = vadd.f32 %v3209_v34, %v3198_v26  ;;  %v3367_v42 = vadd.f32 %v8879_v61, %v10856_v0  ;;  %v9011_v51 = vpop.f32.mrf.mxu0  ;;  %v10858_v26 = vld [vmem:[#allocation34_spill] sm:$0xff] }
 0x23c   : > { %v3502_v14 = vmul.f32 %v8991_v28, %v10857_v18  ;;  %v9005_v47 = vadd.f32 %v8857_v30, %v3365_v22  ;;  %v3160_v11 = vadd.f32 %v6201_v57, %v3140_v27  ;;  %v3521_v6 = vadd.f32 %v3501_v35, %v10853_v10  ;;  %v9018_v22 = vpop.f32.mrf.mxu1 }
 0x23d   : > { %6216 = vpow2.f32 %v5723_v3  ;;  %v9009_v62 = vadd.f32 %v8871_v63, %v3366_v48  ;;  %v3368_v61 = vadd.f32 %v8892_v21, %v10858_v26  ;;  %v10860_v3 = vld [vmem:[#allocation10_spill] sm:$0xff]  ;;  %v9023_v48 = vadd.f32 %v8888_v44, %v3367_v42  ;;  %v9034_v54 = vpop.f32.mrf.mxu0 }
 0x23e   : > { %v6205_v34 = vpop.eup %6204  ;;  %6218 = vpow2.f32 %v5724_v49  ;;  %v3522_v0 = vadd.f32 %v3502_v14, %v10859_v56  ;;  %v3503_v30 = vmul.f32 %v9005_v47, %v10857_v18  ;;  %v5725_v27 = vmul.f32 -1.442695, %v3521_v6  ;;  %v10863_v42 = vld [vmem:[#allocation30_spill] sm:$0xff] }
 0x23f   : > { %v3063_v57 = vadd.f32 1.0, %v6205_v34  ;;  %v3504_v63 = vmul.f32 %v9009_v62, %v10860_v3  ;;  %v3369_v21 = vadd.f32 %v8909_v41, %v10861_v8  ;;  %v9029_v26 = vadd.f32 %v8907_v52, %v3368_v61  ;;  %v10862_v34 = vld [vmem:[#allocation25_spill] sm:$0xff]  ;;  %v10864_v8 = vld [vmem:[#allocation24_spill] sm:$0xff]  ;;  %v9040_v52 = vpop.f32.mrf.mxu1  ;;  %v9048_v37 = vpop.f32.mrf.mxu0 }
 0x240   : > { %v6207_v35 = vpop.eup %6206  ;;  %v5726_v49 = vmul.f32 -1.442695, %v3522_v0  ;;  %v3523_v14 = vadd.f32 %v3503_v30, %v10859_v56  ;;  %v3505_v10 = vmul.f32 %v9023_v48, %v10860_v3  ;;  %v3370_v41 = vadd.f32 %v8934_v12, %v10863_v42 }
 0x241   : > { %6220 = vrcp.f32 %v3063_v57  ;;  %v3596_v18 = vadd.f32 1.0, %v6207_v35  ;;  %v3524_v6 = vadd.f32 %v3504_v63, %v10862_v34  ;;  %v6209_v44 = vpop.eup %6208  ;;  %v3506_v30 = vmul.f32 %v9029_v26, %v10864_v8 }
 0x242   : > { %6222 = vpow2.f32 %v5725_v27  ;;  %v5727_v0 = vmul.f32 -1.442695, %v3523_v14  ;;  %v3121_v57 = vsub.f32 1.0, %v6209_v44  ;;  %v3525_v35 = vadd.f32 %v3505_v10, %v10862_v34  ;;  %v10876_v34 = vld [vmem:[#allocation42_spill] sm:$0xff] }
 0x243   : > { %v6211_v61 = vpop.eup %6210  ;;  %6224 = vrcp.f32 %v3596_v18  ;;  %v5728_v63 = vmul.f32 -1.442695, %v3524_v6  ;;  %v3526_v27 = vadd.f32 %v3506_v30, %v10865_v46  ;;  %v9045_v14 = vadd.f32 %v8929_v16, %v3369_v21  ;;  %v10866_v18 = vld [vmem:[#allocation35_spill] sm:$0xff]  ;;  %v10867_v21 = vld [vmem:[#allocation41_spill] sm:$0xff] }
 0x244   : > { %v6213_v3 = vpop.eup %6212  ;;  %v3597_v56 = vadd.f32 1.0, %v6211_v61  ;;  %6226 = vpow2.f32 %v5726_v49  ;;  %v3141_v12 = vmul.f32 %v3121_v57, %v10852_v20  ;;  %v5729_v25 = vmul.f32 -1.442695, %v3525_v35  ;;  %v9054_v61 = vpop.f32.mrf.mxu1 }
 0x245   : > { %v3598_v42 = vadd.f32 1.0, %v6213_v3  ;;  %6228 = vpow2.f32 %v5727_v0  ;;  %v3371_v6 = vadd.f32 %v8951_v7, %v10866_v18  ;;  %v5730_v10 = vmul.f32 -1.442695, %v3526_v27  ;;  %v10869_v27 = vld [vmem:[#allocation37_spill] sm:$0xff] }
 0x246   : > { %6230 = vrcp.f32 %v3597_v56  ;;  %v3507_v49 = vmul.f32 %v9045_v14, %v10864_v8  ;;  %v3199_v16 = vmul.f32 %v3179_v17, %v10850_v23  ;;  %v3180_v57 = vmul.f32 %v3160_v11, %v10867_v21  ;;  %v10870_v8 = vld [vmem:[#allocation31_spill] sm:$0xff]  ;;  %v9069_v11 = vpop.f32.mrf.mxu0 }
 0x247   : > { %v6215_v30 = vpop.eup %6214  ;;  %6232 = vrcp.f32 %v3598_v42  ;;  %v9059_v3 = vadd.f32 %v8947_v5, %v3370_v41  ;;  %v9063_v7 = vadd.f32 %v8964_v29, %v3371_v6  ;;  %v3161_v35 = vadd.f32 %v6209_v44, %v3141_v12  ;;  %v10871_v5 = vld [vmem:[#allocation47_spill] sm:$0xff]  ;;  %v9074_v29 = vpop.f32.mrf.mxu1 }
 0x248   : > { %v3122_v0 = vsub.f32 1.0, %v6215_v30  ;;  %6234 = vpow2.f32 %v5728_v63  ;;  %v3527_v56 = vadd.f32 %v3507_v49, %v10865_v46  ;;  %v3372_v18 = vadd.f32 %v8969_v55, %v10869_v27  ;;  %v10873_v55 = vld [vmem:[#allocation43_spill] sm:$0xff] }
 0x249   : > { %10868 = vst [vmem:[#allocation17_spill] sm:$0xff] %v9063_v7  ;;  %6236 = vpow2.f32 %v5729_v25  ;;  %v3508_v17 = vmul.f32 %v9059_v3, %v10870_v8  ;;  %v3509_v49 = vmul.f32 %v9063_v7, %v10870_v8  ;;  %v10872_v25 = vld [vmem:[#allocation86_spill] sm:$0xff] }
 0x24a   : > { %v6217_v42 = vpop.eup %6216  ;;  %v3142_v41 = vmul.f32 %v3122_v0, %v10871_v5  ;;  %6238 = vpow2.f32 %v5730_v10  ;;  %v5731_v63 = vmul.f32 -1.442695, %v3527_v56  ;;  %v3200_v12 = vmul.f32 %v3180_v57, %v10872_v25  ;;  %v10875_v0 = vld [vmem:[#allocation40_spill] sm:$0xff]  ;;  %v9086_v57 = vpop.f32.mrf.mxu0 }
 0x24b   : > { %v6219_v44 = vpop.eup %6218  ;;  %v3599_v6 = vadd.f32 1.0, %v6217_v42  ;;  %v3528_v21 = vadd.f32 %v3508_v17, %v10873_v55  ;;  %v9079_v23 = vadd.f32 %v8984_v58, %v3372_v18  ;;  %v3529_v10 = vadd.f32 %v3509_v49, %v10873_v55  ;;  %v10877_v49 = vld [vmem:[#allocation49_spill] sm:$0xff]  ;;  %v10879_v55 = vld [vmem:[#allocation78_spill] sm:$0xff] }
 0x24c   : > { %v3162_v27 = vadd.f32 %v6215_v30, %v3142_v41  ;;  %v3600_v46 = vadd.f32 1.0, %v6219_v44  ;;  %6240 = vpow2.f32 %v5731_v63  ;;  %v3373_v56 = vadd.f32 %v8993_v15, %v10875_v0  ;;  %v9090_v30 = vpop.f32.mrf.mxu1 }
 0x24d   : > { %10874 = vst [vmem:[#allocation28_spill] sm:$0xff] %v9079_v23  ;;  %6242 = vrcp.f32 %v3599_v6  ;;  %v5732_v8 = vmul.f32 -1.442695, %v3528_v21  ;;  %v3510_v20 = vmul.f32 %v9079_v23, %v10876_v34  ;;  %v3181_v17 = vmul.f32 %v3161_v35, %v8818_v31 }
 0x24e   : > { %v6221_v42 = vpop.eup %6220  ;;  %v3182_v58 = vmul.f32 %v3162_v27, %v8877_v53  ;;  %6244 = vrcp.f32 %v3600_v46  ;;  %v5733_v18 = vmul.f32 -1.442695, %v3529_v10  ;;  %v9094_v44 = vadd.f32 %v9011_v51, %v3373_v56 }
 0x24f   : > { %v6223_v41 = vpop.eup %6222  ;;  %v3123_v63 = vsub.f32 1.0, %v6221_v42  ;;  %6246 = vpow2.f32 %v5732_v8  ;;  %v3530_v15 = vadd.f32 %v3510_v20, %v10877_v49  ;;  %v3211_v21 = vadd.f32 %v8998_v60, %v3200_v12  ;;  %v9104_v8 = vpop.f32.mrf.mxu0 }
 0x250   : > { %10878 = vst [vmem:[#allocation50_spill] sm:$0xff] %v9094_v44  ;;  %v9096_v6 = vpop.eup %6224  ;;  %v3202_v31 = vmul.f32 %v3182_v58, %v10879_v55  ;;  %v3601_v35 = vadd.f32 1.0, %v6223_v41  ;;  %6248 = vpow2.f32 %v5733_v18  ;;  %v3225_v46 = vadd.f32 %v8986_v40, %v3199_v16  ;;  %v9107_v12 = vpop.f32.mrf.mxu1 }
 0x251   : > { %v6227_v53 = vpop.eup %6226  ;;  %v3143_v27 = vmul.f32 %v3123_v63, %v10871_v5  ;;  %v5734_v10 = vmul.f32 -1.442695, %v3530_v15  ;;  %v3511_v20 = vmul.f32 %v9094_v44, %v10876_v34  ;;  %v3201_v56 = vmul.f32 %v3181_v17, %v10872_v25  ;;  %v10880_v15 = vld [vmem:[#allocation44_spill] sm:$0xff] }
 0x252   : > { %v6229_v51 = vpop.eup %6228  ;;  %v3212_v0 = vadd.f32 %v3211_v21, %v3202_v31  ;;  %6250 = vrcp.f32 %v3601_v35  ;;  %v3602_v60 = vadd.f32 1.0, %v6227_v53  ;;  %v3656_v40 = vsub.f32 1.0, %v9096_v6  ;;  %v9114_v35 = vpop.f32.mrf.mxu0 }
 0x253   : > { %v6231_v58 = vpop.eup %6230  ;;  %v3163_v18 = vadd.f32 %v6221_v42, %v3143_v27  ;;  %v3603_v16 = vadd.f32 1.0, %v6229_v51  ;;  %6252 = vpow2.f32 %v5734_v10  ;;  %v3374_v5 = vadd.f32 %v9018_v22, %v10880_v15 }
 0x254   : > { %v6233_v41 = vpop.eup %6232  ;;  %v3213_v63 = vrot.slane %v3212_v0, 4  ;;  %6254 = vrcp.f32 %v3602_v60  ;;  %v3531_v34 = vadd.f32 %v3511_v20, %v10877_v49  ;;  %v3657_v31 = vsub.f32 1.0, %v6231_v58  ;;  %v9119_v60 = vpop.f32.mrf.mxu1  ;;  %v10882_v20 = vld [vmem:[#allocation61_spill] sm:$0xff] }
 0x255   : > { %v6235_v17 = vpop.eup %6234  ;;  %v3183_v21 = vmul.f32 %v3163_v18, %v8900_v1  ;;  %6256 = vrcp.f32 %v3603_v16  ;;  %v3226_v53 = vadd.f32 %v3225_v46, %v3201_v56  ;;  %v9117_v10 = vadd.f32 %v9034_v54, %v3374_v5  ;;  %v9124_v54 = vpop.f32.mrf.mxu0 }
 0x256   : > { %v6237_v42 = vpop.eup %6236  ;;  %v3214_v27 = vadd.f32 %v3213_v63, %v3212_v0  ;;  %v3604_v51 = vadd.f32 1.0, %v6235_v17  ;;  %v3676_v15 = vmul.f32 %v3656_v40, %v10882_v20  ;;  %v5735_v1 = vmul.f32 -1.442695, %v3531_v34  ;;  %10883 = vst [vmem:[#allocation84_spill] sm:$0xff] %v9124_v54  ;;  %v10884_v17 = vld [vmem:[#allocation48_spill] sm:$0xff] }
 0x257   : > { %10881 = vst [vmem:[#allocation4_spill] sm:$0xff] %v9117_v10  ;;  %v6239_v25 = vpop.eup %6238  ;;  %v3203_v22 = vmul.f32 %v3183_v21, %v10879_v55  ;;  %v3605_v49 = vadd.f32 1.0, %v6237_v42  ;;  %v3658_v16 = vsub.f32 1.0, %v6233_v41  ;;  %v3677_v0 = vmul.f32 %v3657_v31, %v10882_v20  ;;  %v9128_v21 = vpop.f32.mrf.mxu1 }
 0x258   : > { %v3215_v18 = vrot.slane %v3214_v27, 2  ;;  %6258 = vrcp.f32 %v3604_v51  ;;  %v3606_v44 = vadd.f32 1.0, %v6239_v25  ;;  %v3512_v40 = vmul.f32 %v9117_v10, %v10884_v17  ;;  %10885 = vst [vmem:[#allocation79_spill] sm:$0xff] %v9128_v21 }
 0x259   : > { %v6241_v23 = vpop.eup %6240  ;;  %v3227_v46 = vadd.f32 %v3226_v53, %v3203_v22  ;;  %6260 = vrcp.f32 %v3605_v49  ;;  %v3696_v53 = vadd.f32 %v9096_v6, %v3676_v15  ;;  %v3678_v49 = vmul.f32 %v3658_v16, %v10820_v19  ;;  %v10889_v15 = vld [vmem:[#allocation67_spill] sm:$0xff] }
 0x25a   : > { %v6243_v5 = vpop.eup %6242  ;;  %v3216_v56 = vadd.f32 %v3215_v18, %v3214_v27  ;;  %6262 = vrcp.f32 %v3606_v44  ;;  %v3607_v63 = vadd.f32 1.0, %v6241_v23  ;;  %v3697_v44 = vadd.f32 %v6231_v58, %v3677_v0  ;;  %v9132_v18 = vpop.f32.mrf.mxu0 }
 0x25b   : > { %v6245_v34 = vpop.eup %6244  ;;  %v3228_v42 = vrot.slane %v3227_v46, 4  ;;  %v3659_v51 = vsub.f32 1.0, %v6243_v5  ;;  %6264 = vpow2.f32 %v5735_v1  ;;  %10886 = vst [vmem:[#allocation82_spill] sm:$0xff] %v9132_v18  ;;  %v3532_v24 = vadd.f32 %v3512_v40, %v10887_v33  ;;  %v9136_v1 = vpop.f32.mrf.mxu1 }
 0x25c   : > { %v6247_v25 = vpop.eup %6246  ;;  %v3660_v31 = vsub.f32 1.0, %v6245_v34  ;;  %6266 = vrcp.f32 %v3607_v63  ;;  %v3217_v20 = vrot.slane %v3216_v56, 1  ;;  %10888 = vst [vmem:[#allocation5_spill] sm:$0xff] %v9136_v1  ;;  %v3698_v58 = vadd.f32 %v6233_v41, %v3678_v49  ;;  %v9141_v40 = vpop.f32.mrf.mxu0 }
 0x25d   : > { %v6249_v22 = vpop.eup %6248  ;;  %v3229_v27 = vadd.f32 %v3228_v42, %v3227_v46  ;;  %v3608_v23 = vadd.f32 1.0, %v6247_v25  ;;  %v3679_v55 = vmul.f32 %v3659_v51, %v10820_v19  ;;  %v3716_v46 = vmul.f32 %v3696_v53, %v8916_v39  ;;  %v9144_v7 = vpop.f32.mrf.mxu1 }
 0x25e   : > { %v3609_v10 = vadd.f32 1.0, %v6249_v22  ;;  %v3680_v16 = vmul.f32 %v3660_v31, %v10889_v15  ;;  %v3717_v51 = vmul.f32 %v3697_v44, %v8921_v43  ;;  %v5736_v19 = vmul.f32 -1.442695, %v3532_v24 }
 0x25f   : > { %v6251_v21 = vpop.eup %6250  ;;  %v3230_v6 = vrot.slane %v3229_v27, 2  ;;  %6268 = vrcp.f32 %v3608_v23  ;;  %v3218_v1 = vadd.f32 %v3217_v20, %v3216_v56  ;;  %v3699_v54 = vadd.f32 %v6243_v5, %v3679_v55 }
 0x260   : > { %v6253_v63 = vpop.eup %6252  ;;  %v3661_v0 = vsub.f32 1.0, %v6251_v21  ;;  %6270 = vrcp.f32 %v3609_v10  ;;  %v3700_v41 = vadd.f32 %v6245_v34, %v3680_v16  ;;  %v10890_v10 = vld [vmem:[#allocation45_spill] sm:$0xff]  ;;  %v3718_v24 = vmul.f32 %v3698_v58, %v8927_v59  ;;  %v10892_v16 = vld [vmem:[#allocation83_spill] sm:$0xff]  ;;  %v9157_v59 = vpop.f32.mrf.mxu1 }
 0x261   : > { %v6255_v42 = vpop.eup %6254  ;;  %v3231_v25 = vadd.f32 %v3230_v6, %v3229_v27  ;;  %v3610_v22 = vadd.f32 1.0, %v6253_v63  ;;  %v3375_v49 = vadd.f32 %v9040_v52, %v10890_v10  ;;  %v10891_v27 = vld [vmem:[#allocation73_spill] sm:$0xff]  ;;  %6272 = vpow2.f32 %v5736_v19  ;;  %v9152_v6 = vpop.f32.mrf.mxu0 }
 0x262   : > { %v6257_v18 = vpop.eup %6256  ;;  %v3681_v31 = vmul.f32 %v3661_v0, %v10889_v15  ;;  %v3662_v23 = vsub.f32 1.0, %v6255_v42  ;;  %v3736_v43 = vmul.f32 %v3716_v46, %v10891_v27  ;;  %v3234_v63 = vadd.f32 %v3218_v1, %v10892_v16 }
 0x263   : > { %v3232_v39 = vrot.slane %v3231_v25, 1  ;;  %v3663_v53 = vsub.f32 1.0, %v6257_v18  ;;  %6274 = vrcp.f32 %v3610_v22  ;;  %v3737_v52 = vmul.f32 %v3717_v51, %v10891_v27 }
 0x264   : > { %v3682_v44 = vmul.f32 %v3662_v23, %v10752_v9  ;;  %v3701_v5 = vadd.f32 %v6251_v21, %v3681_v31  ;;  %v3719_v46 = vmul.f32 %v3699_v54, %v8959_v13  ;;  %v3720_v21 = vmul.f32 %v3700_v41, %v8962_v50 }
 0x265   : > { %v6259_v20 = vpop.eup %6258  ;;  %v3233_v55 = vadd.f32 %v3232_v39, %v3231_v25  ;;  %v3683_v56 = vmul.f32 %v3663_v53, %v10752_v9  ;;  %v9162_v22 = vadd.f32 %v9048_v37, %v3375_v49  ;;  %v3738_v50 = vmul.f32 %v3718_v24, %v10824_v45  ;;  %v10893_v49 = vld [vmem:[#allocation39_spill] sm:$0xff] }
 0x266   : > { %v6261_v34 = vpop.eup %6260  ;;  %v3664_v0 = vsub.f32 1.0, %v6259_v20  ;;  %v3702_v23 = vadd.f32 %v6255_v42, %v3682_v44  ;;  %v3721_v54 = vmul.f32 %v3701_v5, %v8982_v36  ;;  %v3739_v37 = vmul.f32 %v3719_v46, %v10824_v45 }
 0x267   : > { %v6263_v58 = vpop.eup %6262  ;;  %v3235_v19 = vadd.f32 %v3233_v55, %v10892_v16  ;;  %v3665_v25 = vsub.f32 1.0, %v6261_v34  ;;  %v3703_v39 = vadd.f32 %v6257_v18, %v3683_v56  ;;  %v9167_v55 = vpop.f32.mrf.mxu0  ;;  %v3513_v36 = vmul.f32 %v9162_v22, %v10884_v17 }
 0x268   : > { %v6265_v31 = vpop.eup %6264  ;;  %v3684_v1 = vmul.f32 %v3664_v0, %v10825_v32  ;;  %v3666_v51 = vsub.f32 1.0, %v6263_v58  ;;  %v9172_v18 = vpop.f32.mrf.mxu1  ;;  %v3722_v0 = vmul.f32 %v3702_v23, %v8991_v28  ;;  %v10894_v28 = vld [vmem:[#allocation51_spill] sm:$0xff]  ;;  %v3756_v23 = vadd.f32 %v3738_v50, %v3736_v43 }
 0x269   : > { %v6267_v53 = vpop.eup %6266  ;;  %v3238_v13 = vcombine.low %v3234_v63, %v3235_v19  ;;  %v3685_v27 = vmul.f32 %v3665_v25, %v10825_v32  ;;  %v3611_v9 = vadd.f32 1.0, %v6265_v31  ;;  %v3723_v24 = vmul.f32 %v3703_v39, %v9005_v47 }
 0x26a   : > { %v3704_v41 = vadd.f32 %v6259_v20, %v3684_v1  ;;  %v3686_v42 = vmul.f32 %v3666_v51, %v10826_v4  ;;  %v3667_v63 = vsub.f32 1.0, %v6267_v53  ;;  %v3740_v25 = vmul.f32 %v3720_v21, %v10827_v2 }
 0x26b   : > { %v3245_v44 = vrot.slane %v3238_v13, %v10893_v49  ;;  %v3705_v56 = vadd.f32 %v6261_v34, %v3685_v27  ;;  %6276 = vrcp.f32 %v3611_v9  ;;  %v3741_v31 = vmul.f32 %v3721_v54, %v10827_v2  ;;  %v9183_v34 = vpop.f32.mrf.mxu0 }
 0x26c   : > { %v6269_v5 = vpop.eup %6268  ;;  %v3706_v19 = vadd.f32 %v6263_v58, %v3686_v42  ;;  %v3687_v27 = vmul.f32 %v3667_v63, %v10826_v4  ;;  %v3724_v1 = vmul.f32 %v3704_v41, %v9009_v62  ;;  %v3376_v47 = vadd.f32 %v9054_v61, %v10894_v28  ;;  %v9188_v58 = vpop.f32.mrf.mxu1  ;;  %v10896_v42 = vld [vmem:[#allocation81_spill] sm:$0xff] }
 0x26d   : > { %v6271_v20 = vpop.eup %6270  ;;  %v3252_v46 = vrot.slane %v3245_v44, %v10893_v49  ;;  %v3668_v51 = vsub.f32 1.0, %v6269_v5  ;;  %v3771_v21 = vadd.f32 %v3739_v37, %v3737_v52  ;;  %v3725_v39 = vmul.f32 %v3705_v56, %v9023_v48  ;;  %v10897_v49 = vld [vmem:[#allocation58_spill] sm:$0xff]  ;;  %v9200_v43 = vpop.f32.mrf.mxu0  ;;  %v10898_v48 = vld [vmem:[#allocation87_spill] sm:$0xff]  ;;  %v10899_v37 = vld [vmem:[#allocation80_spill] sm:$0xff] }
 0x26e   : > { %v3669_v13 = vsub.f32 1.0, %v6271_v20  ;;  %v3533_v54 = vadd.f32 %v3513_v36, %v10887_v33  ;;  %v3742_v44 = vmul.f32 %v3722_v0, %v10896_v42  ;;  %v3743_v62 = vmul.f32 %v3723_v24, %v10896_v42  ;;  %v6273_v2 = vpop.eup %6272  ;;  %v9205_v24 = vpop.f32.mrf.mxu1 }
 0x26f   : > { %5706 = vst.msk [vmem:[%s8545_s19 + $0x3] ss:$8 sm:$0x3] %vm8550_vm2, %v3252_v46  ;;  %v3726_v41 = vmul.f32 %v3706_v19, %v9029_v26  ;;  %v3707_v63 = vadd.f32 %v6267_v53, %v3687_v27  ;;  %v3757_v61 = vadd.f32 %v3756_v23, %v3740_v25  ;;  %v3772_v4 = vadd.f32 %v3771_v21, %v3741_v31  ;;  %v10900_v53 = vld [vmem:[#allocation11_spill] sm:$0xff]  ;;  %v10901_v27 = vld [vmem:[#allocation68_spill] sm:$0xff]  ;;  %v10903_v21 = vld [vmem:[#allocation54_spill] sm:$0xff] }
 0x270   : > { %v3377_v9 = vadd.f32 %v9074_v29, %v10897_v49  ;;  %v5737_v46 = vmul.f32 -1.442695, %v3533_v54  ;;  %v6275_v52 = vpop.eup %6274  ;;  %v3744_v50 = vmul.f32 %v3724_v1, %v10898_v48  ;;  %v3688_v56 = vmul.f32 %v3668_v51, %v10899_v37 }
 0x271   : > { %v3689_v36 = vmul.f32 %v3669_v13, %v10899_v37  ;;  %v3612_v0 = vadd.f32 1.0, %v6273_v2  ;;  %v3745_v26 = vmul.f32 %v3725_v39, %v10898_v48  ;;  %v3910_v19 = vadd.f32 %v9090_v30, %v10900_v53  ;;  %v10902_v13 = vld [vmem:[#allocation12_spill] sm:$0xff]  ;;  %v9222_v30 = vpop.f32.mrf.mxu0  ;;  %v10917_v48 = vld [vmem:[#allocation14_spill] sm:$0xff] }
 0x272   : > { %6278 = vpow2.f32 %v5737_v46  ;;  %v9211_v29 = vadd.f32 %v9069_v11, %v3376_v47  ;;  %v3758_v25 = vadd.f32 %v3757_v61, %v3742_v44  ;;  %v3773_v31 = vadd.f32 %v3772_v4, %v3743_v62  ;;  %v9224_v4 = vpop.f32.mrf.mxu1 }
 0x273   : > { %v3746_v1 = vmul.f32 %v3726_v41, %v10901_v27  ;;  %v3727_v51 = vmul.f32 %v3707_v63, %v9045_v14  ;;  %v3670_v23 = vsub.f32 1.0, %v6275_v52  ;;  %v3911_v2 = vadd.f32 %v9107_v12, %v10902_v13  ;;  %v10904_v14 = vld [vmem:[#allocation60_spill] sm:$0xff] }
 0x274   : > { %v3514_v39 = vmul.f32 %v9211_v29, %v10903_v21  ;;  %v9220_v54 = vadd.f32 %v9086_v57, %v3377_v9  ;;  %v3759_v11 = vadd.f32 %v3758_v25, %v3744_v50  ;;  %v3708_v47 = vadd.f32 %v6269_v5, %v3688_v56  ;;  %v10905_v9 = vld [vmem:[#allocation15_spill] sm:$0xff]  ;;  %v10907_v25 = vld [vmem:[#allocation17_spill] sm:$0xff]  ;;  %v10939_v13 = vld [vmem:[#allocation32_spill] sm:$0xff] }
 0x275   : > { %v3709_v44 = vadd.f32 %v6271_v20, %v3689_v36  ;;  %6280 = vrcp.f32 %v3612_v0  ;;  %v3774_v62 = vadd.f32 %v3773_v31, %v3745_v26  ;;  %v9230_v63 = vadd.f32 %v9104_v8, %v3910_v19  ;;  %v10906_v0 = vld [vmem:[#allocation6_spill] sm:$0xff]  ;;  %v9244_v26 = vpop.f32.mrf.mxu0 }
 0x276   : > { %v3534_v41 = vadd.f32 %v3514_v39, %v10904_v14  ;;  %v3515_v12 = vmul.f32 %v9220_v54, %v10903_v21  ;;  %v9232_v61 = vadd.f32 %v3759_v11, %v3746_v1  ;;  %v3747_v57 = vmul.f32 %v3727_v51, %v10901_v27  ;;  %v9253_v51 = vpop.f32.mrf.mxu1  ;;  %v10910_v39 = vld [vmem:[#allocation79_spill] sm:$0xff] }
 0x277   : > { %v3912_v5 = vadd.f32 %v9119_v60, %v10905_v9  ;;  %v9238_v20 = vadd.f32 %v9114_v35, %v3911_v2  ;;  %v3690_v50 = vmul.f32 %v3670_v23, %v10840_v38  ;;  %v4048_v8 = vmul.f32 %v9230_v63, %v10906_v0  ;;  %v10908_v35 = vld [vmem:[#allocation84_spill] sm:$0xff]  ;;  %v10912_v9 = vld [vmem:[#allocation21_spill] sm:$0xff] }
 0x278   : > { %v6277_v46 = vpop.eup %6276  ;;  %v5738_v56 = vmul.f32 -1.442695, %v3534_v41  ;;  %v3535_v36 = vadd.f32 %v3515_v12, %v10904_v14  ;;  %v3728_v19 = vmul.f32 %v3708_v47, %v9059_v3  ;;  %v3729_v31 = vmul.f32 %v3709_v44, %v10907_v25  ;;  %v10909_v2 = vld [vmem:[#allocation20_spill] sm:$0xff]  ;;  %v10911_v41 = vld [vmem:[#allocation13_spill] sm:$0xff]  ;;  %v10914_v25 = vld [vmem:[#allocation7_spill] sm:$0xff] }
 0x279   : > { %v4049_v60 = vmul.f32 %v9238_v20, %v10906_v0  ;;  %v9251_v1 = vadd.f32 %v10908_v35, %v3912_v5  ;;  %v3913_v11 = vadd.f32 %v10910_v39, %v10909_v2  ;;  %v4068_v12 = vadd.f32 %v4048_v8, %v10911_v41  ;;  %v10913_v3 = vld [vmem:[#allocation5_spill] sm:$0xff]  ;;  %v10915_v35 = vld [vmem:[#allocation22_spill] sm:$0xff]  ;;  %v9268_v39 = vpop.f32.mrf.mxu0 }
 0x27a   : > { %6282 = vpow2.f32 %v5738_v56  ;;  %v5739_v23 = vmul.f32 -1.442695, %v3535_v36  ;;  %v3671_v27 = vsub.f32 1.0, %v6277_v46  ;;  %v3914_v47 = vadd.f32 %v10913_v3, %v10912_v9  ;;  %v10916_v36 = vld [vmem:[#allocation82_spill] sm:$0xff] }
 0x27b   : > { %v4069_v44 = vadd.f32 %v4049_v60, %v10911_v41  ;;  %v4050_v0 = vmul.f32 %v9251_v1, %v10914_v25  ;;  %v5754_v5 = vmul.f32 -1.442695, %v4068_v12  ;;  %v3915_v56 = vadd.f32 %v9144_v7, %v10915_v35  ;;  %v9276_v41 = vpop.f32.mrf.mxu1 }
 0x27c   : > { %6284 = vpow2.f32 %v5739_v23  ;;  %v9266_v37 = vadd.f32 %v10916_v36, %v3913_v11  ;;  %v9270_v8 = vadd.f32 %v3774_v62, %v3747_v57  ;;  %v9274_v60 = vadd.f32 %v9141_v40, %v3914_v47  ;;  %v10919_v47 = vld [vmem:[#allocation23_spill] sm:$0xff] }
 0x27d   : > { %v5755_v2 = vmul.f32 -1.442695, %v4069_v44  ;;  %v4070_v3 = vadd.f32 %v4050_v0, %v10917_v48  ;;  %v3710_v23 = vadd.f32 %v6275_v52, %v3690_v50  ;;  %6286 = vpow2.f32 %v5754_v5  ;;  %v10918_v44 = vld [vmem:[#allocation8_spill] sm:$0xff]  ;;  %v9291_v5 = vpop.f32.mrf.mxu0 }
 0x27e   : > { %v4051_v7 = vmul.f32 %v9266_v37, %v10914_v25  ;;  %v9281_v11 = vadd.f32 %v9152_v6, %v3915_v56  ;;  %v3691_v62 = vmul.f32 %v3671_v27, %v10840_v38  ;;  %v4052_v0 = vmul.f32 %v9274_v60, %v10918_v44  ;;  %v10920_v6 = vld [vmem:[#allocation46_spill] sm:$0xff] }
 0x27f   : > { %v6279_v12 = vpop.eup %6278  ;;  %6288 = vpow2.f32 %v5755_v2  ;;  %v5756_v57 = vmul.f32 -1.442695, %v4070_v3  ;;  %v3916_v36 = vadd.f32 %v9157_v59, %v10919_v47  ;;  %v9294_v56 = vmul.f32 %v3728_v19, %v10920_v6  ;;  %v10921_v27 = vld [vmem:[#allocation26_spill] sm:$0xff] }
 0x280   : > { %v3613_v40 = vadd.f32 1.0, %v6279_v12  ;;  %v4071_v52 = vadd.f32 %v4051_v7, %v10917_v48  ;;  %v4053_v50 = vmul.f32 %v9281_v11, %v10918_v44  ;;  %v3917_v2 = vadd.f32 %v9172_v18, %v10921_v27  ;;  %v10922_v3 = vld [vmem:[#allocation18_spill] sm:$0xff]  ;;  %v3893_v12 = vpop.f32.mrf.mxu1  ;;  %v10924_v27 = vld [vmem:[#allocation9_spill] sm:$0xff] }
 0x281   : > { %6290 = vpow2.f32 %v5756_v57  ;;  %v4072_v25 = vadd.f32 %v4052_v0, %v10922_v3  ;;  %v9303_v44 = vadd.f32 %v9167_v55, %v3916_v36  ;;  %v9306_v48 = vmul.f32 %v3729_v31, %v10920_v6  ;;  %v10923_v57 = vld [vmem:[#allocation29_spill] sm:$0xff] }
 0x282   : > { %v9299_v38 = vpop.eup %6280  ;;  %6292 = vrcp.f32 %v3613_v40  ;;  %v5757_v59 = vmul.f32 -1.442695, %v4071_v52  ;;  %v4073_v7 = vadd.f32 %v4053_v50, %v10922_v3  ;;  %v3711_v19 = vadd.f32 %v6277_v46, %v3691_v62  ;;  %v4011_v52 = vpop.f32.mrf.mxu0  ;;  %v10925_v36 = vld [vmem:[#allocation33_spill] sm:$0xff]  ;;  %v10928_v50 = vld [vmem:[#allocation19_spill] sm:$0xff]  ;;  %v10935_v3 = vld [vmem:[#allocation38_spill] sm:$0xff] }
 0x283   : > { %v3918_v47 = vadd.f32 %v9188_v58, %v10923_v57  ;;  %v5758_v18 = vmul.f32 -1.442695, %v4072_v25  ;;  %v4054_v35 = vmul.f32 %v9303_v44, %v10924_v27  ;;  %v9313_v40 = vadd.f32 %v9183_v34, %v3917_v2  ;;  %v3895_v58 = vpop.f32.mrf.mxu1  ;;  %v10927_v25 = vld [vmem:[#allocation34_spill] sm:$0xff] }
 0x284   : > { %6294 = vpow2.f32 %v5757_v59  ;;  %v5759_v0 = vmul.f32 -1.442695, %v4073_v7  ;;  %v3672_v55 = vsub.f32 1.0, %v9299_v38  ;;  %v3919_v31 = vadd.f32 %v9205_v24, %v10925_v36  ;;  %v10929_v7 = vld [vmem:[#allocation28_spill] sm:$0xff]  ;;  %v10931_v24 = vld [vmem:[#allocation10_spill] sm:$0xff]  ;;  %v4013_v36 = vpop.f32.mrf.mxu0 }
 0x285   : > { %6296 = vpow2.f32 %v5758_v18  ;;  %v9319_v46 = vadd.f32 %v9200_v43, %v3918_v47  ;;  %v3920_v62 = vadd.f32 %v9224_v4, %v10927_v25  ;;  %v4074_v59 = vadd.f32 %v4054_v35, %v10928_v50  ;;  %v10930_v18 = vld [vmem:[#allocation50_spill] sm:$0xff] }
 0x286   : > { %6298 = vpow2.f32 %v5759_v0  ;;  %v4055_v34 = vmul.f32 %v9313_v40, %v10924_v27  ;;  %v9327_v6 = vmul.f32 %v3710_v23, %v10929_v7  ;;  %v9330_v57 = vmul.f32 %v3711_v19, %v10930_v18  ;;  %v10934_v23 = vld [vmem:[#allocation88_spill] sm:$0xff]  ;;  %v10936_v18 = vld [vmem:[#allocation25_spill] sm:$0xff] }
 0x287   : > { %10926 = vst [vmem:[#allocation52_spill] sm:$0xff] %v9319_v46  ;;  %v6283_v2 = vpop.eup %6282  ;;  %v4056_v43 = vmul.f32 %v9319_v46, %v10931_v24  ;;  %v9335_v47 = vadd.f32 %v9222_v30, %v3919_v31  ;;  %v5760_v4 = vmul.f32 -1.442695, %v4074_v59  ;;  %v9339_v25 = vadd.f32 %v9244_v26, %v3920_v62  ;;  %v3897_v31 = vpop.f32.mrf.mxu1 }
 0x288   : > { %v3614_v0 = vadd.f32 1.0, %v6283_v2  ;;  %v4075_v35 = vadd.f32 %v4055_v34, %v10928_v50  ;;  %v3692_v7 = vmul.f32 %v3672_v55, %v10934_v23  ;;  %v3921_v19 = vadd.f32 %v9253_v51, %v10935_v3  ;;  %v10937_v34 = vld [vmem:[#allocation24_spill] sm:$0xff]  ;;  %v10938_v50 = vld [vmem:[#allocation30_spill] sm:$0xff] }
 0x289   : > { %10932 = vst [vmem:[#allocation85_spill] sm:$0xff] %v9335_v47  ;;  %10933 = vst [vmem:[#allocation56_spill] sm:$0xff] %v9339_v25  ;;  %v6285_v27 = vpop.eup %6284  ;;  %v4076_v9 = vadd.f32 %v4056_v43, %v10936_v18  ;;  %v4057_v30 = vmul.f32 %v9335_v47, %v10931_v24  ;;  %v4058_v26 = vmul.f32 %v9339_v25, %v10937_v34  ;;  %v10940_v25 = vld [vmem:[#allocation35_spill] sm:$0xff]  ;;  %v3901_v21 = vpop.f32.mrf.mxu1 }
 0x28a   : > { %6300 = vrcp.f32 %v3614_v0  ;;  %v3615_v59 = vadd.f32 1.0, %v6285_v27  ;;  %v5761_v2 = vmul.f32 -1.442695, %v4075_v35  ;;  %v6287_v62 = vpop.eup %6286  ;;  %v3922_v55 = vadd.f32 %v9276_v41, %v10938_v50  ;;  %v4015_v27 = vpop.f32.mrf.mxu0 }
 0x28b   : > { %6302 = vpow2.f32 %v5760_v4  ;;  %v5762_v14 = vmul.f32 -1.442695, %v4076_v9  ;;  %v4077_v51 = vadd.f32 %v4057_v30, %v10936_v18  ;;  %v4148_v43 = vadd.f32 1.0, %v6287_v62  ;;  %v10941_v4 = vld [vmem:[#allocation37_spill] sm:$0xff] }
 0x28c   : > { %v6289_v3 = vpop.eup %6288  ;;  %6304 = vrcp.f32 %v3615_v59  ;;  %v4078_v24 = vadd.f32 %v4058_v26, %v10939_v13  ;;  %v9354_v0 = vadd.f32 %v9268_v39, %v3921_v19  ;;  %v3923_v47 = vadd.f32 %v3893_v12, %v10940_v25  ;;  %v9370_v25 = vpop.f32.mrf.mxu1 }
 0x28d   : > { %v4149_v35 = vadd.f32 1.0, %v6289_v3  ;;  %6306 = vpow2.f32 %v5761_v2  ;;  %v3924_v46 = vadd.f32 %v3895_v58, %v10941_v4  ;;  %v5763_v9 = vmul.f32 -1.442695, %v4077_v51  ;;  %v10942_v58 = vld [vmem:[#allocation31_spill] sm:$0xff]  ;;  %v4019_v51 = vpop.f32.mrf.mxu0 }
 0x28e   : > { %v6291_v41 = vpop.eup %6290  ;;  %6308 = vrcp.f32 %v4148_v43  ;;  %v4059_v30 = vmul.f32 %v9354_v0, %v10937_v34  ;;  %v9361_v59 = vadd.f32 %v9291_v5, %v3922_v55  ;;  %v5764_v19 = vmul.f32 -1.442695, %v4078_v24  ;;  %v10943_v5 = vld [vmem:[#allocation40_spill] sm:$0xff] }
 0x28f   : > { %v6293_v26 = vpop.eup %6292  ;;  %6310 = vrcp.f32 %v4149_v35  ;;  %v4150_v39 = vadd.f32 1.0, %v6291_v41  ;;  %v9363_v3 = vadd.f32 %v4011_v52, %v3923_v47  ;;  %v3712_v4 = vadd.f32 %v9299_v38, %v3692_v7  ;;  %v10944_v38 = vld [vmem:[#allocation43_spill] sm:$0xff] }
 0x290   : > { %v3673_v2 = vsub.f32 1.0, %v6293_v26  ;;  %6312 = vpow2.f32 %v5762_v14  ;;  %v4079_v12 = vadd.f32 %v4059_v30, %v10939_v13  ;;  %v4060_v62 = vmul.f32 %v9361_v59, %v10942_v58 }
 0x291   : > { %v6295_v43 = vpop.eup %6294  ;;  %6314 = vrcp.f32 %v4150_v39  ;;  %v3925_v55 = vadd.f32 %v3897_v31, %v10943_v5  ;;  %v9372_v35 = vadd.f32 %v4013_v36, %v3924_v46  ;;  %v4061_v47 = vmul.f32 %v9363_v3, %v10942_v58  ;;  %v10945_v5 = vld [vmem:[#allocation42_spill] sm:$0xff]  ;;  %v9380_v46 = vpop.f32.mrf.mxu0 }
 0x292   : > { %v6297_v52 = vpop.eup %6296  ;;  %v3693_v24 = vmul.f32 %v3673_v2, %v10934_v23  ;;  %v4151_v14 = vadd.f32 1.0, %v6295_v43  ;;  %6316 = vpow2.f32 %v5763_v9  ;;  %v5765_v13 = vmul.f32 -1.442695, %v4079_v12  ;;  %v10946_v2 = vld [vmem:[#allocation27_spill] sm:$0xff]  ;;  %v10947_v43 = vld [vmem:[#allocation4_spill] sm:$0xff] }
 0x293   : > { %v6299_v41 = vpop.eup %6298  ;;  %v4152_v30 = vadd.f32 1.0, %v6297_v52  ;;  %6318 = vpow2.f32 %v5764_v19  ;;  %v4080_v7 = vadd.f32 %v4060_v62, %v10944_v38  ;;  %v4062_v36 = vmul.f32 %v9372_v35, %v10945_v5  ;;  %v9385_v52 = vpop.f32.mrf.mxu1 }
 0x294   : > { %v3713_v39 = vadd.f32 %v6293_v26, %v3693_v24  ;;  %6320 = vrcp.f32 %v4151_v14  ;;  %v4153_v31 = vadd.f32 1.0, %v6299_v41  ;;  %v3750_v9 = vmul.f32 %v9327_v6, %v10946_v2 }
 0x295   : > { %v3732_v34 = vmul.f32 %v3712_v4, %v10947_v43  ;;  %6322 = vrcp.f32 %v4152_v30  ;;  %v5766_v58 = vmul.f32 -1.442695, %v4080_v7  ;;  %v3761_v19 = vadd.f32 %v9232_v61, %v9294_v56  ;;  %v10948_v4 = vld [vmem:[#allocation49_spill] sm:$0xff]  ;;  %v10949_v61 = vld [vmem:[#allocation44_spill] sm:$0xff] }
 0x296   : > { %6324 = vrcp.f32 %v4153_v31  ;;  %v4081_v26 = vadd.f32 %v4061_v47, %v10944_v38  ;;  %v9390_v12 = vadd.f32 %v4015_v27, %v3925_v55  ;;  %v3776_v24 = vadd.f32 %v9270_v8, %v9306_v48  ;;  %v9399_v47 = vpop.f32.mrf.mxu0  ;;  %v10950_v31 = vld [vmem:[#allocation86_spill] sm:$0xff]  ;;  %v3907_v8 = vpop.f32.mrf.mxu1 }
 0x297   : > { %v6301_v62 = vpop.eup %6300  ;;  %v3751_v6 = vmul.f32 %v9330_v57, %v10946_v2  ;;  %6326 = vpow2.f32 %v5765_v13  ;;  %v4082_v14 = vadd.f32 %v4062_v36, %v10948_v4  ;;  %v3733_v30 = vmul.f32 %v3713_v39, %v9162_v22  ;;  %v10951_v36 = vld [vmem:[#allocation47_spill] sm:$0xff] }
 0x298   : > { %v6303_v41 = vpop.eup %6302  ;;  %v3674_v7 = vsub.f32 1.0, %v6301_v62  ;;  %v3926_v56 = vadd.f32 %v3901_v21, %v10949_v61  ;;  %6328 = vpow2.f32 %v5766_v58  ;;  %v3762_v55 = vadd.f32 %v3761_v19, %v3750_v9  ;;  %v9412_v23 = vpop.f32.mrf.mxu0 }
 0x299   : > { %v6305_v27 = vpop.eup %6304  ;;  %v3752_v43 = vmul.f32 %v3732_v34, %v10950_v31  ;;  %v4154_v48 = vadd.f32 1.0, %v6303_v41  ;;  %v4063_v13 = vmul.f32 %v9390_v12, %v10945_v5  ;;  %v5767_v22 = vmul.f32 -1.442695, %v4081_v26 }
 0x29a   : > { %v6307_v57 = vpop.eup %6306  ;;  %v3694_v38 = vmul.f32 %v3674_v7, %v10951_v36  ;;  %v3675_v2 = vsub.f32 1.0, %v6305_v27  ;;  %v9405_v39 = vadd.f32 %v4019_v51, %v3926_v56  ;;  %v5768_v61 = vmul.f32 -1.442695, %v4082_v14 }
 0x29b   : > { %v6309_v21 = vpop.eup %6308  ;;  %6330 = vrcp.f32 %v4154_v48  ;;  %v4155_v58 = vadd.f32 1.0, %v6307_v57  ;;  %v4083_v9 = vadd.f32 %v4063_v13, %v10948_v4  ;;  %v3777_v34 = vadd.f32 %v3776_v24, %v3751_v6  ;;  %v4413_v48 = vpop.f32.mrf.mxu1 }
 0x29c   : > { %10952 = vst [vmem:[#allocation53_spill] sm:$0xff] %v9405_v39  ;;  %v9408_v19 = vpop.eup %6310  ;;  %v3753_v41 = vmul.f32 %v3733_v30, %v10950_v31  ;;  %v3714_v50 = vadd.f32 %v6301_v62, %v3694_v38  ;;  %v3695_v5 = vmul.f32 %v3675_v2, %v10951_v36  ;;  %v3763_v26 = vadd.f32 %v3762_v55, %v3752_v43  ;;  %v10953_v55 = vld [vmem:[#allocation78_spill] sm:$0xff] }
 0x29d   : > { %v6313_v7 = vpop.eup %6312  ;;  %v4208_v51 = vsub.f32 1.0, %v6309_v21  ;;  %6332 = vrcp.f32 %v4155_v58  ;;  %v5769_v56 = vmul.f32 -1.442695, %v4083_v9  ;;  %v3927_v38 = vadd.f32 %v9370_v25, %v10890_v10  ;;  %v9425_v25 = vpop.f32.mrf.mxu1 }
 0x29e   : > { %v6315_v57 = vpop.eup %6314  ;;  %v3734_v14 = vmul.f32 %v3714_v50, %v9211_v29  ;;  %v3715_v13 = vadd.f32 %v6305_v27, %v3695_v5  ;;  %v4156_v4 = vadd.f32 1.0, %v6313_v7  ;;  %6334 = vpow2.f32 %v5767_v22  ;;  %v9421_v29 = vpop.f32.mrf.mxu0  ;;  %v10954_v5 = vld [vmem:[#allocation61_spill] sm:$0xff] }
 0x29f   : > { %v6317_v24 = vpop.eup %6316  ;;  %v4210_v6 = vsub.f32 1.0, %v6315_v57  ;;  %6336 = vpow2.f32 %v5768_v61  ;;  %v4064_v2 = vmul.f32 %v9405_v39, %v10884_v17  ;;  %v3778_v30 = vadd.f32 %v3777_v34, %v3753_v41  ;;  %v10955_v41 = vld [vmem:[#allocation63_spill] sm:$0xff] }
 0x2a0   : > { %v6319_v62 = vpop.eup %6318  ;;  %v3754_v43 = vmul.f32 %v3734_v14, %v10953_v55  ;;  %v3735_v58 = vmul.f32 %v3715_v13, %v9220_v54  ;;  %6338 = vrcp.f32 %v4156_v4  ;;  %v4228_v27 = vmul.f32 %v4208_v51, %v10954_v5 }
 0x2a1   : > { %v6321_v50 = vpop.eup %6320  ;;  %v4209_v22 = vsub.f32 1.0, %v9408_v19  ;;  %v4157_v9 = vadd.f32 1.0, %v6317_v24  ;;  %6340 = vpow2.f32 %v5769_v56  ;;  %v4230_v14 = vmul.f32 %v4210_v6, %v10955_v41 }
 0x2a2   : > { %v9427_v61 = vpop.eup %6322  ;;  %v3764_v7 = vadd.f32 %v3763_v26, %v3754_v43  ;;  %v3755_v34 = vmul.f32 %v3735_v58, %v10953_v55  ;;  %v4158_v54 = vadd.f32 1.0, %v6319_v62  ;;  %v4211_v13 = vsub.f32 1.0, %v6321_v50  ;;  %v9443_v43 = vpop.f32.mrf.mxu0 }
 0x2a3   : > { %v9431_v4 = vpop.eup %6324  ;;  %6342 = vrcp.f32 %v4157_v9  ;;  %v9435_v51 = vadd.f32 %v9385_v52, %v10894_v28  ;;  %v9438_v31 = vadd.f32 %v3907_v8, %v10897_v49  ;;  %v9441_v26 = vadd.f32 %v9380_v46, %v3927_v38  ;;  %v9450_v28 = vpop.f32.mrf.mxu1 }
 0x2a4   : > { %v6327_v24 = vpop.eup %6326  ;;  %v3765_v56 = vrot.slane %v3764_v7, 4  ;;  %v3779_v10 = vadd.f32 %v3778_v30, %v3755_v34  ;;  %v4248_v62 = vadd.f32 %v6309_v21, %v4228_v27  ;;  %v4229_v58 = vmul.f32 %v4209_v22, %v10954_v5 }
 0x2a5   : > { %10956 = vst [vmem:[#allocation59_spill] sm:$0xff] %v9441_v26  ;;  %v6329_v6 = vpop.eup %6328  ;;  %v4084_v9 = vadd.f32 %v4064_v2, %v10887_v33  ;;  %v9448_v52 = vadd.f32 %v4413_v48, %v10900_v53  ;;  %v4250_v8 = vadd.f32 %v6315_v57, %v4230_v14  ;;  %6344 = vrcp.f32 %v4158_v54  ;;  %v9457_v53 = vpop.f32.mrf.mxu0 }
 0x2a6   : > { %v3766_v30 = vadd.f32 %v3765_v56, %v3764_v7  ;;  %v3780_v34 = vrot.slane %v3779_v10, 4  ;;  %v4231_v46 = vmul.f32 %v4211_v13, %v10955_v41  ;;  %v4212_v38 = vsub.f32 1.0, %v9427_v61  ;;  %v9461_v13 = vpop.f32.mrf.mxu1 }
 0x2a7   : > { %v4213_v49 = vsub.f32 1.0, %v9431_v4  ;;  %v4159_v21 = vadd.f32 1.0, %v6327_v24  ;;  %v4160_v2 = vadd.f32 1.0, %v6329_v6  ;;  %v4065_v48 = vmul.f32 %v9441_v26, %v10884_v17  ;;  %v9467_v26 = vpop.f32.mrf.mxu0 }
 0x2a8   : > { %v6331_v27 = vpop.eup %6330  ;;  %v3767_v22 = vrot.slane %v3766_v30, 2  ;;  %v3781_v5 = vadd.f32 %v3780_v34, %v3779_v10  ;;  %v4268_v7 = vmul.f32 %v4248_v62, %v9230_v63  ;;  %v4249_v57 = vadd.f32 %v9408_v19, %v4229_v58  ;;  %v10957_v58 = vld [vmem:[#allocation69_spill] sm:$0xff] }
 0x2a9   : > { %v4214_v14 = vsub.f32 1.0, %v6331_v27  ;;  %v5770_v54 = vmul.f32 -1.442695, %v4084_v9  ;;  %v4270_v55 = vmul.f32 %v4250_v8, %v9251_v1  ;;  %6346 = vrcp.f32 %v4159_v21 }
 0x2aa   : > { %v6333_v56 = vpop.eup %6332  ;;  %v3768_v41 = vadd.f32 %v3767_v22, %v3766_v30  ;;  %v3782_v24 = vrot.slane %v3781_v5, 2  ;;  %v4251_v6 = vadd.f32 %v6321_v50, %v4231_v46  ;;  %v4232_v34 = vmul.f32 %v4212_v38, %v10889_v15  ;;  %v10958_v22 = vld [vmem:[#allocation73_spill] sm:$0xff]  ;;  %v9473_v46 = vpop.f32.mrf.mxu1 }
 0x2ab   : > { %v6335_v10 = vpop.eup %6334  ;;  %v4233_v17 = vmul.f32 %v4213_v49, %v10889_v15  ;;  %v4215_v36 = vsub.f32 1.0, %v6333_v56  ;;  %v4234_v9 = vmul.f32 %v4214_v14, %v10957_v58  ;;  %6348 = vrcp.f32 %v4160_v2 }
 0x2ac   : > { %v6337_v63 = vpop.eup %6336  ;;  %v3769_v62 = vrot.slane %v3768_v41, 1  ;;  %v3783_v19 = vadd.f32 %v3782_v24, %v3781_v5  ;;  %v4288_v39 = vmul.f32 %v4268_v7, %v10958_v22  ;;  %v4269_v1 = vmul.f32 %v4249_v57, %v9238_v20 }
 0x2ad   : > { %v6339_v30 = vpop.eup %6338  ;;  %v4235_v50 = vmul.f32 %v4215_v36, %v10957_v58  ;;  %v4085_v8 = vadd.f32 %v4065_v48, %v10887_v33  ;;  %v4161_v24 = vadd.f32 1.0, %v6335_v10  ;;  %v4271_v2 = vmul.f32 %v4251_v6, %v9266_v37  ;;  %v9479_v48 = vpop.f32.mrf.mxu0 }
 0x2ae   : > { %v6341_v49 = vpop.eup %6340  ;;  %v3770_v38 = vadd.f32 %v3769_v62, %v3768_v41  ;;  %v3784_v21 = vrot.slane %v3783_v19, 1  ;;  %v4216_v5 = vsub.f32 1.0, %v6339_v30  ;;  %v4252_v14 = vadd.f32 %v9427_v61, %v4232_v34  ;;  %v9482_v10 = vpop.f32.mrf.mxu1 }
 0x2af   : > { %v4253_v15 = vadd.f32 %v9431_v4, %v4233_v17  ;;  %v4162_v7 = vadd.f32 1.0, %v6337_v63  ;;  %v4290_v36 = vmul.f32 %v4270_v55, %v10824_v45  ;;  %v4254_v57 = vadd.f32 %v6331_v27, %v4234_v9  ;;  %v9490_v9 = vpop.f32.mrf.mxu0 }
 0x2b0   : > { %v6343_v18 = vpop.eup %6342  ;;  %v3785_v20 = vadd.f32 %v3784_v21, %v3783_v19  ;;  %6350 = vrcp.f32 %v4161_v24  ;;  %v3786_v41 = vadd.f32 %v3770_v38, %v10892_v16  ;;  %v4255_v62 = vadd.f32 %v6333_v56, %v4235_v50  ;;  %v9495_v38 = vpop.f32.mrf.mxu1 }
 0x2b1   : > { %v4217_v58 = vsub.f32 1.0, %v6343_v18  ;;  %6352 = vrcp.f32 %v4162_v7  ;;  %v4236_v17 = vmul.f32 %v4216_v5, %v10825_v32  ;;  %v4163_v61 = vadd.f32 1.0, %v6341_v49 }
 0x2b2   : > { %v3787_v37 = vadd.f32 %v3785_v20, %v10892_v16  ;;  %6354 = vpow2.f32 %v5770_v54  ;;  %v6345_v4 = vpop.eup %6344  ;;  %v4291_v55 = vmul.f32 %v4271_v2, %v10824_v45  ;;  %v4272_v27 = vmul.f32 %v4252_v14, %v9274_v60  ;;  %v10959_v60 = vld [vmem:[#allocation39_spill] sm:$0xff]  ;;  %v10961_v2 = vld [vmem:[#allocation76_spill] sm:$0xff] }
 0x2b3   : > { %v4273_v6 = vmul.f32 %v4253_v15, %v9281_v11  ;;  %v5771_v34 = vmul.f32 -1.442695, %v4085_v8  ;;  %v4237_v56 = vmul.f32 %v4217_v58, %v10825_v32  ;;  %v4218_v19 = vsub.f32 1.0, %v6345_v4  ;;  %v10960_v11 = vld [vmem:[#allocation77_spill] sm:$0xff] }
 0x2b4   : > { %v3790_v63 = vcombine.low %v3786_v41, %v3787_v37  ;;  %6356 = vrcp.f32 %v4163_v61  ;;  %v4289_v50 = vmul.f32 %v4269_v1, %v10958_v22  ;;  %v4274_v49 = vmul.f32 %v4254_v57, %v9303_v44  ;;  %v9510_v57 = vpop.f32.mrf.mxu0 }
 0x2b5   : > { %v4275_v54 = vmul.f32 %v4255_v62, %v9313_v40  ;;  %6358 = vpow2.f32 %v5771_v34  ;;  %v4256_v15 = vadd.f32 %v6339_v30, %v4236_v17  ;;  %v4238_v8 = vmul.f32 %v4218_v19, %v10960_v11  ;;  %v10966_v34 = vld [vmem:[#allocation60_spill] sm:$0xff] }
 0x2b6   : > { %v3797_v21 = vrot.slane %v3790_v63, %v10959_v60  ;;  %v9501_v58 = vadd.f32 %v9399_v47, %v9435_v51  ;;  %v6347_v5 = vpop.eup %6346  ;;  %v4308_v24 = vadd.f32 %v4290_v36, %v4288_v39  ;;  %v4323_v1 = vadd.f32 %v4291_v55, %v4289_v50  ;;  %v10962_v36 = vld [vmem:[#allocation54_spill] sm:$0xff]  ;;  %v10965_v55 = vld [vmem:[#allocation12_spill] sm:$0xff] }
 0x2b7   : > { %v4292_v44 = vmul.f32 %v4272_v27, %v10961_v2  ;;  %v9506_v40 = vadd.f32 %v9412_v23, %v9438_v31  ;;  %v4293_v30 = vmul.f32 %v4273_v6, %v10961_v2  ;;  %v4257_v7 = vadd.f32 %v6343_v18, %v4237_v56  ;;  %v9518_v31 = vpop.f32.mrf.mxu1  ;;  %v10964_v18 = vld [vmem:[#allocation52_spill] sm:$0xff] }
 0x2b8   : > { %v3804_v14 = vrot.slane %v3797_v21, %v10959_v60  ;;  %v4219_v20 = vsub.f32 1.0, %v6347_v5  ;;  %v6349_v47 = vpop.eup %6348  ;;  %v4294_v51 = vmul.f32 %v4274_v49, %v10896_v42  ;;  %v4295_v39 = vmul.f32 %v4275_v54, %v10896_v42  ;;  %v10967_v49 = vld [vmem:[#allocation85_spill] sm:$0xff] }
 0x2b9   : > { %v4066_v41 = vmul.f32 %v9501_v58, %v10962_v36  ;;  %v4067_v23 = vmul.f32 %v9506_v40, %v10962_v36  ;;  %v4276_v37 = vmul.f32 %v4256_v15, %v10964_v18  ;;  %v4258_v17 = vadd.f32 %v6345_v4, %v4238_v8  ;;  %v9534_v15 = vpop.f32.mrf.mxu0 }
 0x2ba   : > { %5740 = vst.msk [vmem:[%s8545_s19 + $0x4] ss:$8 sm:$0x3] %vm8550_vm2, %v3804_v14  ;;  %v4239_v61 = vmul.f32 %v4219_v20, %v10960_v11  ;;  %v4463_v27 = vadd.f32 %v9425_v25, %v10965_v55  ;;  %v4220_v6 = vsub.f32 1.0, %v6349_v47  ;;  %v9531_v19 = vadd.f32 %v9421_v29, %v9448_v52  ;;  %v10968_v55 = vld [vmem:[#allocation87_spill] sm:$0xff]  ;;  %v10969_v52 = vld [vmem:[#allocation56_spill] sm:$0xff] }
 0x2bb   : > { %v4086_v63 = vadd.f32 %v4066_v41, %v10966_v34  ;;  %v4087_v56 = vadd.f32 %v4067_v23, %v10966_v34  ;;  %v4309_v50 = vadd.f32 %v4308_v24, %v4292_v44  ;;  %v4277_v54 = vmul.f32 %v4257_v7, %v10967_v49  ;;  %v9539_v41 = vpop.f32.mrf.mxu1  ;;  %v10971_v49 = vld [vmem:[#allocation6_spill] sm:$0xff] }
 0x2bc   : > { %v4259_v21 = vadd.f32 %v6347_v5, %v4239_v61  ;;  %v4324_v8 = vadd.f32 %v4323_v1, %v4293_v30  ;;  %v9537_v25 = vadd.f32 %v9443_v43, %v4463_v27  ;;  %v4296_v29 = vmul.f32 %v4276_v37, %v10968_v55  ;;  %v10970_v5 = vld [vmem:[#allocation80_spill] sm:$0xff]  ;;  %v10972_v37 = vld [vmem:[#allocation15_spill] sm:$0xff] }
 0x2bd   : > { %v6351_v4 = vpop.eup %6350  ;;  %v5772_v14 = vmul.f32 -1.442695, %v4086_v63  ;;  %v5773_v20 = vmul.f32 -1.442695, %v4087_v56  ;;  %v4310_v18 = vadd.f32 %v4309_v50, %v4294_v51  ;;  %v4278_v24 = vmul.f32 %v4258_v17, %v10969_v52  ;;  %v9548_v56 = vpop.f32.mrf.mxu0  ;;  %v10974_v52 = vld [vmem:[#allocation68_spill] sm:$0xff] }
 0x2be   : > { %v6353_v23 = vpop.eup %6352  ;;  %v4325_v7 = vadd.f32 %v4324_v8, %v4295_v39  ;;  %v4240_v61 = vmul.f32 %v4220_v6, %v10970_v5  ;;  %v4600_v1 = vmul.f32 %v9531_v19, %v10971_v49  ;;  %v4297_v30 = vmul.f32 %v4277_v54, %v10968_v55  ;;  %v10973_v39 = vld [vmem:[#allocation20_spill] sm:$0xff]  ;;  %v4435_v8 = vpop.f32.mrf.mxu1 }
 0x2bf   : > { %v6355_v44 = vpop.eup %6354  ;;  %6360 = vpow2.f32 %v5772_v14  ;;  %v4279_v43 = vmul.f32 %v4259_v21, %v9354_v0  ;;  %v4221_v27 = vsub.f32 1.0, %v6351_v4  ;;  %v4464_v17 = vadd.f32 %v9450_v28, %v10972_v37  ;;  %v10976_v28 = vld [vmem:[#allocation13_spill] sm:$0xff]  ;;  %v4553_v11 = vpop.f32.mrf.mxu0 }
 0x2c0   : > { %v4164_v63 = vadd.f32 1.0, %v6355_v44  ;;  %6362 = vpow2.f32 %v5773_v20  ;;  %v4465_v6 = vadd.f32 %v9461_v13, %v10973_v39  ;;  %v4601_v50 = vmul.f32 %v9537_v25, %v10971_v49  ;;  %v10975_v44 = vld [vmem:[#allocation21_spill] sm:$0xff] }
 0x2c1   : > { %v6357_v51 = vpop.eup %6356  ;;  %v4311_v54 = vadd.f32 %v4310_v18, %v4296_v29  ;;  %v4298_v0 = vmul.f32 %v4278_v24, %v10974_v52  ;;  %v4222_v21 = vsub.f32 1.0, %v6353_v23  ;;  %v4466_v55 = vadd.f32 %v9473_v46, %v10975_v44  ;;  %v10977_v18 = vld [vmem:[#allocation22_spill] sm:$0xff] }
 0x2c2   : > { %v6359_v14 = vpop.eup %6358  ;;  %v4260_v42 = vadd.f32 %v6349_v47, %v4240_v61  ;;  %6364 = vrcp.f32 %v4164_v63  ;;  %v4620_v20 = vadd.f32 %v4600_v1, %v10976_v28  ;;  %v4326_v37 = vadd.f32 %v4325_v7, %v4297_v30  ;;  %v4437_v47 = vpop.f32.mrf.mxu1  ;;  %v10978_v1 = vld [vmem:[#allocation36_spill] sm:$0xff]  ;;  %v10979_v30 = vld [vmem:[#allocation23_spill] sm:$0xff] }
 0x2c3   : > { %v4165_v2 = vadd.f32 1.0, %v6359_v14  ;;  %v4299_v13 = vmul.f32 %v4279_v43, %v10974_v52  ;;  %v4241_v39 = vmul.f32 %v4221_v27, %v10970_v5  ;;  %v4223_v49 = vsub.f32 1.0, %v6357_v51 }
 0x2c4   : > { %v4467_v29 = vadd.f32 %v9482_v10, %v10977_v18  ;;  %v4621_v24 = vadd.f32 %v4601_v50, %v10976_v28  ;;  %v9566_v46 = vadd.f32 %v9457_v53, %v4464_v17  ;;  %v9568_v61 = vadd.f32 %v4311_v54, %v4298_v0  ;;  %v10980_v10 = vld [vmem:[#allocation7_spill] sm:$0xff]  ;;  %v4555_v0 = vpop.f32.mrf.mxu0  ;;  %v10985_v18 = vld [vmem:[#allocation9_spill] sm:$0xff] }
 0x2c5   : > { %6366 = vrcp.f32 %v4165_v2  ;;  %v4242_v7 = vmul.f32 %v4222_v21, %v10978_v1  ;;  %v4468_v43 = vadd.f32 %v9495_v38, %v10979_v30  ;;  %v9574_v27 = vadd.f32 %v9467_v26, %v4465_v6  ;;  %v10981_v6 = vld [vmem:[#allocation14_spill] sm:$0xff] }
 0x2c6   : > { %v4280_v2 = vmul.f32 %v4260_v42, %v9361_v59  ;;  %v5788_v63 = vmul.f32 -1.442695, %v4620_v20  ;;  %v4602_v50 = vmul.f32 %v9566_v46, %v10980_v10  ;;  %v9580_v53 = vadd.f32 %v9479_v48, %v4466_v55  ;;  %v10982_v42 = vld [vmem:[#allocation8_spill] sm:$0xff]  ;;  %v4439_v48 = vpop.f32.mrf.mxu1 }
 0x2c7   : > { %v9582_v17 = vadd.f32 %v4326_v37, %v4299_v13  ;;  %v4261_v14 = vadd.f32 %v6351_v4, %v4241_v39  ;;  %v4243_v54 = vmul.f32 %v4223_v49, %v10978_v1  ;;  %v4603_v38 = vmul.f32 %v9574_v27, %v10980_v10  ;;  %v10983_v37 = vld [vmem:[#allocation26_spill] sm:$0xff] }
 0x2c8   : > { %v5789_v26 = vmul.f32 -1.442695, %v4621_v24  ;;  %v4622_v21 = vadd.f32 %v4602_v50, %v10981_v6  ;;  %v4604_v59 = vmul.f32 %v9580_v53, %v10982_v42  ;;  %v9591_v20 = vadd.f32 %v9490_v9, %v4467_v29  ;;  %v10984_v24 = vld [vmem:[#allocation18_spill] sm:$0xff] }
 0x2c9   : > { %v4262_v55 = vadd.f32 %v6353_v23, %v4242_v7  ;;  %v4469_v4 = vadd.f32 %v9518_v31, %v10983_v37  ;;  %v4623_v49 = vadd.f32 %v4603_v38, %v10981_v6  ;;  %v9597_v39 = vadd.f32 %v9510_v57, %v4468_v43  ;;  %v4557_v7 = vpop.f32.mrf.mxu0  ;;  %v10986_v57 = vld [vmem:[#allocation29_spill] sm:$0xff] }
 0x2ca   : > { %6368 = vpow2.f32 %v5788_v63  ;;  %v5790_v13 = vmul.f32 -1.442695, %v4622_v21  ;;  %v4624_v50 = vadd.f32 %v4604_v59, %v10984_v24  ;;  %v4605_v30 = vmul.f32 %v9591_v20, %v10982_v42  ;;  %v4443_v21 = vpop.f32.mrf.mxu1  ;;  %v10987_v37 = vld [vmem:[#allocation33_spill] sm:$0xff] }
 0x2cb   : > { %v4263_v9 = vadd.f32 %v6357_v51, %v4243_v54  ;;  %v5791_v29 = vmul.f32 -1.442695, %v4623_v49  ;;  %v4606_v23 = vmul.f32 %v9597_v39, %v10985_v18  ;;  %v9605_v31 = vadd.f32 %v9534_v15, %v4469_v4  ;;  %v10988_v54 = vld [vmem:[#allocation19_spill] sm:$0xff] }
 0x2cc   : > { %v6361_v10 = vpop.eup %6360  ;;  %6370 = vpow2.f32 %v5789_v26  ;;  %v4470_v43 = vadd.f32 %v9539_v41, %v10986_v57  ;;  %v4625_v63 = vadd.f32 %v4605_v30, %v10984_v24  ;;  %v4471_v51 = vadd.f32 %v4435_v8, %v10987_v37  ;;  %v4561_v57 = vpop.f32.mrf.mxu0  ;;  %v10991_v24 = vld [vmem:[#allocation34_spill] sm:$0xff] }
 0x2cd   : > { %v4166_v38 = vadd.f32 1.0, %v6361_v10  ;;  %v6363_v59 = vpop.eup %6362  ;;  %6372 = vpow2.f32 %v5790_v13  ;;  %v4626_v49 = vadd.f32 %v4606_v23, %v10988_v54  ;;  %v4607_v6 = vmul.f32 %v9605_v31, %v10985_v18  ;;  %v10989_v23 = vld [vmem:[#allocation10_spill] sm:$0xff]  ;;  %v4445_v18 = vpop.f32.mrf.mxu1 }
 0x2ce   : > { %v4167_v15 = vadd.f32 1.0, %v6363_v59  ;;  %v5792_v4 = vmul.f32 -1.442695, %v4624_v50  ;;  %v9615_v10 = vadd.f32 %v9548_v56, %v4470_v43  ;;  %v4281_v41 = vmul.f32 %v4261_v14, %v9363_v3  ;;  %v10990_v59 = vld [vmem:[#allocation46_spill] sm:$0xff] }
 0x2cf   : > { %6374 = vrcp.f32 %v4166_v38  ;;  %v6365_v26 = vpop.eup %6364  ;;  %v5793_v30 = vmul.f32 -1.442695, %v4625_v63  ;;  %v4627_v13 = vadd.f32 %v4607_v6, %v10988_v54  ;;  %v9621_v38 = vadd.f32 %v4553_v11, %v4471_v51  ;;  %v10992_v63 = vld [vmem:[#allocation25_spill] sm:$0xff]  ;;  %v10993_v54 = vld [vmem:[#allocation88_spill] sm:$0xff] }
 0x2d0   : > { %6376 = vpow2.f32 %v5791_v29  ;;  %v4224_v8 = vsub.f32 1.0, %v6365_v26  ;;  %v4608_v37 = vmul.f32 %v9615_v10, %v10989_v23  ;;  %v4300_v56 = vmul.f32 %v4280_v2, %v10990_v59  ;;  %v4563_v2 = vpop.f32.mrf.mxu0 }
 0x2d1   : > { %6378 = vrcp.f32 %v4167_v15  ;;  %v4282_v43 = vmul.f32 %v4262_v55, %v9372_v35  ;;  %v4472_v3 = vadd.f32 %v4437_v47, %v10991_v24  ;;  %v5794_v14 = vmul.f32 -1.442695, %v4626_v49  ;;  %v10995_v55 = vld [vmem:[#allocation38_spill] sm:$0xff] }
 0x2d2   : > { %v6367_v50 = vpop.eup %6366  ;;  %v4283_v29 = vmul.f32 %v4263_v9, %v9390_v12  ;;  %6380 = vpow2.f32 %v5792_v4  ;;  %v4628_v15 = vadd.f32 %v4608_v37, %v10992_v63  ;;  %v4244_v42 = vmul.f32 %v4224_v8, %v10993_v54  ;;  %v10996_v24 = vld [vmem:[#allocation30_spill] sm:$0xff]  ;;  %v4447_v9 = vpop.f32.mrf.mxu1 }
 0x2d3   : > { %v4225_v6 = vsub.f32 1.0, %v6367_v50  ;;  %6382 = vpow2.f32 %v5793_v30  ;;  %v4609_v11 = vmul.f32 %v9621_v38, %v10989_v23  ;;  %v9631_v51 = vadd.f32 %v4555_v0, %v4472_v3  ;;  %v10997_v30 = vld [vmem:[#allocation24_spill] sm:$0xff]  ;;  %v10998_v23 = vld [vmem:[#allocation27_spill] sm:$0xff] }
 0x2d4   : > { %v4301_v35 = vmul.f32 %v4281_v41, %v10990_v59  ;;  %v4473_v47 = vadd.f32 %v4439_v48, %v10995_v55  ;;  %v5795_v49 = vmul.f32 -1.442695, %v4627_v13  ;;  %v4474_v12 = vadd.f32 %v4443_v21, %v10996_v24  ;;  %v11000_v55 = vld [vmem:[#allocation35_spill] sm:$0xff]  ;;  %v11001_v24 = vld [vmem:[#allocation32_spill] sm:$0xff] }
 0x2d5   : > { %10994 = vst [vmem:[#allocation57_spill] sm:$0xff] %v9631_v51  ;;  %v4245_v4 = vmul.f32 %v4225_v6, %v10993_v54  ;;  %6384 = vpow2.f32 %v5794_v14  ;;  %v4629_v37 = vadd.f32 %v4609_v11, %v10992_v63  ;;  %v4610_v8 = vmul.f32 %v9631_v51, %v10997_v30  ;;  %v4565_v14 = vpop.f32.mrf.mxu0 }
 0x2d6   : > { %v4302_v0 = vmul.f32 %v4282_v43, %v10998_v23  ;;  %v4303_v3 = vmul.f32 %v4283_v29, %v10998_v23  ;;  %v5796_v28 = vmul.f32 -1.442695, %v4628_v15  ;;  %v9642_v41 = vadd.f32 %v4557_v7, %v4473_v47  ;;  %v9650_v43 = vpop.f32.mrf.mxu1 }
 0x2d7   : > { %v6369_v48 = vpop.eup %6368  ;;  %v4264_v13 = vadd.f32 %v6365_v26, %v4244_v42  ;;  %v4475_v21 = vadd.f32 %v4445_v18, %v11000_v55  ;;  %v4630_v59 = vadd.f32 %v4610_v8, %v11001_v24  ;;  %v9646_v6 = vadd.f32 %v4561_v57, %v4474_v12  ;;  %v11003_v26 = vld [vmem:[#allocation31_spill] sm:$0xff]  ;;  %v9659_v55 = vpop.f32.mrf.mxu0 }
 0x2d8   : > { %10999 = vst [vmem:[#allocation62_spill] sm:$0xff] %v9642_v41  ;;  %v4313_v11 = vadd.f32 %v9568_v61, %v4300_v56  ;;  %v4328_v63 = vadd.f32 %v9582_v17, %v4301_v35  ;;  %6386 = vpow2.f32 %v5795_v49  ;;  %v4611_v7 = vmul.f32 %v9642_v41, %v10997_v30  ;;  %v11005_v35 = vld [vmem:[#allocation53_spill] sm:$0xff]  ;;  %v9663_v54 = vpop.f32.mrf.mxu1 }
 0x2d9   : > { %11002 = vst [vmem:[#allocation65_spill] sm:$0xff] %v9646_v6  ;;  %v6371_v29 = vpop.eup %6370  ;;  %v4265_v15 = vadd.f32 %v6367_v50, %v4245_v4  ;;  %v5797_v42 = vmul.f32 -1.442695, %v4629_v37  ;;  %v4612_v18 = vmul.f32 %v9646_v6, %v11003_v26  ;;  %v9656_v47 = vadd.f32 %v4563_v2, %v4475_v21  ;;  %v11006_v50 = vld [vmem:[#allocation37_spill] sm:$0xff] }
 0x2da   : > { %v6373_v57 = vpop.eup %6372  ;;  %v4700_v12 = vadd.f32 1.0, %v6369_v48  ;;  %6388 = vpow2.f32 %v5796_v28  ;;  %v4314_v56 = vadd.f32 %v4313_v11, %v4302_v0  ;;  %v4329_v17 = vadd.f32 %v4328_v63, %v4303_v3  ;;  %v11007_v48 = vld [vmem:[#allocation59_spill] sm:$0xff] }
 0x2db   : > { %11004 = vst [vmem:[#allocation64_spill] sm:$0xff] %v9656_v47  ;;  %v4284_v49 = vmul.f32 %v4264_v13, %v11005_v35  ;;  %v5798_v8 = vmul.f32 -1.442695, %v4630_v59  ;;  %v4476_v4 = vadd.f32 %v4447_v9, %v11006_v50  ;;  %v4631_v37 = vadd.f32 %v4611_v7, %v11001_v24  ;;  %v11008_v3 = vld [vmem:[#allocation43_spill] sm:$0xff]  ;;  %v11010_v50 = vld [vmem:[#allocation86_spill] sm:$0xff] }
 0x2dc   : > { %v6375_v61 = vpop.eup %6374  ;;  %v4613_v2 = vmul.f32 %v9656_v47, %v11003_v26  ;;  %v4285_v0 = vmul.f32 %v4265_v15, %v11007_v48  ;;  %v4701_v63 = vadd.f32 1.0, %v6371_v29  ;;  %6390 = vpow2.f32 %v5797_v42  ;;  %v11009_v13 = vld [vmem:[#allocation47_spill] sm:$0xff]  ;;  %v4571_v26 = vpop.f32.mrf.mxu0  ;;  %v11013_v48 = vld [vmem:[#allocation49_spill] sm:$0xff] }
 0x2dd   : > { %v6377_v30 = vpop.eup %6376  ;;  %v4226_v23 = vsub.f32 1.0, %v6375_v61  ;;  %v4632_v59 = vadd.f32 %v4612_v18, %v11008_v3  ;;  %6392 = vrcp.f32 %v4700_v12  ;;  %v4702_v35 = vadd.f32 1.0, %v6373_v57  ;;  %v9674_v42 = vpop.f32.mrf.mxu1  ;;  %v11012_v12 = vld [vmem:[#allocation42_spill] sm:$0xff] }
 0x2de   : > { %v6379_v28 = vpop.eup %6378  ;;  %v4304_v7 = vmul.f32 %v4284_v49, %v11010_v50  ;;  %v4703_v24 = vadd.f32 1.0, %v6377_v30  ;;  %6394 = vpow2.f32 %v5798_v8  ;;  %v9671_v6 = vadd.f32 %v4565_v14, %v4476_v4 }
 0x2df   : > { %v4246_v21 = vmul.f32 %v4226_v23, %v11009_v13  ;;  %v4227_v11 = vsub.f32 1.0, %v6379_v28  ;;  %v6381_v9 = vpop.eup %6380  ;;  %v5799_v15 = vmul.f32 -1.442695, %v4631_v37  ;;  %v4633_v23 = vadd.f32 %v4613_v2, %v11008_v3  ;;  %v11014_v2 = vld [vmem:[#allocation78_spill] sm:$0xff]  ;;  %v9686_v3 = vpop.f32.mrf.mxu1 }
 0x2e0   : > { %11011 = vst [vmem:[#allocation70_spill] sm:$0xff] %v9671_v6  ;;  %v6383_v47 = vpop.eup %6382  ;;  %v4305_v18 = vmul.f32 %v4285_v0, %v11010_v50  ;;  %6396 = vrcp.f32 %v4701_v63  ;;  %v5800_v57 = vmul.f32 -1.442695, %v4632_v59  ;;  %v4614_v30 = vmul.f32 %v9671_v6, %v11012_v12 }
 0x2e1   : > { %v4266_v41 = vadd.f32 %v6375_v61, %v4246_v21  ;;  %v4247_v29 = vmul.f32 %v4227_v11, %v11009_v13  ;;  %6398 = vrcp.f32 %v4702_v35  ;;  %v4704_v61 = vadd.f32 1.0, %v6381_v9  ;;  %v9682_v11 = vpop.f32.mrf.mxu0 }
 0x2e2   : > { %v6385_v49 = vpop.eup %6384  ;;  %v4315_v4 = vadd.f32 %v4314_v56, %v4304_v7  ;;  %6400 = vrcp.f32 %v4703_v24  ;;  %v4705_v37 = vadd.f32 1.0, %v6383_v47  ;;  %v4634_v21 = vadd.f32 %v4614_v30, %v11013_v48 }
 0x2e3   : > { %v4286_v14 = vmul.f32 %v4266_v41, %v9501_v58  ;;  %v4267_v8 = vadd.f32 %v6379_v28, %v4247_v29  ;;  %6402 = vpow2.f32 %v5799_v15  ;;  %v5801_v59 = vmul.f32 -1.442695, %v4633_v23  ;;  %v9689_v35 = vpop.f32.mrf.mxu0  ;;  %v11015_v15 = vld [vmem:[#allocation40_spill] sm:$0xff] }
 0x2e4   : > { %v4706_v58 = vadd.f32 1.0, %v6385_v49  ;;  %6404 = vpow2.f32 %v5800_v57  ;;  %v4330_v41 = vadd.f32 %v4329_v17, %v4305_v18  ;;  %v5802_v56 = vmul.f32 -1.442695, %v4634_v21 }
 0x2e5   : > { %v4306_v0 = vmul.f32 %v4286_v14, %v11014_v2  ;;  %v4287_v63 = vmul.f32 %v4267_v8, %v9506_v40  ;;  %v6387_v50 = vpop.eup %6386  ;;  %6406 = vrcp.f32 %v4704_v61  ;;  %v9691_v40 = vpop.f32.mrf.mxu1  ;;  %v4477_v23 = vadd.f32 %v9650_v43, %v11015_v15  ;;  %v11016_v14 = vld [vmem:[#allocation44_spill] sm:$0xff] }
 0x2e6   : > { %6408 = vrcp.f32 %v4705_v37  ;;  %v4707_v29 = vadd.f32 1.0, %v6387_v50  ;;  %v4478_v8 = vadd.f32 %v9663_v54, %v11016_v14 }
 0x2e7   : > { %v4316_v28 = vadd.f32 %v4315_v4, %v4306_v0  ;;  %v4307_v24 = vmul.f32 %v4287_v63, %v11014_v2  ;;  %v6389_v47 = vpop.eup %6388  ;;  %6410 = vpow2.f32 %v5801_v59  ;;  %v9700_v61 = vadd.f32 %v9659_v55, %v4477_v23  ;;  %v9702_v4 = vpop.f32.mrf.mxu0 }
 0x2e8   : > { %6412 = vrcp.f32 %v4706_v58  ;;  %v4708_v30 = vadd.f32 1.0, %v6389_v47  ;;  %v9704_v0 = vpop.f32.mrf.mxu1  ;;  %v9706_v63 = vadd.f32 %v4571_v26, %v4478_v8 }
 0x2e9   : > { %v4317_v9 = vrot.slane %v4316_v28, 4  ;;  %v4331_v7 = vadd.f32 %v4330_v41, %v4307_v24  ;;  %v6391_v17 = vpop.eup %6390  ;;  %6414 = vpow2.f32 %v5802_v56  ;;  %11017 = vst [vmem:[#allocation72_spill] sm:$0xff] %v9700_v61  ;;  %v4615_v55 = vmul.f32 %v9700_v61, %v11012_v12  ;;  %v9712_v24 = vpop.f32.mrf.mxu0 }
 0x2ea   : > { %v9695_v49 = vpop.eup %6392  ;;  %6416 = vrcp.f32 %v4707_v29  ;;  %v4709_v43 = vadd.f32 1.0, %v6391_v17  ;;  %11018 = vst [vmem:[#allocation75_spill] sm:$0xff] %v9706_v63  ;;  %v11019_v29 = vld [vmem:[#allocation48_spill] sm:$0xff] }
 0x2eb   : > { %v4318_v18 = vadd.f32 %v4317_v9, %v4316_v28  ;;  %v4332_v57 = vrot.slane %v4331_v7, 4  ;;  %v6395_v37 = vpop.eup %6394  ;;  %6418 = vrcp.f32 %v4708_v30  ;;  %v4616_v23 = vmul.f32 %v9706_v63, %v11019_v29  ;;  %v9724_v14 = vpop.f32.mrf.mxu0  ;;  %v11021_v63 = vld [vmem:[#allocation61_spill] sm:$0xff] }
 0x2ec   : > { %v4710_v28 = vadd.f32 1.0, %v6395_v37  ;;  %6420 = vrcp.f32 %v4709_v43  ;;  %v4760_v8 = vsub.f32 1.0, %v9695_v49 }
 0x2ed   : > { %v4319_v50 = vrot.slane %v4318_v18, 2  ;;  %v4333_v21 = vadd.f32 %v4332_v57, %v4331_v7  ;;  %v9708_v59 = vpop.eup %6396  ;;  %v9716_v7 = vpop.f32.mrf.mxu1 }
 0x2ee   : > { %v6399_v54 = vpop.eup %6398  ;;  %6422 = vrcp.f32 %v4710_v28  ;;  %v4761_v28 = vsub.f32 1.0, %v9708_v59 }
 0x2ef   : > { %v4320_v58 = vadd.f32 %v4319_v50, %v4318_v18  ;;  %v4334_v41 = vrot.slane %v4333_v21, 2  ;;  %v9714_v47 = vpop.eup %6400  ;;  %v4762_v37 = vsub.f32 1.0, %v6399_v54  ;;  %v4635_v50 = vadd.f32 %v4615_v55, %v11013_v48  ;;  %v9726_v43 = vpop.f32.mrf.mxu1  ;;  %v11022_v48 = vld [vmem:[#allocation63_spill] sm:$0xff] }
 0x2f0   : > { %v6403_v26 = vpop.eup %6402  ;;  %11020 = vst [vmem:[#allocation16_spill] sm:$0xff] %v9726_v43  ;;  %v4780_v55 = vmul.f32 %v4760_v8, %v11021_v63  ;;  %v4781_v43 = vmul.f32 %v4761_v28, %v11021_v63  ;;  %v11027_v63 = vld [vmem:[#allocation69_spill] sm:$0xff] }
 0x2f1   : > { %v4321_v56 = vrot.slane %v4320_v58, 1  ;;  %v4335_v9 = vadd.f32 %v4334_v41, %v4333_v21  ;;  %v6405_v17 = vpop.eup %6404  ;;  %v4711_v15 = vadd.f32 1.0, %v6403_v26  ;;  %v4782_v6 = vmul.f32 %v4762_v37, %v11022_v48 }
 0x2f2   : > { %v9720_v30 = vpop.eup %6406  ;;  %v4712_v2 = vadd.f32 1.0, %v6405_v17  ;;  %v5803_v26 = vmul.f32 -1.442695, %v4635_v50  ;;  %v11025_v50 = vld [vmem:[#allocation45_spill] sm:$0xff] }
 0x2f3   : > { %v4322_v18 = vadd.f32 %v4321_v56, %v4320_v58  ;;  %v4336_v57 = vrot.slane %v4335_v9, 1  ;;  %v6409_v21 = vpop.eup %6408  ;;  %v4636_v58 = vadd.f32 %v4616_v23, %v10887_v33  ;;  %v4764_v23 = vsub.f32 1.0, %v9720_v30 }
 0x2f4   : > { %v6411_v12 = vpop.eup %6410  ;;  %6424 = vrcp.f32 %v4711_v15 }
 0x2f5   : > { %v4337_v41 = vadd.f32 %v4336_v57, %v4335_v9  ;;  %v6413_v56 = vpop.eup %6412  ;;  %v4338_v13 = vadd.f32 %v4322_v18, %v10892_v16  ;;  %v4763_v9 = vsub.f32 1.0, %v9714_v47  ;;  %v9735_v57 = vpop.f32.mrf.mxu0  ;;  %v4713_v52 = vadd.f32 1.0, %v6411_v12 }
 0x2f6   : > { %11023 = vst [vmem:[#allocation41_spill] sm:$0xff] %v9735_v57  ;;  %v6415_v1 = vpop.eup %6414  ;;  %v9738_v18 = vpop.f32.mrf.mxu1  ;;  %6426 = vrcp.f32 %v4712_v2  ;;  %v5804_v44 = vmul.f32 -1.442695, %v4636_v58  ;;  %v4479_v57 = vadd.f32 %v9674_v42, %v11025_v50  ;;  %v4800_v58 = vadd.f32 %v9695_v49, %v4780_v55  ;;  %v11029_v55 = vld [vmem:[#allocation58_spill] sm:$0xff] }
 0x2f7   : > { %v4339_v61 = vadd.f32 %v4337_v41, %v10892_v16  ;;  %11024 = vst [vmem:[#allocation55_spill] sm:$0xff] %v9738_v18  ;;  %v4765_v41 = vsub.f32 1.0, %v6409_v21  ;;  %v4766_v16 = vsub.f32 1.0, %v6413_v56  ;;  %v6417_v8 = vpop.eup %6416  ;;  %v4783_v15 = vmul.f32 %v4763_v9, %v11022_v48  ;;  %v11026_v18 = vld [vmem:[#allocation67_spill] sm:$0xff] }
 0x2f8   : > { %v6419_v51 = vpop.eup %6418  ;;  %v4714_v12 = vadd.f32 1.0, %v6415_v1  ;;  %6428 = vpow2.f32 %v5803_v26  ;;  %v9750_v28 = vpop.f32.mrf.mxu1  ;;  %v11028_v9 = vld [vmem:[#allocation51_spill] sm:$0xff]  ;;  %v9764_v26 = vadd.f32 %v9682_v11, %v4479_v57 }
 0x2f9   : > { %v4342_v17 = vcombine.low %v4338_v13, %v4339_v61  ;;  %v4802_v13 = vadd.f32 %v6399_v54, %v4782_v6  ;;  %v9745_v61 = vpop.f32.mrf.mxu0  ;;  %6430 = vrcp.f32 %v4713_v52  ;;  %v4785_v42 = vmul.f32 %v4765_v41, %v11026_v18  ;;  %v9754_v54 = vpop.eup %6420 }
 0x2fa   : > { %v4786_v50 = vmul.f32 %v4766_v16, %v11027_v63  ;;  %v4767_v6 = vsub.f32 1.0, %v6417_v8  ;;  %6432 = vpow2.f32 %v5804_v44  ;;  %v4768_v1 = vsub.f32 1.0, %v6419_v51  ;;  %v9778_v57 = vpop.f32.mrf.mxu1 }
 0x2fb   : > { %v4349_v37 = vrot.slane %v4342_v17, %v10959_v60  ;;  %v4784_v17 = vmul.f32 %v4764_v23, %v11026_v18  ;;  %v4480_v49 = vadd.f32 %v9686_v3, %v11028_v9  ;;  %v4481_v52 = vadd.f32 %v9691_v40, %v11029_v55  ;;  %v9769_v41 = vpop.f32.mrf.mxu0 }
 0x2fc   : > { %v4801_v23 = vadd.f32 %v9708_v59, %v4781_v43  ;;  %v4822_v16 = vmul.f32 %v4802_v13, %v9566_v46  ;;  %v4803_v44 = vadd.f32 %v9714_v47, %v4783_v15  ;;  %6434 = vrcp.f32 %v4714_v12 }
 0x2fd   : > { %v4356_v2 = vrot.slane %v4349_v37, %v10959_v60  ;;  %v6423_v37 = vpop.eup %6422  ;;  %v4804_v3 = vadd.f32 %v9720_v30, %v4784_v17  ;;  %v4617_v40 = vmul.f32 %v9764_v26, %v11019_v29  ;;  %v9776_v11 = vadd.f32 %v9689_v35, %v4480_v49 }
 0x2fe   : > { %v4805_v59 = vadd.f32 %v6409_v21, %v4785_v42  ;;  %v4806_v46 = vadd.f32 %v6413_v56, %v4786_v50  ;;  %v4787_v47 = vmul.f32 %v4767_v6, %v11027_v63  ;;  %v4769_v43 = vsub.f32 1.0, %v9754_v54  ;;  %v9792_v50 = vpop.f32.mrf.mxu0 }
 0x2ff   : > { %5774 = vst.msk [vmem:[%s8545_s19 + $0x5] ss:$8 sm:$0x3] %vm8550_vm2, %v4356_v2  ;;  %v4820_v2 = vmul.f32 %v4800_v58, %v9531_v19  ;;  %v4788_v13 = vmul.f32 %v4768_v1, %v10825_v32  ;;  %v4637_v19 = vadd.f32 %v4617_v40, %v10887_v33  ;;  %v4618_v30 = vmul.f32 %v9776_v11, %v10962_v36  ;;  %v9798_v1 = vpop.f32.mrf.mxu1 }
 0x300   : > { %v9787_v15 = vadd.f32 %v9702_v4, %v4481_v52  ;;  %v4821_v35 = vmul.f32 %v4801_v23, %v9537_v25  ;;  %v4842_v12 = vmul.f32 %v4822_v16, %v10824_v45  ;;  %v4823_v21 = vmul.f32 %v4803_v44, %v9574_v27 }
 0x301   : > { %v4770_v56 = vsub.f32 1.0, %v6423_v37  ;;  %v4824_v58 = vmul.f32 %v4804_v3, %v9580_v53  ;;  %v5805_v17 = vmul.f32 -1.442695, %v4637_v19  ;;  %v4638_v42 = vadd.f32 %v4618_v30, %v10966_v34  ;;  %v6425_v4 = vpop.eup %6424  ;;  %v11030_v19 = vld [vmem:[#allocation77_spill] sm:$0xff] }
 0x302   : > { %v4619_v6 = vmul.f32 %v9787_v15, %v10962_v36  ;;  %v4840_v25 = vmul.f32 %v4820_v2, %v10958_v22  ;;  %v4825_v49 = vmul.f32 %v4805_v59, %v9591_v20  ;;  %v4826_v27 = vmul.f32 %v4806_v46, %v9597_v39  ;;  %v9808_v2 = vpop.f32.mrf.mxu0  ;;  %v11031_v39 = vld [vmem:[#allocation76_spill] sm:$0xff] }
 0x303   : > { %v4807_v52 = vadd.f32 %v6417_v8, %v4787_v47  ;;  %v6427_v23 = vpop.eup %6426  ;;  %v4808_v16 = vadd.f32 %v6419_v51, %v4788_v13  ;;  %v4789_v53 = vmul.f32 %v4769_v43, %v10825_v32  ;;  %6436 = vpow2.f32 %v5805_v17  ;;  %v9811_v51 = vpop.f32.mrf.mxu1 }
 0x304   : > { %v5806_v44 = vmul.f32 -1.442695, %v4638_v42  ;;  %v4841_v3 = vmul.f32 %v4821_v35, %v10958_v22  ;;  %v4843_v40 = vmul.f32 %v4823_v21, %v10824_v45  ;;  %v4790_v30 = vmul.f32 %v4770_v56, %v11030_v19  ;;  %v11032_v56 = vld [vmem:[#allocation81_spill] sm:$0xff]  ;;  %v9820_v32 = vpop.f32.mrf.mxu0 }
 0x305   : > { %v4639_v63 = vadd.f32 %v4619_v6, %v10966_v34  ;;  %v6429_v20 = vpop.eup %6428  ;;  %v4860_v59 = vadd.f32 %v4842_v12, %v4840_v25  ;;  %v4844_v8 = vmul.f32 %v4824_v58, %v11031_v39  ;;  %v4771_v46 = vsub.f32 1.0, %v6425_v4 }
 0x306   : > { %6438 = vpow2.f32 %v5806_v44  ;;  %v6431_v47 = vpop.eup %6430  ;;  %v4845_v43 = vmul.f32 %v4825_v49, %v11031_v39  ;;  %v4772_v13 = vsub.f32 1.0, %v6427_v23  ;;  %v4715_v35 = vadd.f32 1.0, %v6429_v20  ;;  %v11033_v44 = vld [vmem:[#allocation11_spill] sm:$0xff]  ;;  %v11034_v39 = vld [vmem:[#allocation12_spill] sm:$0xff] }
 0x307   : > { %v5807_v21 = vmul.f32 -1.442695, %v4639_v63  ;;  %v6433_v17 = vpop.eup %6432  ;;  %v4846_v42 = vmul.f32 %v4826_v27, %v11032_v56  ;;  %v4827_v6 = vmul.f32 %v4807_v52, %v9605_v31  ;;  %v4828_v22 = vmul.f32 %v4808_v16, %v9615_v10  ;;  %v9825_v31 = vpop.f32.mrf.mxu1 }
 0x308   : > { %v4809_v12 = vadd.f32 %v9754_v54, %v4789_v53  ;;  %v4810_v58 = vadd.f32 %v6423_v37, %v4790_v30  ;;  %6440 = vrcp.f32 %v4715_v35  ;;  %v4716_v25 = vadd.f32 1.0, %v6433_v17  ;;  %v11035_v30 = vld [vmem:[#allocation87_spill] sm:$0xff] }
 0x309   : > { %v5014_v45 = vadd.f32 %v9704_v0, %v11033_v44  ;;  %v6435_v49 = vpop.eup %6434  ;;  %v4791_v63 = vmul.f32 %v4771_v46, %v11030_v19  ;;  %v4773_v20 = vsub.f32 1.0, %v6431_v47  ;;  %v5015_v27 = vadd.f32 %v9716_v7, %v11034_v39  ;;  %v11036_v39 = vld [vmem:[#allocation57_spill] sm:$0xff]  ;;  %v9843_v17 = vpop.f32.mrf.mxu1 }
 0x30a   : > { %6442 = vpow2.f32 %v5807_v21  ;;  %v4875_v10 = vadd.f32 %v4843_v40, %v4841_v3  ;;  %v4792_v54 = vmul.f32 %v4772_v13, %v10970_v5  ;;  %v4861_v0 = vadd.f32 %v4860_v59, %v4844_v8  ;;  %v11037_v3 = vld [vmem:[#allocation15_spill] sm:$0xff]  ;;  %v11038_v40 = vld [vmem:[#allocation16_spill] sm:$0xff]  ;;  %v9840_v21 = vpop.f32.mrf.mxu0 }
 0x30b   : > { %6444 = vrcp.f32 %v4716_v25  ;;  %v9829_v37 = vadd.f32 %v9712_v24, %v5014_v45  ;;  %v4847_v52 = vmul.f32 %v4827_v6, %v11032_v56  ;;  %v4829_v16 = vmul.f32 %v4809_v12, %v9621_v38  ;;  %v11040_v6 = vld [vmem:[#allocation55_spill] sm:$0xff]  ;;  %v11042_v25 = vld [vmem:[#allocation41_spill] sm:$0xff] }
 0x30c   : > { %v9834_v53 = vadd.f32 %v9724_v14, %v5015_v27  ;;  %v4848_v7 = vmul.f32 %v4828_v22, %v11035_v30  ;;  %v4830_v46 = vmul.f32 %v4810_v58, %v11036_v39  ;;  %v4774_v35 = vsub.f32 1.0, %v6435_v49  ;;  %v11039_v14 = vld [vmem:[#allocation20_spill] sm:$0xff]  ;;  %v11041_v22 = vld [vmem:[#allocation6_spill] sm:$0xff] }
 0x30d   : > { %v5016_v13 = vadd.f32 %v11038_v40, %v11037_v3  ;;  %v4876_v45 = vadd.f32 %v4875_v10, %v4845_v43  ;;  %v4862_v24 = vadd.f32 %v4861_v0, %v4846_v42  ;;  %v4811_v59 = vadd.f32 %v6425_v4, %v4791_v63  ;;  %v11043_v43 = vld [vmem:[#allocation21_spill] sm:$0xff]  ;;  %v9862_v40 = vpop.f32.mrf.mxu0 }
 0x30e   : > { %v4793_v8 = vmul.f32 %v4773_v20, %v10970_v5  ;;  %v4812_v38 = vadd.f32 %v6427_v23, %v4792_v54  ;;  %v5017_v12 = vadd.f32 %v11040_v6, %v11039_v14  ;;  %v5152_v58 = vmul.f32 %v9829_v37, %v11041_v22  ;;  %v11044_v20 = vld [vmem:[#allocation68_spill] sm:$0xff]  ;;  %v4989_v14 = vpop.f32.mrf.mxu1 }
 0x30f   : > { %v9850_v44 = vadd.f32 %v11042_v25, %v5016_v13  ;;  %v4877_v27 = vadd.f32 %v4876_v45, %v4847_v52  ;;  %v4849_v39 = vmul.f32 %v4829_v16, %v11035_v30  ;;  %v5018_v4 = vadd.f32 %v9750_v28, %v11043_v43  ;;  %v11045_v54 = vld [vmem:[#allocation36_spill] sm:$0xff]  ;;  %v11046_v52 = vld [vmem:[#allocation62_spill] sm:$0xff] }
 0x310   : > { %v5153_v42 = vmul.f32 %v9834_v53, %v11041_v22  ;;  %v6437_v63 = vpop.eup %6436  ;;  %v4863_v23 = vadd.f32 %v4862_v24, %v4848_v7  ;;  %v4850_v10 = vmul.f32 %v4830_v46, %v11044_v20  ;;  %v4794_v0 = vmul.f32 %v4774_v35, %v11045_v54  ;;  %v11047_v22 = vld [vmem:[#allocation65_spill] sm:$0xff]  ;;  %v11049_v25 = vld [vmem:[#allocation22_spill] sm:$0xff] }
 0x311   : > { %v9860_v3 = vadd.f32 %v9745_v61, %v5017_v12  ;;  %v4831_v13 = vmul.f32 %v4811_v59, %v11046_v52  ;;  %v4813_v16 = vadd.f32 %v6431_v47, %v4793_v8  ;;  %v4717_v45 = vadd.f32 1.0, %v6437_v63  ;;  %v11048_v24 = vld [vmem:[#allocation13_spill] sm:$0xff]  ;;  %v11050_v61 = vld [vmem:[#allocation7_spill] sm:$0xff] }
 0x312   : > { %v9866_v28 = vadd.f32 %v9769_v41, %v5018_v4  ;;  %v4832_v7 = vmul.f32 %v4812_v38, %v11047_v22  ;;  %v5172_v46 = vadd.f32 %v5152_v58, %v11048_v24  ;;  %v5019_v35 = vadd.f32 %v9778_v57, %v11049_v25  ;;  %v9880_v58 = vpop.f32.mrf.mxu0  ;;  %v11051_v57 = vld [vmem:[#allocation64_spill] sm:$0xff]  ;;  %v11052_v22 = vld [vmem:[#allocation23_spill] sm:$0xff] }
 0x313   : > { %v6439_v6 = vpop.eup %6438  ;;  %v5154_v12 = vmul.f32 %v9850_v44, %v11050_v61  ;;  %v4878_v43 = vadd.f32 %v4877_v27, %v4849_v39  ;;  %6446 = vrcp.f32 %v4717_v45  ;;  %v5173_v47 = vadd.f32 %v5153_v42, %v11048_v24  ;;  %v11053_v39 = vld [vmem:[#allocation8_spill] sm:$0xff] }
 0x314   : > { %v4718_v59 = vadd.f32 1.0, %v6439_v6  ;;  %v4864_v8 = vadd.f32 %v4863_v23, %v4850_v10  ;;  %v4814_v41 = vadd.f32 %v6435_v49, %v4794_v0  ;;  %v5155_v4 = vmul.f32 %v9860_v3, %v11050_v61  ;;  %v4991_v23 = vpop.f32.mrf.mxu1  ;;  %v11054_v0 = vld [vmem:[#allocation46_spill] sm:$0xff] }
 0x315   : > { %v9878_v38 = vadd.f32 %v9792_v50, %v5019_v35  ;;  %v6441_v63 = vpop.eup %6440  ;;  %v4833_v52 = vmul.f32 %v4813_v16, %v11051_v57  ;;  %v5020_v27 = vadd.f32 %v9798_v1, %v11052_v22  ;;  %v5156_v42 = vmul.f32 %v9866_v28, %v11053_v39  ;;  %v11055_v6 = vld [vmem:[#allocation14_spill] sm:$0xff] }
 0x316   : > { %6448 = vrcp.f32 %v4718_v59  ;;  %v4851_v10 = vmul.f32 %v4831_v13, %v11044_v20  ;;  %v4852_v45 = vmul.f32 %v4832_v7, %v11054_v0  ;;  %v5822_v50 = vmul.f32 -1.442695, %v5172_v46  ;;  %v11056_v16 = vld [vmem:[#allocation26_spill] sm:$0xff]  ;;  %v5109_v7 = vpop.f32.mrf.mxu0  ;;  %v4995_v20 = vpop.f32.mrf.mxu1 }
 0x317   : > { %v6443_v49 = vpop.eup %6442  ;;  %v5174_v24 = vadd.f32 %v5154_v12, %v11055_v6  ;;  %v5823_v61 = vmul.f32 -1.442695, %v5173_v47  ;;  %v5021_v59 = vadd.f32 %v9811_v51, %v11056_v16  ;;  %v9893_v1 = vadd.f32 %v9808_v2, %v5020_v27  ;;  %v11057_v57 = vld [vmem:[#allocation70_spill] sm:$0xff]  ;;  %v11059_v2 = vld [vmem:[#allocation88_spill] sm:$0xff] }
 0x318   : > { %v6445_v25 = vpop.eup %6444  ;;  %v4719_v35 = vadd.f32 1.0, %v6443_v49  ;;  %v4834_v22 = vmul.f32 %v4814_v41, %v11057_v57  ;;  %v5175_v56 = vadd.f32 %v5155_v4, %v11055_v6  ;;  %v5157_v13 = vmul.f32 %v9878_v38, %v11053_v39  ;;  %v11058_v47 = vld [vmem:[#allocation18_spill] sm:$0xff]  ;;  %v11060_v41 = vld [vmem:[#allocation29_spill] sm:$0xff] }
 0x319   : > { %v4776_v30 = vsub.f32 1.0, %v6445_v25  ;;  %v4853_v46 = vmul.f32 %v4833_v52, %v11054_v0  ;;  %v4775_v12 = vsub.f32 1.0, %v6441_v63  ;;  %v5176_v49 = vadd.f32 %v5156_v42, %v11058_v47  ;;  %v11061_v6 = vld [vmem:[#allocation9_spill] sm:$0xff]  ;;  %v11062_v52 = vld [vmem:[#allocation27_spill] sm:$0xff] }
 0x31a   : > { %6450 = vrcp.f32 %v4719_v35  ;;  %v4879_v51 = vadd.f32 %v4878_v43, %v4851_v10  ;;  %v4865_v16 = vadd.f32 %v4864_v8, %v4852_v45  ;;  %v5824_v5 = vmul.f32 -1.442695, %v5174_v24  ;;  %v5113_v8 = vpop.f32.mrf.mxu0  ;;  %v4997_v24 = vpop.f32.mrf.mxu1 }
 0x31b   : > { %v4796_v27 = vmul.f32 %v4776_v30, %v11059_v2  ;;  %6452 = vpow2.f32 %v5822_v50  ;;  %v5022_v4 = vadd.f32 %v9825_v31, %v11060_v41  ;;  %v5158_v39 = vmul.f32 %v9893_v1, %v11061_v6  ;;  %v11063_v50 = vld [vmem:[#allocation33_spill] sm:$0xff] }
 0x31c   : > { %v9907_v57 = vadd.f32 %v9820_v32, %v5021_v59  ;;  %v4854_v35 = vmul.f32 %v4834_v22, %v11062_v52  ;;  %6454 = vpow2.f32 %v5823_v61  ;;  %v5825_v42 = vmul.f32 -1.442695, %v5175_v56  ;;  %v11064_v32 = vld [vmem:[#allocation34_spill] sm:$0xff]  ;;  %v11065_v56 = vld [vmem:[#allocation19_spill] sm:$0xff] }
 0x31d   : > { %v5177_v43 = vadd.f32 %v5157_v13, %v11058_v47  ;;  %v9911_v10 = vadd.f32 %v4879_v51, %v4853_v46  ;;  %v4795_v30 = vmul.f32 %v4775_v12, %v11045_v54  ;;  %v5826_v45 = vmul.f32 -1.442695, %v5176_v49  ;;  %v11066_v13 = vld [vmem:[#allocation38_spill] sm:$0xff] }
 0x31e   : > { %v5023_v31 = vadd.f32 %v9843_v17, %v11063_v50  ;;  %v4816_v41 = vadd.f32 %v6445_v25, %v4796_v27  ;;  %6456 = vpow2.f32 %v5824_v5  ;;  %v5024_v59 = vadd.f32 %v4989_v14, %v11064_v32  ;;  %v11067_v12 = vld [vmem:[#allocation30_spill] sm:$0xff]  ;;  %v5115_v14 = vpop.f32.mrf.mxu0  ;;  %v11068_v27 = vld [vmem:[#allocation35_spill] sm:$0xff] }
 0x31f   : > { %v9918_v22 = vadd.f32 %v9840_v21, %v5022_v4  ;;  %v5178_v61 = vadd.f32 %v5158_v39, %v11065_v56  ;;  %v5025_v47 = vadd.f32 %v4991_v23, %v11066_v13  ;;  %v5159_v46 = vmul.f32 %v9907_v57, %v11061_v6  ;;  %v4999_v39 = vpop.f32.mrf.mxu1  ;;  %v11069_v50 = vld [vmem:[#allocation75_spill] sm:$0xff]  ;;  %v11070_v6 = vld [vmem:[#allocation10_spill] sm:$0xff]  ;;  %v11072_v13 = vld [vmem:[#allocation72_spill] sm:$0xff] }
 0x320   : > { %v5026_v49 = vadd.f32 %v4995_v20, %v11067_v12  ;;  %v6447_v51 = vpop.eup %6446  ;;  %v4866_v0 = vadd.f32 %v4865_v16, %v4854_v35  ;;  %6458 = vpow2.f32 %v5825_v42  ;;  %v5827_v17 = vmul.f32 -1.442695, %v5177_v43 }
 0x321   : > { %v9926_v5 = vadd.f32 %v9862_v40, %v5023_v31  ;;  %v4815_v25 = vadd.f32 %v6441_v63, %v4795_v30  ;;  %v4777_v21 = vsub.f32 1.0, %v6447_v51  ;;  %6460 = vpow2.f32 %v5826_v45  ;;  %v11071_v45 = vld [vmem:[#allocation37_spill] sm:$0xff] }
 0x322   : > { %v5027_v4 = vadd.f32 %v4997_v24, %v11068_v27  ;;  %v4836_v32 = vmul.f32 %v4816_v41, %v11069_v50  ;;  %v5160_v20 = vmul.f32 %v9918_v22, %v11070_v6  ;;  %v9933_v16 = vadd.f32 %v9880_v58, %v5024_v59  ;;  %v5117_v41 = vpop.f32.mrf.mxu0 }
 0x323   : > { %v6449_v23 = vpop.eup %6448  ;;  %v9935_v35 = vadd.f32 %v5109_v7, %v5025_v47  ;;  %v4797_v40 = vmul.f32 %v4777_v21, %v11059_v2  ;;  %v5828_v63 = vmul.f32 -1.442695, %v5178_v61  ;;  %v5179_v43 = vadd.f32 %v5159_v46, %v11065_v56  ;;  %v11073_v7 = vld [vmem:[#allocation47_spill] sm:$0xff]  ;;  %v11074_v61 = vld [vmem:[#allocation86_spill] sm:$0xff]  ;;  %v11075_v56 = vld [vmem:[#allocation25_spill] sm:$0xff] }
 0x324   : > { %v4778_v42 = vsub.f32 1.0, %v6449_v23  ;;  %6462 = vpow2.f32 %v5827_v17  ;;  %v5161_v30 = vmul.f32 %v9926_v5, %v11070_v6  ;;  %v5028_v31 = vadd.f32 %v4999_v39, %v11071_v45  ;;  %v11076_v17 = vld [vmem:[#allocation24_spill] sm:$0xff] }
 0x325   : > { %v9942_v24 = vadd.f32 %v5113_v8, %v5026_v49  ;;  %v4835_v58 = vmul.f32 %v4815_v25, %v11072_v13  ;;  %v4817_v59 = vadd.f32 %v6447_v51, %v4797_v40  ;;  %v9946_v12 = vadd.f32 %v5115_v14, %v5027_v4 }
 0x326   : > { %v4798_v47 = vmul.f32 %v4778_v42, %v11073_v7  ;;  %v4856_v27 = vmul.f32 %v4836_v32, %v11074_v61  ;;  %v5180_v46 = vadd.f32 %v5160_v20, %v11075_v56  ;;  %v5162_v50 = vmul.f32 %v9933_v16, %v11076_v17  ;;  %v11077_v32 = vld [vmem:[#allocation31_spill] sm:$0xff] }
 0x327   : > { %v6451_v21 = vpop.eup %6450  ;;  %v5163_v8 = vmul.f32 %v9935_v35, %v11076_v17  ;;  %v4837_v49 = vmul.f32 %v4817_v59, %v9764_v26  ;;  %v9955_v51 = vadd.f32 %v5117_v41, %v5028_v31  ;;  %6464 = vpow2.f32 %v5828_v63  ;;  %v11078_v41 = vld [vmem:[#allocation32_spill] sm:$0xff] }
 0x328   : > { %v4818_v39 = vadd.f32 %v6449_v23, %v4798_v47  ;;  %v4779_v25 = vsub.f32 1.0, %v6451_v21  ;;  %v6453_v6 = vpop.eup %6452  ;;  %v5829_v14 = vmul.f32 -1.442695, %v5179_v43  ;;  %v5181_v4 = vadd.f32 %v5161_v30, %v11075_v56  ;;  %v11079_v47 = vld [vmem:[#allocation78_spill] sm:$0xff] }
 0x329   : > { %v5164_v20 = vmul.f32 %v9942_v24, %v11077_v32  ;;  %v6455_v40 = vpop.eup %6454  ;;  %v4855_v42 = vmul.f32 %v4835_v58, %v11062_v52  ;;  %v5165_v26 = vmul.f32 %v9946_v12, %v11077_v32  ;;  %v4867_v23 = vadd.f32 %v4866_v0, %v4856_v27  ;;  %v11080_v58 = vld [vmem:[#allocation42_spill] sm:$0xff] }
 0x32a   : > { %v4838_v45 = vmul.f32 %v4818_v39, %v9776_v11  ;;  %v4799_v13 = vmul.f32 %v4779_v25, %v11073_v7  ;;  %v5830_v31 = vmul.f32 -1.442695, %v5180_v46  ;;  %v5182_v63 = vadd.f32 %v5162_v50, %v11078_v41  ;;  %v11081_v25 = vld [vmem:[#allocation43_spill] sm:$0xff] }
 0x32b   : > { %v5183_v43 = vadd.f32 %v5163_v8, %v11078_v41  ;;  %v6457_v30 = vpop.eup %6456  ;;  %v4857_v59 = vmul.f32 %v4837_v49, %v11074_v61  ;;  %v5166_v11 = vmul.f32 %v9955_v51, %v11080_v58  ;;  %6466 = vpow2.f32 %v5829_v14  ;;  %v11082_v14 = vld [vmem:[#allocation49_spill] sm:$0xff]  ;;  %v5001_v61 = vpop.f32.mrf.mxu1 }
 0x32c   : > { %v4858_v56 = vmul.f32 %v4838_v45, %v11079_v47  ;;  %v4819_v17 = vadd.f32 %v6451_v21, %v4799_v13  ;;  %v5831_v39 = vmul.f32 -1.442695, %v5181_v4  ;;  %v5184_v7 = vadd.f32 %v5164_v20, %v11081_v25 }
 0x32d   : > { %v6459_v32 = vpop.eup %6458  ;;  %v4881_v0 = vadd.f32 %v9911_v10, %v4855_v42  ;;  %v5185_v50 = vadd.f32 %v5165_v26, %v11081_v25  ;;  %6468 = vpow2.f32 %v5830_v31  ;;  %v5832_v49 = vmul.f32 -1.442695, %v5182_v63  ;;  %v5119_v31 = vpop.f32.mrf.mxu0  ;;  %v11083_v63 = vld [vmem:[#allocation40_spill] sm:$0xff] }
 0x32e   : > { %v4868_v27 = vadd.f32 %v4867_v23, %v4858_v56  ;;  %v4839_v46 = vmul.f32 %v4819_v17, %v9787_v15  ;;  %v6461_v8 = vpop.eup %6460  ;;  %v5833_v45 = vmul.f32 -1.442695, %v5183_v43  ;;  %v5186_v4 = vadd.f32 %v5166_v11, %v11082_v14 }
 0x32f   : > { %v4882_v21 = vadd.f32 %v4881_v0, %v4857_v59  ;;  %v5834_v20 = vmul.f32 -1.442695, %v5184_v7  ;;  %6470 = vpow2.f32 %v5831_v39  ;;  %v5835_v42 = vmul.f32 -1.442695, %v5185_v50  ;;  %v5005_v59 = vpop.f32.mrf.mxu1 }
 0x330   : > { %v4869_v13 = vrot.slane %v4868_v27, 4  ;;  %v4859_v41 = vmul.f32 %v4839_v46, %v11079_v47  ;;  %6472 = vpow2.f32 %v5832_v49  ;;  %v5836_v23 = vmul.f32 -1.442695, %v5186_v4 }
 0x331   : > { %v6463_v52 = vpop.eup %6462  ;;  %6474 = vpow2.f32 %v5833_v45  ;;  %v5029_v43 = vadd.f32 %v5001_v61, %v11083_v63  ;;  %v5252_v39 = vadd.f32 1.0, %v6453_v6  ;;  %v5254_v46 = vadd.f32 1.0, %v6457_v30  ;;  %v5007_v50 = vpop.f32.mrf.mxu1  ;;  %v11085_v63 = vld [vmem:[#allocation83_spill] sm:$0xff] }
 0x332   : > { %v4870_v2 = vadd.f32 %v4869_v13, %v4868_v27  ;;  %v4883_v10 = vadd.f32 %v4882_v21, %v4859_v41  ;;  %6476 = vpow2.f32 %v5834_v20  ;;  %v5123_v27 = vpop.f32.mrf.mxu0  ;;  %v5255_v21 = vadd.f32 1.0, %v6459_v32  ;;  %v11084_v32 = vld [vmem:[#allocation44_spill] sm:$0xff] }
 0x333   : > { %6478 = vpow2.f32 %v5835_v42  ;;  %v9978_v7 = vadd.f32 %v5119_v31, %v5029_v43  ;;  %v5253_v13 = vadd.f32 1.0, %v6455_v40  ;;  %v5256_v20 = vadd.f32 1.0, %v6461_v8  ;;  %v5009_v6 = vpop.f32.mrf.mxu1 }
 0x334   : > { %v4871_v15 = vrot.slane %v4870_v2, 2  ;;  %v4884_v26 = vrot.slane %v4883_v10, 4  ;;  %v6465_v56 = vpop.eup %6464  ;;  %6480 = vpow2.f32 %v5836_v23  ;;  %v5257_v42 = vadd.f32 1.0, %v6463_v52 }
 0x335   : > { %v5167_v61 = vmul.f32 %v9978_v7, %v11080_v58  ;;  %6482 = vrcp.f32 %v5252_v39  ;;  %v5258_v30 = vadd.f32 1.0, %v6465_v56  ;;  %v5030_v40 = vadd.f32 %v5005_v59, %v11084_v32  ;;  %v11086_v59 = vld [vmem:[#allocation45_spill] sm:$0xff] }
 0x336   : > { %v4872_v17 = vadd.f32 %v4871_v15, %v4870_v2  ;;  %v4885_v11 = vadd.f32 %v4884_v26, %v4883_v10  ;;  %v5125_v10 = vpop.f32.mrf.mxu0  ;;  %6484 = vrcp.f32 %v5254_v46 }
 0x337   : > { %6486 = vrcp.f32 %v5255_v21  ;;  %v5187_v31 = vadd.f32 %v5167_v61, %v11082_v14  ;;  %v5032_v21 = vadd.f32 %v5009_v6, %v11028_v9 }
 0x338   : > { %v4873_v25 = vrot.slane %v4872_v17, 1  ;;  %v4886_v0 = vrot.slane %v4885_v11, 2  ;;  %v6467_v49 = vpop.eup %6466  ;;  %6488 = vrcp.f32 %v5253_v13 }
 0x339   : > { %v5259_v23 = vadd.f32 1.0, %v6467_v49  ;;  %6490 = vrcp.f32 %v5256_v20  ;;  %v5031_v49 = vadd.f32 %v5007_v50, %v11086_v59  ;;  %v5837_v13 = vmul.f32 -1.442695, %v5187_v31 }
 0x33a   : > { %v4887_v45 = vadd.f32 %v4886_v0, %v4885_v11  ;;  %v6469_v41 = vpop.eup %6468  ;;  %v4874_v2 = vadd.f32 %v4873_v25, %v4872_v17  ;;  %v5127_v11 = vpop.f32.mrf.mxu0  ;;  %6492 = vrcp.f32 %v5257_v42  ;;  %v9986_v0 = vadd.f32 %v5123_v27, %v5030_v40 }
 0x33b   : > { %v5260_v8 = vadd.f32 1.0, %v6469_v41  ;;  %v5011_v25 = vpop.f32.mrf.mxu1  ;;  %6494 = vrcp.f32 %v5258_v30  ;;  %v9994_v42 = vadd.f32 %v5125_v10, %v5031_v49  ;;  %v9997_v6 = vadd.f32 %v5127_v11, %v5032_v21 }
 0x33c   : > { %v4888_v4 = vrot.slane %v4887_v45, 1  ;;  %v6471_v26 = vpop.eup %6470  ;;  %v4890_v43 = vadd.f32 %v4874_v2, %v11085_v63  ;;  %6496 = vrcp.f32 %v5259_v23  ;;  %v5033_v27 = vadd.f32 %v5011_v25, %v11029_v55  ;;  %v5129_v2 = vpop.f32.mrf.mxu0 }
 0x33d   : > { %v6473_v58 = vpop.eup %6472  ;;  %v5261_v46 = vadd.f32 1.0, %v6471_v26  ;;  %6498 = vrcp.f32 %v5260_v8  ;;  %v5168_v50 = vmul.f32 %v9986_v0, %v11019_v29  ;;  %v5169_v55 = vmul.f32 %v9994_v42, %v11019_v29 }
 0x33e   : > { %v4889_v15 = vadd.f32 %v4888_v4, %v4887_v45  ;;  %v6475_v52 = vpop.eup %6474  ;;  %v5262_v45 = vadd.f32 1.0, %v6473_v58  ;;  %6500 = vpow2.f32 %v5837_v13  ;;  %v10002_v26 = vadd.f32 %v5129_v2, %v5033_v27  ;;  %v11087_v13 = vld [vmem:[#allocation61_spill] sm:$0xff] }
 0x33f   : > { %v6477_v56 = vpop.eup %6476  ;;  %v5263_v41 = vadd.f32 1.0, %v6475_v52  ;;  %6502 = vrcp.f32 %v5261_v46  ;;  %v5188_v30 = vadd.f32 %v5168_v50, %v10887_v33  ;;  %v5170_v23 = vmul.f32 %v9997_v6, %v10962_v36 }
 0x340   : > { %v4891_v17 = vadd.f32 %v4889_v15, %v11085_v63  ;;  %v6479_v14 = vpop.eup %6478  ;;  %v5264_v20 = vadd.f32 1.0, %v6477_v56  ;;  %6504 = vrcp.f32 %v5262_v45  ;;  %v5189_v31 = vadd.f32 %v5169_v55, %v10887_v33 }
 0x341   : > { %v6481_v4 = vpop.eup %6480  ;;  %v5265_v9 = vadd.f32 1.0, %v6479_v14  ;;  %6506 = vrcp.f32 %v5263_v41  ;;  %v5838_v40 = vmul.f32 -1.442695, %v5188_v30  ;;  %v5171_v58 = vmul.f32 %v10002_v26, %v10962_v36 }
 0x342   : > { %v4894_v39 = vcombine.low %v4890_v43, %v4891_v17  ;;  %v5266_v10 = vadd.f32 1.0, %v6481_v4  ;;  %v6483_v32 = vpop.eup %6482  ;;  %6508 = vrcp.f32 %v5264_v20  ;;  %v5190_v29 = vadd.f32 %v5170_v23, %v10966_v34 }
 0x343   : > { %v6485_v43 = vpop.eup %6484  ;;  %6510 = vrcp.f32 %v5265_v9  ;;  %v5839_v8 = vmul.f32 -1.442695, %v5189_v31  ;;  %v5191_v11 = vadd.f32 %v5171_v58, %v10966_v34 }
 0x344   : > { %v4901_v61 = vrot.slane %v4894_v39, %v10959_v60  ;;  %v6487_v17 = vpop.eup %6486  ;;  %6512 = vpow2.f32 %v5838_v40  ;;  %v5840_v25 = vmul.f32 -1.442695, %v5190_v29  ;;  %v5312_v39 = vsub.f32 1.0, %v6483_v32 }
 0x345   : > { %v6489_v52 = vpop.eup %6488  ;;  %6514 = vrcp.f32 %v5266_v10  ;;  %v5314_v46 = vsub.f32 1.0, %v6485_v43  ;;  %v5841_v33 = vmul.f32 -1.442695, %v5191_v11  ;;  %v5315_v49 = vsub.f32 1.0, %v6487_v17  ;;  %v11088_v11 = vld [vmem:[#allocation69_spill] sm:$0xff] }
 0x346   : > { %v4908_v15 = vrot.slane %v4901_v61, %v10959_v60  ;;  %v6491_v56 = vpop.eup %6490  ;;  %6516 = vpow2.f32 %v5839_v8  ;;  %v5313_v45 = vsub.f32 1.0, %v6489_v52  ;;  %v5332_v61 = vmul.f32 %v5312_v39, %v11087_v13 }
 0x347   : > { %v6493_v59 = vpop.eup %6492  ;;  %6518 = vpow2.f32 %v5840_v25  ;;  %v5334_v34 = vmul.f32 %v5314_v46, %v11022_v48  ;;  %v5335_v27 = vmul.f32 %v5315_v49, %v11022_v48  ;;  %v5316_v2 = vsub.f32 1.0, %v6491_v56 }
 0x348   : > { %5808 = vst.msk [vmem:[%s8545_s19 + $0x6] ss:$8 sm:$0x3] %vm8550_vm2, %v4908_v15  ;;  %v6495_v36 = vpop.eup %6494  ;;  %6520 = vpow2.f32 %v5841_v33  ;;  %v5317_v20 = vsub.f32 1.0, %v6493_v59  ;;  %v5333_v30 = vmul.f32 %v5313_v45, %v11087_v13  ;;  %v5352_v10 = vadd.f32 %v6483_v32, %v5332_v61 }
 0x349   : > { %v6497_v14 = vpop.eup %6496  ;;  %v5318_v50 = vsub.f32 1.0, %v6495_v36  ;;  %v5354_v23 = vadd.f32 %v6485_v43, %v5334_v34  ;;  %v5355_v58 = vadd.f32 %v6487_v17, %v5335_v27  ;;  %v5336_v29 = vmul.f32 %v5316_v2, %v11026_v18 }
 0x34a   : > { %v6499_v21 = vpop.eup %6498  ;;  %v5319_v40 = vsub.f32 1.0, %v6497_v14  ;;  %v5337_v48 = vmul.f32 %v5317_v20, %v11026_v18  ;;  %v5353_v46 = vadd.f32 %v6489_v52, %v5333_v30  ;;  %v5372_v45 = vmul.f32 %v5352_v10, %v9829_v37  ;;  %v11089_v30 = vld [vmem:[#allocation71_spill] sm:$0xff] }
 0x34b   : > { %v6501_v41 = vpop.eup %6500  ;;  %v5338_v25 = vmul.f32 %v5318_v50, %v11088_v11  ;;  %v5320_v33 = vsub.f32 1.0, %v6499_v21  ;;  %v5374_v32 = vmul.f32 %v5354_v23, %v9850_v44  ;;  %v5375_v61 = vmul.f32 %v5355_v58, %v9860_v3 }
 0x34c   : > { %v6503_v4 = vpop.eup %6502  ;;  %v5267_v15 = vadd.f32 1.0, %v6501_v41  ;;  %v5339_v43 = vmul.f32 %v5319_v40, %v11088_v11  ;;  %v5356_v34 = vadd.f32 %v6491_v56, %v5336_v29  ;;  %v5357_v20 = vadd.f32 %v6493_v59, %v5337_v48 }
 0x34d   : > { %v6505_v9 = vpop.eup %6504  ;;  %v5321_v49 = vsub.f32 1.0, %v6503_v4  ;;  %v5358_v50 = vadd.f32 %v6495_v36, %v5338_v25  ;;  %v5340_v62 = vmul.f32 %v5320_v33, %v11089_v30  ;;  %v5373_v59 = vmul.f32 %v5353_v46, %v9834_v53  ;;  %v11090_v36 = vld [vmem:[#allocation74_spill] sm:$0xff]  ;;  %v11091_v33 = vld [vmem:[#allocation80_spill] sm:$0xff] }
 0x34e   : > { %v6507_v55 = vpop.eup %6506  ;;  %6522 = vrcp.f32 %v5267_v15  ;;  %v5322_v27 = vsub.f32 1.0, %v6505_v9  ;;  %v5359_v23 = vadd.f32 %v6497_v14, %v5339_v43  ;;  %v5394_v29 = vmul.f32 %v5374_v32, %v11090_v36  ;;  %v11092_v43 = vld [vmem:[#allocation73_spill] sm:$0xff] }
 0x34f   : > { %v6509_v31 = vpop.eup %6508  ;;  %v5323_v18 = vsub.f32 1.0, %v6507_v55  ;;  %v5341_v37 = vmul.f32 %v5321_v49, %v11089_v30  ;;  %v5376_v48 = vmul.f32 %v5356_v34, %v9866_v28  ;;  %v5377_v25 = vmul.f32 %v5357_v20, %v9878_v38 }
 0x350   : > { %v6511_v8 = vpop.eup %6510  ;;  %v5324_v44 = vsub.f32 1.0, %v6509_v31  ;;  %v5342_v3 = vmul.f32 %v5322_v27, %v11030_v19  ;;  %v5379_v46 = vmul.f32 %v5359_v23, %v9907_v57 }
 0x351   : > { %v6513_v39 = vpop.eup %6512  ;;  %v5325_v40 = vsub.f32 1.0, %v6511_v8  ;;  %v5343_v56 = vmul.f32 %v5323_v18, %v11030_v19  ;;  %v5361_v14 = vadd.f32 %v6503_v4, %v5341_v37  ;;  %v5378_v19 = vmul.f32 %v5358_v50, %v9893_v1  ;;  %v11094_v50 = vld [vmem:[#allocation81_spill] sm:$0xff] }
 0x352   : > { %v6515_v41 = vpop.eup %6514  ;;  %v5268_v13 = vadd.f32 1.0, %v6513_v39  ;;  %v5360_v39 = vadd.f32 %v6499_v21, %v5340_v62  ;;  %v5344_v49 = vmul.f32 %v5324_v44, %v11091_v33  ;;  %v5362_v32 = vadd.f32 %v6505_v9, %v5342_v3  ;;  %v11093_v21 = vld [vmem:[#allocation76_spill] sm:$0xff] }
 0x353   : > { %v6517_v17 = vpop.eup %6516  ;;  %v5326_v58 = vsub.f32 1.0, %v6515_v41  ;;  %v5345_v27 = vmul.f32 %v5325_v40, %v11091_v33  ;;  %v5363_v28 = vadd.f32 %v6507_v55, %v5343_v56  ;;  %v5393_v62 = vmul.f32 %v5373_v59, %v11092_v43  ;;  %v11095_v40 = vld [vmem:[#allocation87_spill] sm:$0xff] }
 0x354   : > { %v6519_v2 = vpop.eup %6518  ;;  %6524 = vrcp.f32 %v5268_v13  ;;  %v5269_v52 = vadd.f32 1.0, %v6517_v17  ;;  %v5392_v13 = vmul.f32 %v5372_v45, %v11092_v43  ;;  %v5395_v17 = vmul.f32 %v5375_v61, %v11090_v36 }
 0x355   : > { %v6521_v15 = vpop.eup %6520  ;;  %v5270_v10 = vadd.f32 1.0, %v6519_v2  ;;  %v5346_v34 = vmul.f32 %v5326_v58, %v11045_v54  ;;  %v5396_v4 = vmul.f32 %v5376_v48, %v11093_v21  ;;  %v5397_v45 = vmul.f32 %v5377_v25, %v11093_v21  ;;  %v11097_v48 = vld [vmem:[#allocation88_spill] sm:$0xff] }
 0x356   : > { %6526 = vrcp.f32 %v5269_v52  ;;  %v5271_v11 = vadd.f32 1.0, %v6521_v15  ;;  %v5412_v38 = vadd.f32 %v5394_v29, %v5392_v13  ;;  %v5380_v61 = vmul.f32 %v5360_v39, %v9918_v22 }
 0x357   : > { %6528 = vrcp.f32 %v5270_v10  ;;  %v5381_v1 = vmul.f32 %v5361_v14, %v9926_v5  ;;  %v5364_v2 = vadd.f32 %v6509_v31, %v5344_v49  ;;  %v5427_v20 = vadd.f32 %v5395_v17, %v5393_v62  ;;  %v11098_v49 = vld [vmem:[#allocation46_spill] sm:$0xff] }
 0x358   : > { %6530 = vrcp.f32 %v5271_v11  ;;  %v5398_v57 = vmul.f32 %v5378_v19, %v11094_v50  ;;  %v5365_v9 = vadd.f32 %v6511_v8, %v5345_v27  ;;  %v5399_v52 = vmul.f32 %v5379_v46, %v11094_v50  ;;  %v11099_v46 = vld [vmem:[#allocation27_spill] sm:$0xff] }
 0x359   : > { %v5382_v15 = vmul.f32 %v5362_v32, %v9933_v16  ;;  %v5383_v30 = vmul.f32 %v5363_v28, %v9935_v35  ;;  %v5366_v37 = vadd.f32 %v6515_v41, %v5346_v34  ;;  %v5413_v44 = vadd.f32 %v5412_v38, %v5396_v4  ;;  %v11096_v16 = vld [vmem:[#allocation68_spill] sm:$0xff] }
 0x35a   : > { %v5428_v22 = vadd.f32 %v5427_v20, %v5397_v45  ;;  %v5400_v5 = vmul.f32 %v5380_v61, %v11095_v40  ;;  %v5401_v31 = vmul.f32 %v5381_v1, %v11095_v40  ;;  %v5384_v11 = vmul.f32 %v5364_v2, %v9942_v24  ;;  %v11101_v61 = vld [vmem:[#allocation86_spill] sm:$0xff] }
 0x35b   : > { %v6523_v53 = vpop.eup %6522  ;;  %v5414_v8 = vadd.f32 %v5413_v44, %v5398_v57  ;;  %v5402_v59 = vmul.f32 %v5382_v15, %v11096_v16  ;;  %v5403_v35 = vmul.f32 %v5383_v30, %v11096_v16  ;;  %v5386_v41 = vmul.f32 %v5366_v37, %v9955_v51 }
 0x35c   : > { %v5327_v18 = vsub.f32 1.0, %v6523_v53  ;;  %v5429_v58 = vadd.f32 %v5428_v22, %v5399_v52 }
 0x35d   : > { %v5415_v24 = vadd.f32 %v5414_v8, %v5400_v5  ;;  %v5406_v32 = vmul.f32 %v5386_v41, %v11099_v46 }
 0x35e   : > { %v5347_v55 = vmul.f32 %v5327_v18, %v11045_v54  ;;  %v5385_v54 = vmul.f32 %v5365_v9, %v9946_v12  ;;  %v5430_v33 = vadd.f32 %v5429_v58, %v5401_v31  ;;  %v5404_v12 = vmul.f32 %v5384_v11, %v11098_v49 }
 0x360   : > { %v5367_v10 = vadd.f32 %v6523_v53, %v5347_v55  ;;  %v5405_v13 = vmul.f32 %v5385_v54, %v11098_v49  ;;  %v5416_v53 = vadd.f32 %v5415_v24, %v5402_v59  ;;  %v5431_v51 = vadd.f32 %v5430_v33, %v5403_v35 }
 0x361   : > { %v6525_v23 = vpop.eup %6524 }
 0x362   : > { %v5328_v3 = vsub.f32 1.0, %v6525_v23  ;;  %v5387_v29 = vmul.f32 %v5367_v10, %v9978_v7  ;;  %v11100_v7 = vld [vmem:[#allocation47_spill] sm:$0xff]  ;;  %v5417_v4 = vadd.f32 %v5416_v53, %v5404_v12  ;;  %v5432_v45 = vadd.f32 %v5431_v51, %v5405_v13 }
 0x363   : > { %v6527_v56 = vpop.eup %6526 }
 0x364   : > { %v6529_v36 = vpop.eup %6528  ;;  %v5348_v25 = vmul.f32 %v5328_v3, %v11097_v48  ;;  %v5329_v39 = vsub.f32 1.0, %v6527_v56  ;;  %v5407_v34 = vmul.f32 %v5387_v29, %v11099_v46  ;;  %v5418_v50 = vadd.f32 %v5417_v4, %v5406_v32 }
 0x365   : > { %v6531_v14 = vpop.eup %6530  ;;  %v5330_v43 = vsub.f32 1.0, %v6529_v36 }
 0x366   : > { %v5368_v17 = vadd.f32 %v6525_v23, %v5348_v25  ;;  %v5349_v19 = vmul.f32 %v5329_v39, %v11097_v48  ;;  %v5331_v27 = vsub.f32 1.0, %v6531_v14  ;;  %v5433_v9 = vadd.f32 %v5432_v45, %v5407_v34 }
 0x367   : > { %v5350_v28 = vmul.f32 %v5330_v43, %v11100_v7 }
 0x368   : > { %v5388_v62 = vmul.f32 %v5368_v17, %v9986_v0  ;;  %v5369_v38 = vadd.f32 %v6527_v56, %v5349_v19  ;;  %v5351_v21 = vmul.f32 %v5331_v27, %v11100_v7 }
 0x369   : > { %v5370_v18 = vadd.f32 %v6529_v36, %v5350_v28 }
 0x36a   : > { %v5408_v1 = vmul.f32 %v5388_v62, %v11101_v61  ;;  %v5389_v2 = vmul.f32 %v5369_v38, %v9994_v42  ;;  %v5371_v20 = vadd.f32 %v6531_v14, %v5351_v21 }
 0x36b   : > { %v5390_v57 = vmul.f32 %v5370_v18, %v9997_v6 }
 0x36c   : > { %v5409_v55 = vmul.f32 %v5389_v2, %v11101_v61  ;;  %v5391_v52 = vmul.f32 %v5371_v20, %v10002_v26  ;;  %v5419_v0 = vadd.f32 %v5418_v50, %v5408_v1 }
 0x36d   : > { %v5410_v15 = vmul.f32 %v5390_v57, %v11079_v47 }
 0x36e   : > { %v5434_v30 = vadd.f32 %v5433_v9, %v5409_v55  ;;  %v5411_v37 = vmul.f32 %v5391_v52, %v11079_v47 }
 0x36f   : > { %v5420_v44 = vadd.f32 %v5419_v0, %v5410_v15 }
 0x370   : > { %v5435_v10 = vadd.f32 %v5434_v30, %v5411_v37 }
 0x371   : > { %v5421_v23 = vrot.slane %v5420_v44, 4 }
 0x372   : > { %v5436_v22 = vrot.slane %v5435_v10, 4 }
 0x373   : > { %v5422_v42 = vadd.f32 %v5421_v23, %v5420_v44 }
 0x374   : > { %v5437_v40 = vadd.f32 %v5436_v22, %v5435_v10 }
 0x375   : > { %v5423_v5 = vrot.slane %v5422_v42, 2 }
 0x376   : > { %v5438_v6 = vrot.slane %v5437_v40, 2 }
 0x377   : > { %v5424_v31 = vadd.f32 %v5423_v5, %v5422_v42 }
 0x378   : > { %v5439_v11 = vadd.f32 %v5438_v6, %v5437_v40 }
 0x379   : > { %v5425_v8 = vrot.slane %v5424_v31, 1 }
 0x37a   : > { %v5440_v54 = vrot.slane %v5439_v11, 1 }
 0x37b   : > { %v5426_v26 = vadd.f32 %v5425_v8, %v5424_v31 }
 0x37c   : > { %v5441_v3 = vadd.f32 %v5440_v54, %v5439_v11 }
 0x37d   : > { %v5442_v56 = vadd.f32 %v5426_v26, %v11085_v63 }
 0x37e   : > { %v5443_v58 = vadd.f32 %v5441_v3, %v11085_v63 }
 0x380   : > { %v5446_v47 = vcombine.low %v5442_v56, %v5443_v58 }
 0x382   : > { %v5453_v16 = vrot.slane %v5446_v47, %v10959_v60 }
 0x384   : > { %v5460_v59 = vrot.slane %v5453_v16, %v10959_v60 }
 0x386   : > { %5842 = vst.msk [vmem:[%s8545_s19 + $0x7] ss:$8 sm:$0x3] %vm8550_vm2, %v5460_v59 }
 0x387 PF: > { %p20_p9 = scmp.ge.s32.totalorder %s6649_s22, 4   ;;  %s11103_s19 = smov %s6560_s20 }
 0x388   : > { %s11104_s20 = smov %s6658_s25  ;;  %s11105_s21 = smov %s6649_s22 }
 0x389   :  { %22 = sbr.rel (!%p20_p9) target bundleno = 5 (0x5), region = 157 }

</bundles_post_ra>
